<compile_context>
chip_gen: v5e
topology: v5e:2x2
jax: 0.10.0
libtpu: 0.0.40
codegen_flags: <defaults>
</compile_context>

<pallas_src>
import functools

import jax
import jax.numpy as jnp
import jax.scipy.linalg as jsl
from jax.experimental import pallas as pl
from jax.experimental.pallas import tpu as pltpu


# Target gate-major column order inside the kernel: [i, f, o, g].
# PyTorch nn.LSTM stores gates in order [i, f, g, o]; this maps target slot
# -> source gate index.
_GATE_PERM = (0, 1, 3, 2)


# --------------------------------------------------------------------------
# Single fused kernel: merged LSTM recurrence -> 2x NetVLAD -> MLP head
# --------------------------------------------------------------------------
def _fused_forward_kernel(
    xw_ref,        # (T, R=4B, 16H)  x @ W_ih + b, gate-major / group-minor cols
    lens_ref,      # (R, 4H) int32   clamped lengths per (row, group column block)
    valid_ref,     # (R, 4H) f32     1.0 where original length > 0
    whh_ref,       # (4H, 16H)       block-diagonal merged recurrent weights
    clusters_ref, cbias_ref, clusters2_ref, projf_ref, gate_w_ref, gate_b_ref,
                   # (2,H,K), (2,1,K), (2,K,H), (2,K*H,O), (2,O,O), (2,1,O)
    fc1_w_ref, fc1_b_ref, fcout_w_ref, fcout_b_ref,
    out_ref,       # (B, output_dim)
):
    T, R, _ = xw_ref.shape
    HG = whh_ref.shape[0]          # 4H (= 128 for H=32)
    H = HG // 4
    B = R // 4
    K = clusters_ref.shape[2]
    O = gate_w_ref.shape[1]

    # ---------------- merged packed-sequence LSTM recurrence ----------------
    lens = lens_ref[...]                                   # (R, 4H), one vreg
    masks = [lens > t for t in range(T)]                   # hoisted off the chain

    h = jnp.zeros((R, HG), jnp.float32)
    c = jnp.zeros((R, HG), jnp.float32)
    for t in range(T):                                     # T static -> full unroll
        # one lane-dense (R,128)@(128,512) matmul per step for all 4 groups
        gates = xw_ref[t] + jnp.dot(h, whh_ref[...],
                                    preferred_element_type=jnp.float32)
        sig = jax.nn.sigmoid(gates[:, 0:3 * HG])           # i|f|o in one pass
        i_g = sig[:, 0:HG]
        f_g = sig[:, HG:2 * HG]
        o_g = sig[:, 2 * HG:3 * HG]
        g_g = jnp.tanh(gates[:, 3 * HG:4 * HG])
        c_new = f_g * c + i_g * g_g
        h_new = o_g * jnp.tanh(c_new)
        m = masks[t]
        h = jnp.where(m, h_new, h)
        c = jnp.where(m, c_new, c)
    h = h * valid_ref[...]          # zero slots whose original length was 0

    # h column blocks: 0 acc_subject, 1 acc_neighbors, 2 mic_subject, 3 mic_neighbors
    # neighbor rows: row = j*B + b (j = neighbor slot 0..3 <-> original slot 1..4)
    def modality(m, g_s, g_n):
        h_s = h[0:B, g_s * H:(g_s + 1) * H]                # (B, H)   subject
        h_n = h[:, g_n * H:(g_n + 1) * H]                  # (4B, H)  neighbors (full rows)

        clusters = clusters_ref[m]                         # (H, K)
        cbias = cbias_ref[m]                               # (1, K)
        clusters2 = clusters2_ref[m]                       # (K, H)

        def soft_assign(hblk):
            lg = jnp.dot(hblk, clusters, preferred_element_type=jnp.float32) + cbias
            lg = lg - jnp.max(lg, axis=-1, keepdims=True)
            e = jnp.exp(lg)
            return e * pl.reciprocal(jnp.sum(e, axis=-1, keepdims=True), approx=True)

        a_s = soft_assign(h_s)                             # (B, K)
        a_n = soft_assign(h_n)                             # (4B, K)

        # VLAD aggregation over the 5 slots (tiny static loop, pure VPU)
        a_sum = a_s
        vlad = a_s[:, :, None] * h_s[:, None, :]           # (B, K, H)
        for j in range(4):
            a_j = a_n[j * B:(j + 1) * B]
            h_j = h_n[j * B:(j + 1) * B]
            a_sum = a_sum + a_j
            vlad = vlad + a_j[:, :, None] * h_j[:, None, :]
        vlad = vlad - a_sum[:, :, None] * clusters2

        # intra-normalization over features, then global L2 (EUP rsqrt path)
        vlad = vlad * jax.lax.rsqrt(
            jnp.sum(vlad * vlad, axis=2, keepdims=True) + 1e-12)
        vlad = vlad * jax.lax.rsqrt(
            jnp.sum(jnp.sum(vlad * vlad, axis=2, keepdims=True),
                    axis=1, keepdims=True) + 1e-12)

        # single (B, K*H) @ (K*H, O) contraction; flatten via lane-axis concat
        vlad_flat = jnp.concatenate([vlad[:, k, :] for k in range(K)], axis=-1)
        out = jnp.dot(vlad_flat, projf_ref[m], preferred_element_type=jnp.float32)

        # context gating
        g = (jnp.dot(out, gate_w_ref[m], preferred_element_type=jnp.float32)
             + gate_b_ref[m])
        return out * jax.nn.sigmoid(g)                     # (B, O)

    v_acc = modality(0, 0, 1)
    v_mic = modality(1, 2, 3)

    # ---------------- MLP head: fc1 + relu + fcout --------------------------
    fc1_w = fc1_w_ref[...]                                 # (2O, 8)
    hidden = (jnp.dot(v_acc, fc1_w[0:O, :], preferred_element_type=jnp.float32)
              + jnp.dot(v_mic, fc1_w[O:2 * O, :], preferred_element_type=jnp.float32)
              + fc1_b_ref[...])
    hidden = jnp.maximum(hidden, 0.0)
    out_ref[...] = (jnp.dot(hidden, fcout_w_ref[...],
                            preferred_element_type=jnp.float32) + fcout_b_ref[...])


# --------------------------------------------------------------------------
# Host-side (plain XLA) weight merge & layout prep
# --------------------------------------------------------------------------
def _merge_whh(whh_stack):
    """(4, H, 4H) PyTorch-ordered (i,f,g,o cols) -> block-diag (4H, 16H), gate-major."""
    H = whh_stack.shape[1]
    blocks = []
    for src in _GATE_PERM:                                  # target order i, f, o, g
        per_group = [whh_stack[g, :, src * H:(src + 1) * H] for g in range(4)]
        blocks.append(jsl.block_diag(*per_group))           # (4H, 4H)
    return jnp.concatenate(blocks, axis=1)                   # (4H, 16H)


def _gate_reorder_concat(xw_groups, H):
    """4x (T, R, 4H) per-group xw (PyTorch i,f,g,o cols) -> (T, R, 16H) gate-major."""
    cols = []
    for src in _GATE_PERM:
        for xwg in xw_groups:
            cols.append(xwg[..., src * H:(src + 1) * H])
    return jnp.concatenate(cols, axis=-1)


# --------------------------------------------------------------------------
# Wrapper: host-side layout prep + one pallas_call
# --------------------------------------------------------------------------
def lstm_model_forward(params, x_acc, x_mic, acc_lens, mic_lens):
    N, T, D = x_acc.shape
    B = N // 5
    R = 4 * B
    H = params["lstm_whh"].shape[1]
    K = params["vlad_clusters"].shape[2]
    O = params["vlad_proj"].shape[3]

    wih = params["lstm_wih"]        # (4, D, 4H)
    bias = params["lstm_b"]         # (4, 1, 4H)

    # input projection in plain XLA (lane-dense xw fed to the kernel)
    def per_modality_xw(x, g_s, g_n):
        xg = x.astype(jnp.float32).reshape(B, 5, T, D)
        xs = jnp.transpose(xg[:, 0], (1, 0, 2))                        # (T, B, D)
        xn = jnp.transpose(xg[:, 1:5], (2, 1, 0, 3)).reshape(T, R, D)  # (T, 4B, D)
        xw_s = jnp.einsum("tbd,df->tbf", xs, wih[g_s]) + bias[g_s]     # (T, B, 4H)
        xw_s = jnp.pad(xw_s, ((0, 0), (0, R - B), (0, 0)))             # (T, R, 4H)
        xw_n = jnp.einsum("tbd,df->tbf", xn, wih[g_n]) + bias[g_n]     # (T, R, 4H)
        return xw_s, xw_n

    xw_as, xw_an = per_modality_xw(x_acc, 0, 1)
    xw_ms, xw_mn = per_modality_xw(x_mic, 2, 3)
    xw = _gate_reorder_concat([xw_as, xw_an, xw_ms, xw_mn], H)         # (T, R, 16H)

    def per_modality_lens(lens):
        lg = lens.astype(jnp.int32).reshape(B, 5)
        subj = lg[:, 0]                                    # (B,)
        nbr = lg[:, 1:5].T.reshape(R)                      # (4B,), row = j*B + b
        subj_clamp = jnp.concatenate(
            [jnp.maximum(subj, 1), jnp.zeros((R - B,), jnp.int32)])
        subj_valid = jnp.concatenate(
            [(subj > 0).astype(jnp.float32), jnp.zeros((R - B,), jnp.float32)])
        nbr_clamp = jnp.maximum(nbr, 1)
        nbr_valid = (nbr > 0).astype(jnp.float32)
        return subj_clamp, nbr_clamp, subj_valid, nbr_valid

    asc, anc, asv, anv = per_modality_lens(acc_lens)
    msc, mnc, msv, mnv = per_modality_lens(mic_lens)

    def col_blocks(vs):             # 4x (R,) -> (R, 4H), group-block layout
        return jnp.concatenate(
            [jnp.broadcast_to(v[:, None], (R, H)) for v in vs], axis=1)

    lens_all = col_blocks([asc, anc, msc, mnc])            # (R, 4H) int32
    valid_all = col_blocks([asv, anv, msv, mnv])           # (R, 4H) f32

    whh_bd = _merge_whh(params["lstm_whh"])                # (4H, 16H)
    projf = params["vlad_proj"].reshape(2, K * H, O)       # (2, K*H, O)

    args = (
        xw, lens_all, valid_all, whh_bd,
        params["vlad_clusters"], params["vlad_cbias"], params["vlad_clusters2"],
        projf, params["vlad_gate_w"], params["vlad_gate_b"],
        params["fc1_w"], params["fc1_b"], params["fcout_w"], params["fcout_b"],
    )
    vmem = pl.BlockSpec(memory_space=pltpu.MemorySpace.VMEM)
    out = pl.pallas_call(
        _fused_forward_kernel,
        out_shape=jax.ShapeDtypeStruct((B, params["fcout_w"].shape[1]), jnp.float32),
        in_specs=[vmem] * len(args),
        out_specs=vmem,
    )(*args)
    return out.reshape(-1)


# --------------------------------------------------------------------------
# Deterministic parameter init (same tensor shapes as the nn.Module __init__)
# --------------------------------------------------------------------------
def init_params(key, input_dim, hidden_dim, cluster_size, cluster_output_dim,
                output_dim):
    H, D, K, O = hidden_dim, input_dim, cluster_size, cluster_output_dim
    ks = iter(jax.random.split(key, 48))

    def one_lstm():
        s = 1.0 / jnp.sqrt(jnp.float32(H))
        wih = jax.random.normal(next(ks), (4 * H, D), jnp.float32) * s
        whh = jax.random.normal(next(ks), (4 * H, H), jnp.float32) * s
        bih = jax.random.normal(next(ks), (4 * H,), jnp.float32) * s
        bhh = jax.random.normal(next(ks), (4 * H,), jnp.float32) * s
        # kernel/wrapper consume transposed weights + fused bias
        return wih.T, whh.T, (bih + bhh).reshape(1, 4 * H)

    # group order: 0 acc_subject, 1 acc_neighbors, 2 mic_subject, 3 mic_neighbors
    lstms = [one_lstm() for _ in range(4)]

    def one_vlad():
        sD = 1.0 / jnp.sqrt(jnp.float32(H))
        sK = 1.0 / jnp.sqrt(jnp.float32(K))
        sO = 1.0 / jnp.sqrt(jnp.float32(O))
        return dict(
            clusters=jax.random.normal(next(ks), (H, K), jnp.float32) * sD,
            cbias=jax.random.normal(next(ks), (1, K), jnp.float32) * sD,
            clusters2=jax.random.normal(next(ks), (K, H), jnp.float32) * sD,
            proj=jax.random.normal(next(ks), (K, H, O), jnp.float32) * sK,
            gate_w=jax.random.normal(next(ks), (O, O), jnp.float32) * sO,
            gate_b=jax.random.normal(next(ks), (1, O), jnp.float32) * sO,
        )

    vl = [one_vlad(), one_vlad()]        # modality order: 0 acc, 1 mic

    return dict(
        lstm_wih=jnp.stack([w for w, _, _ in lstms]),       # (4, D, 4H)
        lstm_whh=jnp.stack([w for _, w, _ in lstms]),       # (4, H, 4H)
        lstm_b=jnp.stack([b for _, _, b in lstms]),         # (4, 1, 4H)
        vlad_clusters=jnp.stack([v["clusters"] for v in vl]),
        vlad_cbias=jnp.stack([v["cbias"] for v in vl]),
        vlad_clusters2=jnp.stack([v["clusters2"] for v in vl]),
        vlad_proj=jnp.stack([v["proj"] for v in vl]),
        vlad_gate_w=jnp.stack([v["gate_w"] for v in vl]),
        vlad_gate_b=jnp.stack([v["gate_b"] for v in vl]),
        fc1_w=jax.random.normal(next(ks), (2 * O, 8), jnp.float32)
        / jnp.sqrt(jnp.float32(2 * O)),
        fc1_b=jnp.zeros((1, 8), jnp.float32),
        fcout_w=jax.random.normal(next(ks), (8, output_dim), jnp.float32)
        / jnp.sqrt(jnp.float32(8)),
        fcout_b=jnp.zeros((1, output_dim), jnp.float32),
    )


if __name__ == "__main__":
    key = jax.random.PRNGKey(0)

    # model config (small, consistent with the forward pass)
    input_dim, hidden_dim, layer_dim = 4, 32, 1
    batch_size = 2                       # groups; total sequences N = 5 * batch_size
    cluster_size, cluster_output_dim, output_dim = 8, 16, 1
    seq_len = 8
    N = 5 * batch_size

    kp, kx1, kx2 = jax.random.split(key, 3)
    params = init_params(kp, input_dim, hidden_dim, cluster_size,
                         cluster_output_dim, output_dim)

    x_acc = jax.random.normal(kx1, (N, seq_len, input_dim), jnp.float32)
    x_mic = jax.random.normal(kx2, (N, seq_len, input_dim), jnp.float32)
    acc_lens = jnp.array([3, 8, 0, 5, 2, 7, 1, 4, 6, 8], jnp.int32)
    mic_lens = jnp.array([8, 0, 4, 6, 1, 2, 5, 3, 7, 0], jnp.int32)

    fwd = jax.jit(functools.partial(lstm_model_forward, params))
    out = fwd(x_acc, x_mic, acc_lens, mic_lens)
    jax.block_until_ready(out)
    assert out.shape == (batch_size * output_dim,)
    print("KERNEL_OK")
</pallas_src>

<mosaic_0001>
module attributes {stable_mosaic.version = 11 : i64} {
  func.func @_fused_forward_kernel(%arg0: memref<8x8x512xf32, #tpu.memory_space<vmem>>, %arg1: memref<8x128xi32, #tpu.memory_space<vmem>>, %arg2: memref<8x128xf32, #tpu.memory_space<vmem>>, %arg3: memref<128x512xf32, #tpu.memory_space<vmem>>, %arg4: memref<2x32x8xf32, #tpu.memory_space<vmem>>, %arg5: memref<2x1x8xf32, #tpu.memory_space<vmem>>, %arg6: memref<2x8x32xf32, #tpu.memory_space<vmem>>, %arg7: memref<2x256x16xf32, #tpu.memory_space<vmem>>, %arg8: memref<2x16x16xf32, #tpu.memory_space<vmem>>, %arg9: memref<2x1x16xf32, #tpu.memory_space<vmem>>, %arg10: memref<32x8xf32, #tpu.memory_space<vmem>>, %arg11: memref<1x8xf32, #tpu.memory_space<vmem>>, %arg12: memref<8x1xf32, #tpu.memory_space<vmem>>, %arg13: memref<1x1xf32, #tpu.memory_space<vmem>>, %arg14: memref<2x1xf32, #tpu.memory_space<vmem>>) attributes {dimension_semantics = [], scalar_prefetch = 0 : i64, scratch_operands = 0 : i64, tpu.core_type = #tpu.core_type<tc>} {
    %c0 = arith.constant 0 : index
    %c0_0 = arith.constant 0 : index
    %0 = vector.load %arg1[%c0, %c0_0] : memref<8x128xi32, #tpu.memory_space<vmem>>, vector<8x128xi32>
    %c0_i32 = arith.constant 0 : i32
    %1 = vector.broadcast %c0_i32 : i32 to vector<8x128xi32>
    %2 = arith.cmpi sgt, %0, %1 : vector<8x128xi32>
    %c1_i32 = arith.constant 1 : i32
    %3 = vector.broadcast %c1_i32 : i32 to vector<8x128xi32>
    %4 = arith.cmpi sgt, %0, %3 : vector<8x128xi32>
    %c2_i32 = arith.constant 2 : i32
    %5 = vector.broadcast %c2_i32 : i32 to vector<8x128xi32>
    %6 = arith.cmpi sgt, %0, %5 : vector<8x128xi32>
    %c3_i32 = arith.constant 3 : i32
    %7 = vector.broadcast %c3_i32 : i32 to vector<8x128xi32>
    %8 = arith.cmpi sgt, %0, %7 : vector<8x128xi32>
    %c4_i32 = arith.constant 4 : i32
    %9 = vector.broadcast %c4_i32 : i32 to vector<8x128xi32>
    %10 = arith.cmpi sgt, %0, %9 : vector<8x128xi32>
    %c5_i32 = arith.constant 5 : i32
    %11 = vector.broadcast %c5_i32 : i32 to vector<8x128xi32>
    %12 = arith.cmpi sgt, %0, %11 : vector<8x128xi32>
    %c6_i32 = arith.constant 6 : i32
    %13 = vector.broadcast %c6_i32 : i32 to vector<8x128xi32>
    %14 = arith.cmpi sgt, %0, %13 : vector<8x128xi32>
    %c7_i32 = arith.constant 7 : i32
    %15 = vector.broadcast %c7_i32 : i32 to vector<8x128xi32>
    %16 = arith.cmpi sgt, %0, %15 : vector<8x128xi32>
    %cst = arith.constant 0.000000e+00 : f32
    %17 = vector.broadcast %cst : f32 to vector<8x128xf32>
    %cst_1 = arith.constant 0.000000e+00 : f32
    %18 = vector.broadcast %cst_1 : f32 to vector<8x128xf32>
    %c0_2 = arith.constant 0 : index
    %c0_3 = arith.constant 0 : index
    %c0_4 = arith.constant 0 : index
    %19 = vector.load %arg0[%c0_2, %c0_3, %c0_4] : memref<8x8x512xf32, #tpu.memory_space<vmem>>, vector<1x8x512xf32>
    %20 = vector.shape_cast %19 : vector<1x8x512xf32> to vector<8x512xf32>
    %c0_5 = arith.constant 0 : index
    %c0_6 = arith.constant 0 : index
    %21 = vector.load %arg3[%c0_5, %c0_6] : memref<128x512xf32, #tpu.memory_space<vmem>>, vector<128x512xf32>
    %cst_7 = arith.constant dense<0.000000e+00> : vector<8x512xf32>
    %22 = tpu.matmul %17, %21, %cst_7 {dimension_numbers = #tpu.dot_dimension_numbers<[1], [0], [0], [1], [0, 0, 1, 1], [], []>} : vector<8x128xf32>, vector<128x512xf32>, vector<8x512xf32> -> vector<8x512xf32>
    %23 = arith.addf %20, %22 : vector<8x512xf32>
    %24 = vector.extract_strided_slice %23 {offsets = [0, 0], sizes = [8, 384], strides = [1, 1]} : vector<8x512xf32> to vector<8x384xf32>
    %25 = arith.negf %24 : vector<8x384xf32>
    %26 = math.exp %25 : vector<8x384xf32>
    %cst_8 = arith.constant 1.000000e+00 : f32
    %27 = vector.broadcast %cst_8 : f32 to vector<8x384xf32>
    %28 = arith.addf %27, %26 : vector<8x384xf32>
    %29 = arith.divf %27, %28 : vector<8x384xf32>
    %30 = vector.extract_strided_slice %29 {offsets = [0, 0], sizes = [8, 128], strides = [1, 1]} : vector<8x384xf32> to vector<8x128xf32>
    %31 = vector.extract_strided_slice %29 {offsets = [0, 128], sizes = [8, 128], strides = [1, 1]} : vector<8x384xf32> to vector<8x128xf32>
    %32 = vector.extract_strided_slice %29 {offsets = [0, 256], sizes = [8, 128], strides = [1, 1]} : vector<8x384xf32> to vector<8x128xf32>
    %33 = vector.extract_strided_slice %23 {offsets = [0, 384], sizes = [8, 128], strides = [1, 1]} : vector<8x512xf32> to vector<8x128xf32>
    %34 = math.tanh %33 : vector<8x128xf32>
    %35 = arith.mulf %31, %18 : vector<8x128xf32>
    %36 = arith.mulf %30, %34 : vector<8x128xf32>
    %37 = arith.addf %35, %36 : vector<8x128xf32>
    %38 = math.tanh %37 : vector<8x128xf32>
    %39 = arith.mulf %32, %38 : vector<8x128xf32>
    %40 = arith.select %2, %39, %17 : vector<8x128xi1>, vector<8x128xf32>
    %41 = arith.select %2, %37, %18 : vector<8x128xi1>, vector<8x128xf32>
    %c1 = arith.constant 1 : index
    %c0_9 = arith.constant 0 : index
    %c0_10 = arith.constant 0 : index
    %42 = vector.load %arg0[%c1, %c0_9, %c0_10] : memref<8x8x512xf32, #tpu.memory_space<vmem>>, vector<1x8x512xf32>
    %43 = vector.shape_cast %42 : vector<1x8x512xf32> to vector<8x512xf32>
    %c0_11 = arith.constant 0 : index
    %c0_12 = arith.constant 0 : index
    %44 = vector.load %arg3[%c0_11, %c0_12] : memref<128x512xf32, #tpu.memory_space<vmem>>, vector<128x512xf32>
    %cst_13 = arith.constant dense<0.000000e+00> : vector<8x512xf32>
    %45 = tpu.matmul %40, %44, %cst_13 {dimension_numbers = #tpu.dot_dimension_numbers<[1], [0], [0], [1], [0, 0, 1, 1], [], []>} : vector<8x128xf32>, vector<128x512xf32>, vector<8x512xf32> -> vector<8x512xf32>
    %46 = arith.addf %43, %45 : vector<8x512xf32>
    %47 = vector.extract_strided_slice %46 {offsets = [0, 0], sizes = [8, 384], strides = [1, 1]} : vector<8x512xf32> to vector<8x384xf32>
    %48 = arith.negf %47 : vector<8x384xf32>
    %49 = math.exp %48 : vector<8x384xf32>
    %cst_14 = arith.constant 1.000000e+00 : f32
    %50 = vector.broadcast %cst_14 : f32 to vector<8x384xf32>
    %51 = arith.addf %50, %49 : vector<8x384xf32>
    %52 = arith.divf %50, %51 : vector<8x384xf32>
    %53 = vector.extract_strided_slice %52 {offsets = [0, 0], sizes = [8, 128], strides = [1, 1]} : vector<8x384xf32> to vector<8x128xf32>
    %54 = vector.extract_strided_slice %52 {offsets = [0, 128], sizes = [8, 128], strides = [1, 1]} : vector<8x384xf32> to vector<8x128xf32>
    %55 = vector.extract_strided_slice %52 {offsets = [0, 256], sizes = [8, 128], strides = [1, 1]} : vector<8x384xf32> to vector<8x128xf32>
    %56 = vector.extract_strided_slice %46 {offsets = [0, 384], sizes = [8, 128], strides = [1, 1]} : vector<8x512xf32> to vector<8x128xf32>
    %57 = math.tanh %56 : vector<8x128xf32>
    %58 = arith.mulf %54, %41 : vector<8x128xf32>
    %59 = arith.mulf %53, %57 : vector<8x128xf32>
    %60 = arith.addf %58, %59 : vector<8x128xf32>
    %61 = math.tanh %60 : vector<8x128xf32>
    %62 = arith.mulf %55, %61 : vector<8x128xf32>
    %63 = arith.select %4, %62, %40 : vector<8x128xi1>, vector<8x128xf32>
    %64 = arith.select %4, %60, %41 : vector<8x128xi1>, vector<8x128xf32>
    %c2 = arith.constant 2 : index
    %c0_15 = arith.constant 0 : index
    %c0_16 = arith.constant 0 : index
    %65 = vector.load %arg0[%c2, %c0_15, %c0_16] : memref<8x8x512xf32, #tpu.memory_space<vmem>>, vector<1x8x512xf32>
    %66 = vector.shape_cast %65 : vector<1x8x512xf32> to vector<8x512xf32>
    %c0_17 = arith.constant 0 : index
    %c0_18 = arith.constant 0 : index
    %67 = vector.load %arg3[%c0_17, %c0_18] : memref<128x512xf32, #tpu.memory_space<vmem>>, vector<128x512xf32>
    %cst_19 = arith.constant dense<0.000000e+00> : vector<8x512xf32>
    %68 = tpu.matmul %63, %67, %cst_19 {dimension_numbers = #tpu.dot_dimension_numbers<[1], [0], [0], [1], [0, 0, 1, 1], [], []>} : vector<8x128xf32>, vector<128x512xf32>, vector<8x512xf32> -> vector<8x512xf32>
    %69 = arith.addf %66, %68 : vector<8x512xf32>
    %70 = vector.extract_strided_slice %69 {offsets = [0, 0], sizes = [8, 384], strides = [1, 1]} : vector<8x512xf32> to vector<8x384xf32>
    %71 = arith.negf %70 : vector<8x384xf32>
    %72 = math.exp %71 : vector<8x384xf32>
    %cst_20 = arith.constant 1.000000e+00 : f32
    %73 = vector.broadcast %cst_20 : f32 to vector<8x384xf32>
    %74 = arith.addf %73, %72 : vector<8x384xf32>
    %75 = arith.divf %73, %74 : vector<8x384xf32>
    %76 = vector.extract_strided_slice %75 {offsets = [0, 0], sizes = [8, 128], strides = [1, 1]} : vector<8x384xf32> to vector<8x128xf32>
    %77 = vector.extract_strided_slice %75 {offsets = [0, 128], sizes = [8, 128], strides = [1, 1]} : vector<8x384xf32> to vector<8x128xf32>
    %78 = vector.extract_strided_slice %75 {offsets = [0, 256], sizes = [8, 128], strides = [1, 1]} : vector<8x384xf32> to vector<8x128xf32>
    %79 = vector.extract_strided_slice %69 {offsets = [0, 384], sizes = [8, 128], strides = [1, 1]} : vector<8x512xf32> to vector<8x128xf32>
    %80 = math.tanh %79 : vector<8x128xf32>
    %81 = arith.mulf %77, %64 : vector<8x128xf32>
    %82 = arith.mulf %76, %80 : vector<8x128xf32>
    %83 = arith.addf %81, %82 : vector<8x128xf32>
    %84 = math.tanh %83 : vector<8x128xf32>
    %85 = arith.mulf %78, %84 : vector<8x128xf32>
    %86 = arith.select %6, %85, %63 : vector<8x128xi1>, vector<8x128xf32>
    %87 = arith.select %6, %83, %64 : vector<8x128xi1>, vector<8x128xf32>
    %c3 = arith.constant 3 : index
    %c0_21 = arith.constant 0 : index
    %c0_22 = arith.constant 0 : index
    %88 = vector.load %arg0[%c3, %c0_21, %c0_22] : memref<8x8x512xf32, #tpu.memory_space<vmem>>, vector<1x8x512xf32>
    %89 = vector.shape_cast %88 : vector<1x8x512xf32> to vector<8x512xf32>
    %c0_23 = arith.constant 0 : index
    %c0_24 = arith.constant 0 : index
    %90 = vector.load %arg3[%c0_23, %c0_24] : memref<128x512xf32, #tpu.memory_space<vmem>>, vector<128x512xf32>
    %cst_25 = arith.constant dense<0.000000e+00> : vector<8x512xf32>
    %91 = tpu.matmul %86, %90, %cst_25 {dimension_numbers = #tpu.dot_dimension_numbers<[1], [0], [0], [1], [0, 0, 1, 1], [], []>} : vector<8x128xf32>, vector<128x512xf32>, vector<8x512xf32> -> vector<8x512xf32>
    %92 = arith.addf %89, %91 : vector<8x512xf32>
    %93 = vector.extract_strided_slice %92 {offsets = [0, 0], sizes = [8, 384], strides = [1, 1]} : vector<8x512xf32> to vector<8x384xf32>
    %94 = arith.negf %93 : vector<8x384xf32>
    %95 = math.exp %94 : vector<8x384xf32>
    %cst_26 = arith.constant 1.000000e+00 : f32
    %96 = vector.broadcast %cst_26 : f32 to vector<8x384xf32>
    %97 = arith.addf %96, %95 : vector<8x384xf32>
    %98 = arith.divf %96, %97 : vector<8x384xf32>
    %99 = vector.extract_strided_slice %98 {offsets = [0, 0], sizes = [8, 128], strides = [1, 1]} : vector<8x384xf32> to vector<8x128xf32>
    %100 = vector.extract_strided_slice %98 {offsets = [0, 128], sizes = [8, 128], strides = [1, 1]} : vector<8x384xf32> to vector<8x128xf32>
    %101 = vector.extract_strided_slice %98 {offsets = [0, 256], sizes = [8, 128], strides = [1, 1]} : vector<8x384xf32> to vector<8x128xf32>
    %102 = vector.extract_strided_slice %92 {offsets = [0, 384], sizes = [8, 128], strides = [1, 1]} : vector<8x512xf32> to vector<8x128xf32>
    %103 = math.tanh %102 : vector<8x128xf32>
    %104 = arith.mulf %100, %87 : vector<8x128xf32>
    %105 = arith.mulf %99, %103 : vector<8x128xf32>
    %106 = arith.addf %104, %105 : vector<8x128xf32>
    %107 = math.tanh %106 : vector<8x128xf32>
    %108 = arith.mulf %101, %107 : vector<8x128xf32>
    %109 = arith.select %8, %108, %86 : vector<8x128xi1>, vector<8x128xf32>
    %110 = arith.select %8, %106, %87 : vector<8x128xi1>, vector<8x128xf32>
    %c4 = arith.constant 4 : index
    %c0_27 = arith.constant 0 : index
    %c0_28 = arith.constant 0 : index
    %111 = vector.load %arg0[%c4, %c0_27, %c0_28] : memref<8x8x512xf32, #tpu.memory_space<vmem>>, vector<1x8x512xf32>
    %112 = vector.shape_cast %111 : vector<1x8x512xf32> to vector<8x512xf32>
    %c0_29 = arith.constant 0 : index
    %c0_30 = arith.constant 0 : index
    %113 = vector.load %arg3[%c0_29, %c0_30] : memref<128x512xf32, #tpu.memory_space<vmem>>, vector<128x512xf32>
    %cst_31 = arith.constant dense<0.000000e+00> : vector<8x512xf32>
    %114 = tpu.matmul %109, %113, %cst_31 {dimension_numbers = #tpu.dot_dimension_numbers<[1], [0], [0], [1], [0, 0, 1, 1], [], []>} : vector<8x128xf32>, vector<128x512xf32>, vector<8x512xf32> -> vector<8x512xf32>
    %115 = arith.addf %112, %114 : vector<8x512xf32>
    %116 = vector.extract_strided_slice %115 {offsets = [0, 0], sizes = [8, 384], strides = [1, 1]} : vector<8x512xf32> to vector<8x384xf32>
    %117 = arith.negf %116 : vector<8x384xf32>
    %118 = math.exp %117 : vector<8x384xf32>
    %cst_32 = arith.constant 1.000000e+00 : f32
    %119 = vector.broadcast %cst_32 : f32 to vector<8x384xf32>
    %120 = arith.addf %119, %118 : vector<8x384xf32>
    %121 = arith.divf %119, %120 : vector<8x384xf32>
    %122 = vector.extract_strided_slice %121 {offsets = [0, 0], sizes = [8, 128], strides = [1, 1]} : vector<8x384xf32> to vector<8x128xf32>
    %123 = vector.extract_strided_slice %121 {offsets = [0, 128], sizes = [8, 128], strides = [1, 1]} : vector<8x384xf32> to vector<8x128xf32>
    %124 = vector.extract_strided_slice %121 {offsets = [0, 256], sizes = [8, 128], strides = [1, 1]} : vector<8x384xf32> to vector<8x128xf32>
    %125 = vector.extract_strided_slice %115 {offsets = [0, 384], sizes = [8, 128], strides = [1, 1]} : vector<8x512xf32> to vector<8x128xf32>
    %126 = math.tanh %125 : vector<8x128xf32>
    %127 = arith.mulf %123, %110 : vector<8x128xf32>
    %128 = arith.mulf %122, %126 : vector<8x128xf32>
    %129 = arith.addf %127, %128 : vector<8x128xf32>
    %130 = math.tanh %129 : vector<8x128xf32>
    %131 = arith.mulf %124, %130 : vector<8x128xf32>
    %132 = arith.select %10, %131, %109 : vector<8x128xi1>, vector<8x128xf32>
    %133 = arith.select %10, %129, %110 : vector<8x128xi1>, vector<8x128xf32>
    %c5 = arith.constant 5 : index
    %c0_33 = arith.constant 0 : index
    %c0_34 = arith.constant 0 : index
    %134 = vector.load %arg0[%c5, %c0_33, %c0_34] : memref<8x8x512xf32, #tpu.memory_space<vmem>>, vector<1x8x512xf32>
    %135 = vector.shape_cast %134 : vector<1x8x512xf32> to vector<8x512xf32>
    %c0_35 = arith.constant 0 : index
    %c0_36 = arith.constant 0 : index
    %136 = vector.load %arg3[%c0_35, %c0_36] : memref<128x512xf32, #tpu.memory_space<vmem>>, vector<128x512xf32>
    %cst_37 = arith.constant dense<0.000000e+00> : vector<8x512xf32>
    %137 = tpu.matmul %132, %136, %cst_37 {dimension_numbers = #tpu.dot_dimension_numbers<[1], [0], [0], [1], [0, 0, 1, 1], [], []>} : vector<8x128xf32>, vector<128x512xf32>, vector<8x512xf32> -> vector<8x512xf32>
    %138 = arith.addf %135, %137 : vector<8x512xf32>
    %139 = vector.extract_strided_slice %138 {offsets = [0, 0], sizes = [8, 384], strides = [1, 1]} : vector<8x512xf32> to vector<8x384xf32>
    %140 = arith.negf %139 : vector<8x384xf32>
    %141 = math.exp %140 : vector<8x384xf32>
    %cst_38 = arith.constant 1.000000e+00 : f32
    %142 = vector.broadcast %cst_38 : f32 to vector<8x384xf32>
    %143 = arith.addf %142, %141 : vector<8x384xf32>
    %144 = arith.divf %142, %143 : vector<8x384xf32>
    %145 = vector.extract_strided_slice %144 {offsets = [0, 0], sizes = [8, 128], strides = [1, 1]} : vector<8x384xf32> to vector<8x128xf32>
    %146 = vector.extract_strided_slice %144 {offsets = [0, 128], sizes = [8, 128], strides = [1, 1]} : vector<8x384xf32> to vector<8x128xf32>
    %147 = vector.extract_strided_slice %144 {offsets = [0, 256], sizes = [8, 128], strides = [1, 1]} : vector<8x384xf32> to vector<8x128xf32>
    %148 = vector.extract_strided_slice %138 {offsets = [0, 384], sizes = [8, 128], strides = [1, 1]} : vector<8x512xf32> to vector<8x128xf32>
    %149 = math.tanh %148 : vector<8x128xf32>
    %150 = arith.mulf %146, %133 : vector<8x128xf32>
    %151 = arith.mulf %145, %149 : vector<8x128xf32>
    %152 = arith.addf %150, %151 : vector<8x128xf32>
    %153 = math.tanh %152 : vector<8x128xf32>
    %154 = arith.mulf %147, %153 : vector<8x128xf32>
    %155 = arith.select %12, %154, %132 : vector<8x128xi1>, vector<8x128xf32>
    %156 = arith.select %12, %152, %133 : vector<8x128xi1>, vector<8x128xf32>
    %c6 = arith.constant 6 : index
    %c0_39 = arith.constant 0 : index
    %c0_40 = arith.constant 0 : index
    %157 = vector.load %arg0[%c6, %c0_39, %c0_40] : memref<8x8x512xf32, #tpu.memory_space<vmem>>, vector<1x8x512xf32>
    %158 = vector.shape_cast %157 : vector<1x8x512xf32> to vector<8x512xf32>
    %c0_41 = arith.constant 0 : index
    %c0_42 = arith.constant 0 : index
    %159 = vector.load %arg3[%c0_41, %c0_42] : memref<128x512xf32, #tpu.memory_space<vmem>>, vector<128x512xf32>
    %cst_43 = arith.constant dense<0.000000e+00> : vector<8x512xf32>
    %160 = tpu.matmul %155, %159, %cst_43 {dimension_numbers = #tpu.dot_dimension_numbers<[1], [0], [0], [1], [0, 0, 1, 1], [], []>} : vector<8x128xf32>, vector<128x512xf32>, vector<8x512xf32> -> vector<8x512xf32>
    %161 = arith.addf %158, %160 : vector<8x512xf32>
    %162 = vector.extract_strided_slice %161 {offsets = [0, 0], sizes = [8, 384], strides = [1, 1]} : vector<8x512xf32> to vector<8x384xf32>
    %163 = arith.negf %162 : vector<8x384xf32>
    %164 = math.exp %163 : vector<8x384xf32>
    %cst_44 = arith.constant 1.000000e+00 : f32
    %165 = vector.broadcast %cst_44 : f32 to vector<8x384xf32>
    %166 = arith.addf %165, %164 : vector<8x384xf32>
    %167 = arith.divf %165, %166 : vector<8x384xf32>
    %168 = vector.extract_strided_slice %167 {offsets = [0, 0], sizes = [8, 128], strides = [1, 1]} : vector<8x384xf32> to vector<8x128xf32>
    %169 = vector.extract_strided_slice %167 {offsets = [0, 128], sizes = [8, 128], strides = [1, 1]} : vector<8x384xf32> to vector<8x128xf32>
    %170 = vector.extract_strided_slice %167 {offsets = [0, 256], sizes = [8, 128], strides = [1, 1]} : vector<8x384xf32> to vector<8x128xf32>
    %171 = vector.extract_strided_slice %161 {offsets = [0, 384], sizes = [8, 128], strides = [1, 1]} : vector<8x512xf32> to vector<8x128xf32>
    %172 = math.tanh %171 : vector<8x128xf32>
    %173 = arith.mulf %169, %156 : vector<8x128xf32>
    %174 = arith.mulf %168, %172 : vector<8x128xf32>
    %175 = arith.addf %173, %174 : vector<8x128xf32>
    %176 = math.tanh %175 : vector<8x128xf32>
    %177 = arith.mulf %170, %176 : vector<8x128xf32>
    %178 = arith.select %14, %177, %155 : vector<8x128xi1>, vector<8x128xf32>
    %179 = arith.select %14, %175, %156 : vector<8x128xi1>, vector<8x128xf32>
    %c7 = arith.constant 7 : index
    %c0_45 = arith.constant 0 : index
    %c0_46 = arith.constant 0 : index
    %180 = vector.load %arg0[%c7, %c0_45, %c0_46] : memref<8x8x512xf32, #tpu.memory_space<vmem>>, vector<1x8x512xf32>
    %181 = vector.shape_cast %180 : vector<1x8x512xf32> to vector<8x512xf32>
    %c0_47 = arith.constant 0 : index
    %c0_48 = arith.constant 0 : index
    %182 = vector.load %arg3[%c0_47, %c0_48] : memref<128x512xf32, #tpu.memory_space<vmem>>, vector<128x512xf32>
    %cst_49 = arith.constant dense<0.000000e+00> : vector<8x512xf32>
    %183 = tpu.matmul %178, %182, %cst_49 {dimension_numbers = #tpu.dot_dimension_numbers<[1], [0], [0], [1], [0, 0, 1, 1], [], []>} : vector<8x128xf32>, vector<128x512xf32>, vector<8x512xf32> -> vector<8x512xf32>
    %184 = arith.addf %181, %183 : vector<8x512xf32>
    %185 = vector.extract_strided_slice %184 {offsets = [0, 0], sizes = [8, 384], strides = [1, 1]} : vector<8x512xf32> to vector<8x384xf32>
    %186 = arith.negf %185 : vector<8x384xf32>
    %187 = math.exp %186 : vector<8x384xf32>
    %cst_50 = arith.constant 1.000000e+00 : f32
    %188 = vector.broadcast %cst_50 : f32 to vector<8x384xf32>
    %189 = arith.addf %188, %187 : vector<8x384xf32>
    %190 = arith.divf %188, %189 : vector<8x384xf32>
    %191 = vector.extract_strided_slice %190 {offsets = [0, 0], sizes = [8, 128], strides = [1, 1]} : vector<8x384xf32> to vector<8x128xf32>
    %192 = vector.extract_strided_slice %190 {offsets = [0, 128], sizes = [8, 128], strides = [1, 1]} : vector<8x384xf32> to vector<8x128xf32>
    %193 = vector.extract_strided_slice %190 {offsets = [0, 256], sizes = [8, 128], strides = [1, 1]} : vector<8x384xf32> to vector<8x128xf32>
    %194 = vector.extract_strided_slice %184 {offsets = [0, 384], sizes = [8, 128], strides = [1, 1]} : vector<8x512xf32> to vector<8x128xf32>
    %195 = math.tanh %194 : vector<8x128xf32>
    %196 = arith.mulf %192, %179 : vector<8x128xf32>
    %197 = arith.mulf %191, %195 : vector<8x128xf32>
    %198 = arith.addf %196, %197 : vector<8x128xf32>
    %199 = math.tanh %198 : vector<8x128xf32>
    %200 = arith.mulf %193, %199 : vector<8x128xf32>
    %201 = arith.select %16, %200, %178 : vector<8x128xi1>, vector<8x128xf32>
    %c0_51 = arith.constant 0 : index
    %c0_52 = arith.constant 0 : index
    %202 = vector.load %arg2[%c0_51, %c0_52] : memref<8x128xf32, #tpu.memory_space<vmem>>, vector<8x128xf32>
    %203 = arith.mulf %201, %202 : vector<8x128xf32>
    %204 = vector.extract_strided_slice %203 {offsets = [0, 0], sizes = [2, 32], strides = [1, 1]} : vector<8x128xf32> to vector<2x32xf32>
    %205 = vector.extract_strided_slice %203 {offsets = [0, 32], sizes = [8, 32], strides = [1, 1]} : vector<8x128xf32> to vector<8x32xf32>
    %c0_53 = arith.constant 0 : index
    %c0_54 = arith.constant 0 : index
    %c0_55 = arith.constant 0 : index
    %206 = vector.load %arg4[%c0_53, %c0_54, %c0_55] : memref<2x32x8xf32, #tpu.memory_space<vmem>>, vector<1x32x8xf32>
    %207 = vector.shape_cast %206 : vector<1x32x8xf32> to vector<32x8xf32>
    %c0_56 = arith.constant 0 : index
    %c0_57 = arith.constant 0 : index
    %c0_58 = arith.constant 0 : index
    %208 = vector.load %arg5[%c0_56, %c0_57, %c0_58] : memref<2x1x8xf32, #tpu.memory_space<vmem>>, vector<1x1x8xf32>
    %209 = vector.shape_cast %208 : vector<1x1x8xf32> to vector<1x8xf32>
    %c0_59 = arith.constant 0 : index
    %c0_60 = arith.constant 0 : index
    %c0_61 = arith.constant 0 : index
    %210 = vector.load %arg6[%c0_59, %c0_60, %c0_61] : memref<2x8x32xf32, #tpu.memory_space<vmem>>, vector<1x8x32xf32>
    %211 = vector.shape_cast %210 : vector<1x8x32xf32> to vector<8x32xf32>
    %cst_62 = arith.constant dense<0.000000e+00> : vector<2x8xf32>
    %212 = tpu.matmul %204, %207, %cst_62 {dimension_numbers = #tpu.dot_dimension_numbers<[1], [0], [0], [1], [0, 0, 1, 1], [], []>} : vector<2x32xf32>, vector<32x8xf32>, vector<2x8xf32> -> vector<2x8xf32>
    %213 = vector.broadcast %209 : vector<1x8xf32> to vector<2x8xf32>
    %214 = arith.addf %212, %213 : vector<2x8xf32>
    %cst_63 = arith.constant dense<0xFF800000> : vector<2xf32>
    %215 = vector.multi_reduction <maximumf>, %214, %cst_63 [1] : vector<2x8xf32> to vector<2xf32>
    %216 = vector.shape_cast %215 : vector<2xf32> to vector<2x1xf32>
    %217 = vector.broadcast %216 : vector<2x1xf32> to vector<2x8xf32>
    %218 = arith.subf %214, %217 : vector<2x8xf32>
    %219 = math.exp %218 : vector<2x8xf32>
    %cst_64 = arith.constant dense<0.000000e+00> : vector<2xf32>
    %220 = vector.multi_reduction <add>, %219, %cst_64 [1] : vector<2x8xf32> to vector<2xf32>
    %221 = vector.shape_cast %220 : vector<2xf32> to vector<2x1xf32>
    %222 = tpu.reciprocal %221 {approx = true} : vector<2x1xf32> -> vector<2x1xf32>
    %223 = vector.broadcast %222 : vector<2x1xf32> to vector<2x8xf32>
    %224 = arith.mulf %219, %223 : vector<2x8xf32>
    %cst_65 = arith.constant dense<0.000000e+00> : vector<8x8xf32>
    %225 = tpu.matmul %205, %207, %cst_65 {dimension_numbers = #tpu.dot_dimension_numbers<[1], [0], [0], [1], [0, 0, 1, 1], [], []>} : vector<8x32xf32>, vector<32x8xf32>, vector<8x8xf32> -> vector<8x8xf32>
    %226 = vector.broadcast %209 : vector<1x8xf32> to vector<8x8xf32>
    %227 = arith.addf %225, %226 : vector<8x8xf32>
    %cst_66 = arith.constant dense<0xFF800000> : vector<8xf32>
    %228 = vector.multi_reduction <maximumf>, %227, %cst_66 [1] : vector<8x8xf32> to vector<8xf32>
    %229 = vector.shape_cast %228 : vector<8xf32> to vector<8x1xf32>
    %230 = vector.broadcast %229 : vector<8x1xf32> to vector<8x8xf32>
    %231 = arith.subf %227, %230 : vector<8x8xf32>
    %232 = math.exp %231 : vector<8x8xf32>
    %cst_67 = arith.constant dense<0.000000e+00> : vector<8xf32>
    %233 = vector.multi_reduction <add>, %232, %cst_67 [1] : vector<8x8xf32> to vector<8xf32>
    %234 = vector.shape_cast %233 : vector<8xf32> to vector<8x1xf32>
    %235 = tpu.reciprocal %234 {approx = true} : vector<8x1xf32> -> vector<8x1xf32>
    %236 = vector.broadcast %235 : vector<8x1xf32> to vector<8x8xf32>
    %237 = arith.mulf %232, %236 : vector<8x8xf32>
    %238 = vector.shape_cast %224 : vector<2x8xf32> to vector<2x8x1xf32>
    %239 = vector.shape_cast %204 : vector<2x32xf32> to vector<2x1x32xf32>
    %240 = vector.broadcast %238 : vector<2x8x1xf32> to vector<2x8x32xf32>
    %241 = vector.broadcast %239 : vector<2x1x32xf32> to vector<2x8x32xf32>
    %242 = arith.mulf %240, %241 : vector<2x8x32xf32>
    %243 = vector.extract_strided_slice %237 {offsets = [0, 0], sizes = [2, 8], strides = [1, 1]} : vector<8x8xf32> to vector<2x8xf32>
    %244 = vector.extract_strided_slice %205 {offsets = [0, 0], sizes = [2, 32], strides = [1, 1]} : vector<8x32xf32> to vector<2x32xf32>
    %245 = arith.addf %224, %243 : vector<2x8xf32>
    %246 = vector.shape_cast %243 : vector<2x8xf32> to vector<2x8x1xf32>
    %247 = vector.shape_cast %244 : vector<2x32xf32> to vector<2x1x32xf32>
    %248 = vector.broadcast %246 : vector<2x8x1xf32> to vector<2x8x32xf32>
    %249 = vector.broadcast %247 : vector<2x1x32xf32> to vector<2x8x32xf32>
    %250 = arith.mulf %248, %249 : vector<2x8x32xf32>
    %251 = arith.addf %242, %250 : vector<2x8x32xf32>
    %252 = vector.extract_strided_slice %237 {offsets = [2, 0], sizes = [2, 8], strides = [1, 1]} : vector<8x8xf32> to vector<2x8xf32>
    %253 = vector.extract_strided_slice %205 {offsets = [2, 0], sizes = [2, 32], strides = [1, 1]} : vector<8x32xf32> to vector<2x32xf32>
    %254 = arith.addf %245, %252 : vector<2x8xf32>
    %255 = vector.shape_cast %252 : vector<2x8xf32> to vector<2x8x1xf32>
    %256 = vector.shape_cast %253 : vector<2x32xf32> to vector<2x1x32xf32>
    %257 = vector.broadcast %255 : vector<2x8x1xf32> to vector<2x8x32xf32>
    %258 = vector.broadcast %256 : vector<2x1x32xf32> to vector<2x8x32xf32>
    %259 = arith.mulf %257, %258 : vector<2x8x32xf32>
    %260 = arith.addf %251, %259 : vector<2x8x32xf32>
    %261 = vector.extract_strided_slice %237 {offsets = [4, 0], sizes = [2, 8], strides = [1, 1]} : vector<8x8xf32> to vector<2x8xf32>
    %262 = vector.extract_strided_slice %205 {offsets = [4, 0], sizes = [2, 32], strides = [1, 1]} : vector<8x32xf32> to vector<2x32xf32>
    %263 = arith.addf %254, %261 : vector<2x8xf32>
    %264 = vector.shape_cast %261 : vector<2x8xf32> to vector<2x8x1xf32>
    %265 = vector.shape_cast %262 : vector<2x32xf32> to vector<2x1x32xf32>
    %266 = vector.broadcast %264 : vector<2x8x1xf32> to vector<2x8x32xf32>
    %267 = vector.broadcast %265 : vector<2x1x32xf32> to vector<2x8x32xf32>
    %268 = arith.mulf %266, %267 : vector<2x8x32xf32>
    %269 = arith.addf %260, %268 : vector<2x8x32xf32>
    %270 = vector.extract_strided_slice %237 {offsets = [6, 0], sizes = [2, 8], strides = [1, 1]} : vector<8x8xf32> to vector<2x8xf32>
    %271 = vector.extract_strided_slice %205 {offsets = [6, 0], sizes = [2, 32], strides = [1, 1]} : vector<8x32xf32> to vector<2x32xf32>
    %272 = arith.addf %263, %270 : vector<2x8xf32>
    %273 = vector.shape_cast %270 : vector<2x8xf32> to vector<2x8x1xf32>
    %274 = vector.shape_cast %271 : vector<2x32xf32> to vector<2x1x32xf32>
    %275 = vector.broadcast %273 : vector<2x8x1xf32> to vector<2x8x32xf32>
    %276 = vector.broadcast %274 : vector<2x1x32xf32> to vector<2x8x32xf32>
    %277 = arith.mulf %275, %276 : vector<2x8x32xf32>
    %278 = arith.addf %269, %277 : vector<2x8x32xf32>
    %279 = vector.shape_cast %272 : vector<2x8xf32> to vector<2x8x1xf32>
    %280 = vector.shape_cast %211 : vector<8x32xf32> to vector<1x8x32xf32>
    %281 = vector.broadcast %279 : vector<2x8x1xf32> to vector<2x8x32xf32>
    %282 = vector.broadcast %280 : vector<1x8x32xf32> to vector<2x8x32xf32>
    %283 = arith.mulf %281, %282 : vector<2x8x32xf32>
    %284 = arith.subf %278, %283 : vector<2x8x32xf32>
    %285 = arith.mulf %284, %284 : vector<2x8x32xf32>
    %cst_68 = arith.constant dense<0.000000e+00> : vector<2x8xf32>
    %286 = vector.multi_reduction <add>, %285, %cst_68 [2] : vector<2x8x32xf32> to vector<2x8xf32>
    %287 = vector.shape_cast %286 : vector<2x8xf32> to vector<2x8x1xf32>
    %cst_69 = arith.constant 9.99999996E-13 : f32
    %288 = vector.broadcast %cst_69 : f32 to vector<2x8x1xf32>
    %289 = arith.addf %287, %288 : vector<2x8x1xf32>
    %290 = math.rsqrt %289 : vector<2x8x1xf32>
    %291 = vector.broadcast %290 : vector<2x8x1xf32> to vector<2x8x32xf32>
    %292 = arith.mulf %284, %291 : vector<2x8x32xf32>
    %293 = arith.mulf %292, %292 : vector<2x8x32xf32>
    %cst_70 = arith.constant dense<0.000000e+00> : vector<2x8xf32>
    %294 = vector.multi_reduction <add>, %293, %cst_70 [2] : vector<2x8x32xf32> to vector<2x8xf32>
    %295 = vector.shape_cast %294 : vector<2x8xf32> to vector<2x8x1xf32>
    %cst_71 = arith.constant dense<0.000000e+00> : vector<2x1xf32>
    %296 = vector.multi_reduction <add>, %295, %cst_71 [1] : vector<2x8x1xf32> to vector<2x1xf32>
    %297 = vector.shape_cast %296 : vector<2x1xf32> to vector<2x1x1xf32>
    %cst_72 = arith.constant 9.99999996E-13 : f32
    %298 = vector.broadcast %cst_72 : f32 to vector<2x1x1xf32>
    %299 = arith.addf %297, %298 : vector<2x1x1xf32>
    %300 = math.rsqrt %299 : vector<2x1x1xf32>
    %301 = vector.broadcast %300 : vector<2x1x1xf32> to vector<2x8x32xf32>
    %302 = arith.mulf %292, %301 : vector<2x8x32xf32>
    %303 = vector.extract_strided_slice %302 {offsets = [0, 0, 0], sizes = [2, 1, 32], strides = [1, 1, 1]} : vector<2x8x32xf32> to vector<2x1x32xf32>
    %304 = vector.shape_cast %303 : vector<2x1x32xf32> to vector<2x32xf32>
    %305 = vector.extract_strided_slice %302 {offsets = [0, 1, 0], sizes = [2, 1, 32], strides = [1, 1, 1]} : vector<2x8x32xf32> to vector<2x1x32xf32>
    %306 = vector.shape_cast %305 : vector<2x1x32xf32> to vector<2x32xf32>
    %307 = vector.extract_strided_slice %302 {offsets = [0, 2, 0], sizes = [2, 1, 32], strides = [1, 1, 1]} : vector<2x8x32xf32> to vector<2x1x32xf32>
    %308 = vector.shape_cast %307 : vector<2x1x32xf32> to vector<2x32xf32>
    %309 = vector.extract_strided_slice %302 {offsets = [0, 3, 0], sizes = [2, 1, 32], strides = [1, 1, 1]} : vector<2x8x32xf32> to vector<2x1x32xf32>
    %310 = vector.shape_cast %309 : vector<2x1x32xf32> to vector<2x32xf32>
    %311 = vector.extract_strided_slice %302 {offsets = [0, 4, 0], sizes = [2, 1, 32], strides = [1, 1, 1]} : vector<2x8x32xf32> to vector<2x1x32xf32>
    %312 = vector.shape_cast %311 : vector<2x1x32xf32> to vector<2x32xf32>
    %313 = vector.extract_strided_slice %302 {offsets = [0, 5, 0], sizes = [2, 1, 32], strides = [1, 1, 1]} : vector<2x8x32xf32> to vector<2x1x32xf32>
    %314 = vector.shape_cast %313 : vector<2x1x32xf32> to vector<2x32xf32>
    %315 = vector.extract_strided_slice %302 {offsets = [0, 6, 0], sizes = [2, 1, 32], strides = [1, 1, 1]} : vector<2x8x32xf32> to vector<2x1x32xf32>
    %316 = vector.shape_cast %315 : vector<2x1x32xf32> to vector<2x32xf32>
    %317 = vector.extract_strided_slice %302 {offsets = [0, 7, 0], sizes = [2, 1, 32], strides = [1, 1, 1]} : vector<2x8x32xf32> to vector<2x1x32xf32>
    %318 = vector.shape_cast %317 : vector<2x1x32xf32> to vector<2x32xf32>
    %319 = tpu.concatenate %304, %306, %308, %310, %312, %314, %316, %318 in 1 : vector<2x32xf32>, vector<2x32xf32>, vector<2x32xf32>, vector<2x32xf32>, vector<2x32xf32>, vector<2x32xf32>, vector<2x32xf32>, vector<2x32xf32> -> vector<2x256xf32>
    %c0_73 = arith.constant 0 : index
    %c0_74 = arith.constant 0 : index
    %c0_75 = arith.constant 0 : index
    %320 = vector.load %arg7[%c0_73, %c0_74, %c0_75] : memref<2x256x16xf32, #tpu.memory_space<vmem>>, vector<1x256x16xf32>
    %321 = vector.shape_cast %320 : vector<1x256x16xf32> to vector<256x16xf32>
    %cst_76 = arith.constant dense<0.000000e+00> : vector<2x16xf32>
    %322 = tpu.matmul %319, %321, %cst_76 {dimension_numbers = #tpu.dot_dimension_numbers<[1], [0], [0], [1], [0, 0, 1, 1], [], []>} : vector<2x256xf32>, vector<256x16xf32>, vector<2x16xf32> -> vector<2x16xf32>
    %c0_77 = arith.constant 0 : index
    %c0_78 = arith.constant 0 : index
    %c0_79 = arith.constant 0 : index
    %323 = vector.load %arg8[%c0_77, %c0_78, %c0_79] : memref<2x16x16xf32, #tpu.memory_space<vmem>>, vector<1x16x16xf32>
    %324 = vector.shape_cast %323 : vector<1x16x16xf32> to vector<16x16xf32>
    %cst_80 = arith.constant dense<0.000000e+00> : vector<2x16xf32>
    %325 = tpu.matmul %322, %324, %cst_80 {dimension_numbers = #tpu.dot_dimension_numbers<[1], [0], [0], [1], [0, 0, 1, 1], [], []>} : vector<2x16xf32>, vector<16x16xf32>, vector<2x16xf32> -> vector<2x16xf32>
    %c0_81 = arith.constant 0 : index
    %c0_82 = arith.constant 0 : index
    %c0_83 = arith.constant 0 : index
    %326 = vector.load %arg9[%c0_81, %c0_82, %c0_83] : memref<2x1x16xf32, #tpu.memory_space<vmem>>, vector<1x1x16xf32>
    %327 = vector.shape_cast %326 : vector<1x1x16xf32> to vector<1x16xf32>
    %328 = vector.broadcast %327 : vector<1x16xf32> to vector<2x16xf32>
    %329 = arith.addf %325, %328 : vector<2x16xf32>
    %330 = arith.negf %329 : vector<2x16xf32>
    %331 = math.exp %330 : vector<2x16xf32>
    %cst_84 = arith.constant 1.000000e+00 : f32
    %332 = vector.broadcast %cst_84 : f32 to vector<2x16xf32>
    %333 = arith.addf %332, %331 : vector<2x16xf32>
    %334 = arith.divf %332, %333 : vector<2x16xf32>
    %335 = arith.mulf %322, %334 : vector<2x16xf32>
    %336 = vector.extract_strided_slice %203 {offsets = [0, 64], sizes = [2, 32], strides = [1, 1]} : vector<8x128xf32> to vector<2x32xf32>
    %337 = vector.extract_strided_slice %203 {offsets = [0, 96], sizes = [8, 32], strides = [1, 1]} : vector<8x128xf32> to vector<8x32xf32>
    %c1_85 = arith.constant 1 : index
    %c0_86 = arith.constant 0 : index
    %c0_87 = arith.constant 0 : index
    %338 = vector.load %arg4[%c1_85, %c0_86, %c0_87] : memref<2x32x8xf32, #tpu.memory_space<vmem>>, vector<1x32x8xf32>
    %339 = vector.shape_cast %338 : vector<1x32x8xf32> to vector<32x8xf32>
    %c1_88 = arith.constant 1 : index
    %c0_89 = arith.constant 0 : index
    %c0_90 = arith.constant 0 : index
    %340 = vector.load %arg5[%c1_88, %c0_89, %c0_90] : memref<2x1x8xf32, #tpu.memory_space<vmem>>, vector<1x1x8xf32>
    %341 = vector.shape_cast %340 : vector<1x1x8xf32> to vector<1x8xf32>
    %c1_91 = arith.constant 1 : index
    %c0_92 = arith.constant 0 : index
    %c0_93 = arith.constant 0 : index
    %342 = vector.load %arg6[%c1_91, %c0_92, %c0_93] : memref<2x8x32xf32, #tpu.memory_space<vmem>>, vector<1x8x32xf32>
    %343 = vector.shape_cast %342 : vector<1x8x32xf32> to vector<8x32xf32>
    %cst_94 = arith.constant dense<0.000000e+00> : vector<2x8xf32>
    %344 = tpu.matmul %336, %339, %cst_94 {dimension_numbers = #tpu.dot_dimension_numbers<[1], [0], [0], [1], [0, 0, 1, 1], [], []>} : vector<2x32xf32>, vector<32x8xf32>, vector<2x8xf32> -> vector<2x8xf32>
    %345 = vector.broadcast %341 : vector<1x8xf32> to vector<2x8xf32>
    %346 = arith.addf %344, %345 : vector<2x8xf32>
    %cst_95 = arith.constant dense<0xFF800000> : vector<2xf32>
    %347 = vector.multi_reduction <maximumf>, %346, %cst_95 [1] : vector<2x8xf32> to vector<2xf32>
    %348 = vector.shape_cast %347 : vector<2xf32> to vector<2x1xf32>
    %349 = vector.broadcast %348 : vector<2x1xf32> to vector<2x8xf32>
    %350 = arith.subf %346, %349 : vector<2x8xf32>
    %351 = math.exp %350 : vector<2x8xf32>
    %cst_96 = arith.constant dense<0.000000e+00> : vector<2xf32>
    %352 = vector.multi_reduction <add>, %351, %cst_96 [1] : vector<2x8xf32> to vector<2xf32>
    %353 = vector.shape_cast %352 : vector<2xf32> to vector<2x1xf32>
    %354 = tpu.reciprocal %353 {approx = true} : vector<2x1xf32> -> vector<2x1xf32>
    %355 = vector.broadcast %354 : vector<2x1xf32> to vector<2x8xf32>
    %356 = arith.mulf %351, %355 : vector<2x8xf32>
    %cst_97 = arith.constant dense<0.000000e+00> : vector<8x8xf32>
    %357 = tpu.matmul %337, %339, %cst_97 {dimension_numbers = #tpu.dot_dimension_numbers<[1], [0], [0], [1], [0, 0, 1, 1], [], []>} : vector<8x32xf32>, vector<32x8xf32>, vector<8x8xf32> -> vector<8x8xf32>
    %358 = vector.broadcast %341 : vector<1x8xf32> to vector<8x8xf32>
    %359 = arith.addf %357, %358 : vector<8x8xf32>
    %cst_98 = arith.constant dense<0xFF800000> : vector<8xf32>
    %360 = vector.multi_reduction <maximumf>, %359, %cst_98 [1] : vector<8x8xf32> to vector<8xf32>
    %361 = vector.shape_cast %360 : vector<8xf32> to vector<8x1xf32>
    %362 = vector.broadcast %361 : vector<8x1xf32> to vector<8x8xf32>
    %363 = arith.subf %359, %362 : vector<8x8xf32>
    %364 = math.exp %363 : vector<8x8xf32>
    %cst_99 = arith.constant dense<0.000000e+00> : vector<8xf32>
    %365 = vector.multi_reduction <add>, %364, %cst_99 [1] : vector<8x8xf32> to vector<8xf32>
    %366 = vector.shape_cast %365 : vector<8xf32> to vector<8x1xf32>
    %367 = tpu.reciprocal %366 {approx = true} : vector<8x1xf32> -> vector<8x1xf32>
    %368 = vector.broadcast %367 : vector<8x1xf32> to vector<8x8xf32>
    %369 = arith.mulf %364, %368 : vector<8x8xf32>
    %370 = vector.shape_cast %356 : vector<2x8xf32> to vector<2x8x1xf32>
    %371 = vector.shape_cast %336 : vector<2x32xf32> to vector<2x1x32xf32>
    %372 = vector.broadcast %370 : vector<2x8x1xf32> to vector<2x8x32xf32>
    %373 = vector.broadcast %371 : vector<2x1x32xf32> to vector<2x8x32xf32>
    %374 = arith.mulf %372, %373 : vector<2x8x32xf32>
    %375 = vector.extract_strided_slice %369 {offsets = [0, 0], sizes = [2, 8], strides = [1, 1]} : vector<8x8xf32> to vector<2x8xf32>
    %376 = vector.extract_strided_slice %337 {offsets = [0, 0], sizes = [2, 32], strides = [1, 1]} : vector<8x32xf32> to vector<2x32xf32>
    %377 = arith.addf %356, %375 : vector<2x8xf32>
    %378 = vector.shape_cast %375 : vector<2x8xf32> to vector<2x8x1xf32>
    %379 = vector.shape_cast %376 : vector<2x32xf32> to vector<2x1x32xf32>
    %380 = vector.broadcast %378 : vector<2x8x1xf32> to vector<2x8x32xf32>
    %381 = vector.broadcast %379 : vector<2x1x32xf32> to vector<2x8x32xf32>
    %382 = arith.mulf %380, %381 : vector<2x8x32xf32>
    %383 = arith.addf %374, %382 : vector<2x8x32xf32>
    %384 = vector.extract_strided_slice %369 {offsets = [2, 0], sizes = [2, 8], strides = [1, 1]} : vector<8x8xf32> to vector<2x8xf32>
    %385 = vector.extract_strided_slice %337 {offsets = [2, 0], sizes = [2, 32], strides = [1, 1]} : vector<8x32xf32> to vector<2x32xf32>
    %386 = arith.addf %377, %384 : vector<2x8xf32>
    %387 = vector.shape_cast %384 : vector<2x8xf32> to vector<2x8x1xf32>
    %388 = vector.shape_cast %385 : vector<2x32xf32> to vector<2x1x32xf32>
    %389 = vector.broadcast %387 : vector<2x8x1xf32> to vector<2x8x32xf32>
    %390 = vector.broadcast %388 : vector<2x1x32xf32> to vector<2x8x32xf32>
    %391 = arith.mulf %389, %390 : vector<2x8x32xf32>
    %392 = arith.addf %383, %391 : vector<2x8x32xf32>
    %393 = vector.extract_strided_slice %369 {offsets = [4, 0], sizes = [2, 8], strides = [1, 1]} : vector<8x8xf32> to vector<2x8xf32>
    %394 = vector.extract_strided_slice %337 {offsets = [4, 0], sizes = [2, 32], strides = [1, 1]} : vector<8x32xf32> to vector<2x32xf32>
    %395 = arith.addf %386, %393 : vector<2x8xf32>
    %396 = vector.shape_cast %393 : vector<2x8xf32> to vector<2x8x1xf32>
    %397 = vector.shape_cast %394 : vector<2x32xf32> to vector<2x1x32xf32>
    %398 = vector.broadcast %396 : vector<2x8x1xf32> to vector<2x8x32xf32>
    %399 = vector.broadcast %397 : vector<2x1x32xf32> to vector<2x8x32xf32>
    %400 = arith.mulf %398, %399 : vector<2x8x32xf32>
    %401 = arith.addf %392, %400 : vector<2x8x32xf32>
    %402 = vector.extract_strided_slice %369 {offsets = [6, 0], sizes = [2, 8], strides = [1, 1]} : vector<8x8xf32> to vector<2x8xf32>
    %403 = vector.extract_strided_slice %337 {offsets = [6, 0], sizes = [2, 32], strides = [1, 1]} : vector<8x32xf32> to vector<2x32xf32>
    %404 = arith.addf %395, %402 : vector<2x8xf32>
    %405 = vector.shape_cast %402 : vector<2x8xf32> to vector<2x8x1xf32>
    %406 = vector.shape_cast %403 : vector<2x32xf32> to vector<2x1x32xf32>
    %407 = vector.broadcast %405 : vector<2x8x1xf32> to vector<2x8x32xf32>
    %408 = vector.broadcast %406 : vector<2x1x32xf32> to vector<2x8x32xf32>
    %409 = arith.mulf %407, %408 : vector<2x8x32xf32>
    %410 = arith.addf %401, %409 : vector<2x8x32xf32>
    %411 = vector.shape_cast %404 : vector<2x8xf32> to vector<2x8x1xf32>
    %412 = vector.shape_cast %343 : vector<8x32xf32> to vector<1x8x32xf32>
    %413 = vector.broadcast %411 : vector<2x8x1xf32> to vector<2x8x32xf32>
    %414 = vector.broadcast %412 : vector<1x8x32xf32> to vector<2x8x32xf32>
    %415 = arith.mulf %413, %414 : vector<2x8x32xf32>
    %416 = arith.subf %410, %415 : vector<2x8x32xf32>
    %417 = arith.mulf %416, %416 : vector<2x8x32xf32>
    %cst_100 = arith.constant dense<0.000000e+00> : vector<2x8xf32>
    %418 = vector.multi_reduction <add>, %417, %cst_100 [2] : vector<2x8x32xf32> to vector<2x8xf32>
    %419 = vector.shape_cast %418 : vector<2x8xf32> to vector<2x8x1xf32>
    %cst_101 = arith.constant 9.99999996E-13 : f32
    %420 = vector.broadcast %cst_101 : f32 to vector<2x8x1xf32>
    %421 = arith.addf %419, %420 : vector<2x8x1xf32>
    %422 = math.rsqrt %421 : vector<2x8x1xf32>
    %423 = vector.broadcast %422 : vector<2x8x1xf32> to vector<2x8x32xf32>
    %424 = arith.mulf %416, %423 : vector<2x8x32xf32>
    %425 = arith.mulf %424, %424 : vector<2x8x32xf32>
    %cst_102 = arith.constant dense<0.000000e+00> : vector<2x8xf32>
    %426 = vector.multi_reduction <add>, %425, %cst_102 [2] : vector<2x8x32xf32> to vector<2x8xf32>
    %427 = vector.shape_cast %426 : vector<2x8xf32> to vector<2x8x1xf32>
    %cst_103 = arith.constant dense<0.000000e+00> : vector<2x1xf32>
    %428 = vector.multi_reduction <add>, %427, %cst_103 [1] : vector<2x8x1xf32> to vector<2x1xf32>
    %429 = vector.shape_cast %428 : vector<2x1xf32> to vector<2x1x1xf32>
    %cst_104 = arith.constant 9.99999996E-13 : f32
    %430 = vector.broadcast %cst_104 : f32 to vector<2x1x1xf32>
    %431 = arith.addf %429, %430 : vector<2x1x1xf32>
    %432 = math.rsqrt %431 : vector<2x1x1xf32>
    %433 = vector.broadcast %432 : vector<2x1x1xf32> to vector<2x8x32xf32>
    %434 = arith.mulf %424, %433 : vector<2x8x32xf32>
    %435 = vector.extract_strided_slice %434 {offsets = [0, 0, 0], sizes = [2, 1, 32], strides = [1, 1, 1]} : vector<2x8x32xf32> to vector<2x1x32xf32>
    %436 = vector.shape_cast %435 : vector<2x1x32xf32> to vector<2x32xf32>
    %437 = vector.extract_strided_slice %434 {offsets = [0, 1, 0], sizes = [2, 1, 32], strides = [1, 1, 1]} : vector<2x8x32xf32> to vector<2x1x32xf32>
    %438 = vector.shape_cast %437 : vector<2x1x32xf32> to vector<2x32xf32>
    %439 = vector.extract_strided_slice %434 {offsets = [0, 2, 0], sizes = [2, 1, 32], strides = [1, 1, 1]} : vector<2x8x32xf32> to vector<2x1x32xf32>
    %440 = vector.shape_cast %439 : vector<2x1x32xf32> to vector<2x32xf32>
    %441 = vector.extract_strided_slice %434 {offsets = [0, 3, 0], sizes = [2, 1, 32], strides = [1, 1, 1]} : vector<2x8x32xf32> to vector<2x1x32xf32>
    %442 = vector.shape_cast %441 : vector<2x1x32xf32> to vector<2x32xf32>
    %443 = vector.extract_strided_slice %434 {offsets = [0, 4, 0], sizes = [2, 1, 32], strides = [1, 1, 1]} : vector<2x8x32xf32> to vector<2x1x32xf32>
    %444 = vector.shape_cast %443 : vector<2x1x32xf32> to vector<2x32xf32>
    %445 = vector.extract_strided_slice %434 {offsets = [0, 5, 0], sizes = [2, 1, 32], strides = [1, 1, 1]} : vector<2x8x32xf32> to vector<2x1x32xf32>
    %446 = vector.shape_cast %445 : vector<2x1x32xf32> to vector<2x32xf32>
    %447 = vector.extract_strided_slice %434 {offsets = [0, 6, 0], sizes = [2, 1, 32], strides = [1, 1, 1]} : vector<2x8x32xf32> to vector<2x1x32xf32>
    %448 = vector.shape_cast %447 : vector<2x1x32xf32> to vector<2x32xf32>
    %449 = vector.extract_strided_slice %434 {offsets = [0, 7, 0], sizes = [2, 1, 32], strides = [1, 1, 1]} : vector<2x8x32xf32> to vector<2x1x32xf32>
    %450 = vector.shape_cast %449 : vector<2x1x32xf32> to vector<2x32xf32>
    %451 = tpu.concatenate %436, %438, %440, %442, %444, %446, %448, %450 in 1 : vector<2x32xf32>, vector<2x32xf32>, vector<2x32xf32>, vector<2x32xf32>, vector<2x32xf32>, vector<2x32xf32>, vector<2x32xf32>, vector<2x32xf32> -> vector<2x256xf32>
    %c1_105 = arith.constant 1 : index
    %c0_106 = arith.constant 0 : index
    %c0_107 = arith.constant 0 : index
    %452 = vector.load %arg7[%c1_105, %c0_106, %c0_107] : memref<2x256x16xf32, #tpu.memory_space<vmem>>, vector<1x256x16xf32>
    %453 = vector.shape_cast %452 : vector<1x256x16xf32> to vector<256x16xf32>
    %cst_108 = arith.constant dense<0.000000e+00> : vector<2x16xf32>
    %454 = tpu.matmul %451, %453, %cst_108 {dimension_numbers = #tpu.dot_dimension_numbers<[1], [0], [0], [1], [0, 0, 1, 1], [], []>} : vector<2x256xf32>, vector<256x16xf32>, vector<2x16xf32> -> vector<2x16xf32>
    %c1_109 = arith.constant 1 : index
    %c0_110 = arith.constant 0 : index
    %c0_111 = arith.constant 0 : index
    %455 = vector.load %arg8[%c1_109, %c0_110, %c0_111] : memref<2x16x16xf32, #tpu.memory_space<vmem>>, vector<1x16x16xf32>
    %456 = vector.shape_cast %455 : vector<1x16x16xf32> to vector<16x16xf32>
    %cst_112 = arith.constant dense<0.000000e+00> : vector<2x16xf32>
    %457 = tpu.matmul %454, %456, %cst_112 {dimension_numbers = #tpu.dot_dimension_numbers<[1], [0], [0], [1], [0, 0, 1, 1], [], []>} : vector<2x16xf32>, vector<16x16xf32>, vector<2x16xf32> -> vector<2x16xf32>
    %c1_113 = arith.constant 1 : index
    %c0_114 = arith.constant 0 : index
    %c0_115 = arith.constant 0 : index
    %458 = vector.load %arg9[%c1_113, %c0_114, %c0_115] : memref<2x1x16xf32, #tpu.memory_space<vmem>>, vector<1x1x16xf32>
    %459 = vector.shape_cast %458 : vector<1x1x16xf32> to vector<1x16xf32>
    %460 = vector.broadcast %459 : vector<1x16xf32> to vector<2x16xf32>
    %461 = arith.addf %457, %460 : vector<2x16xf32>
    %462 = arith.negf %461 : vector<2x16xf32>
    %463 = math.exp %462 : vector<2x16xf32>
    %cst_116 = arith.constant 1.000000e+00 : f32
    %464 = vector.broadcast %cst_116 : f32 to vector<2x16xf32>
    %465 = arith.addf %464, %463 : vector<2x16xf32>
    %466 = arith.divf %464, %465 : vector<2x16xf32>
    %467 = arith.mulf %454, %466 : vector<2x16xf32>
    %c0_117 = arith.constant 0 : index
    %c0_118 = arith.constant 0 : index
    %468 = vector.load %arg10[%c0_117, %c0_118] : memref<32x8xf32, #tpu.memory_space<vmem>>, vector<32x8xf32>
    %469 = vector.extract_strided_slice %468 {offsets = [0, 0], sizes = [16, 8], strides = [1, 1]} : vector<32x8xf32> to vector<16x8xf32>
    %cst_119 = arith.constant dense<0.000000e+00> : vector<2x8xf32>
    %470 = tpu.matmul %335, %469, %cst_119 {dimension_numbers = #tpu.dot_dimension_numbers<[1], [0], [0], [1], [0, 0, 1, 1], [], []>} : vector<2x16xf32>, vector<16x8xf32>, vector<2x8xf32> -> vector<2x8xf32>
    %471 = vector.extract_strided_slice %468 {offsets = [16, 0], sizes = [16, 8], strides = [1, 1]} : vector<32x8xf32> to vector<16x8xf32>
    %cst_120 = arith.constant dense<0.000000e+00> : vector<2x8xf32>
    %472 = tpu.matmul %467, %471, %cst_120 {dimension_numbers = #tpu.dot_dimension_numbers<[1], [0], [0], [1], [0, 0, 1, 1], [], []>} : vector<2x16xf32>, vector<16x8xf32>, vector<2x8xf32> -> vector<2x8xf32>
    %473 = arith.addf %470, %472 : vector<2x8xf32>
    %c0_121 = arith.constant 0 : index
    %c0_122 = arith.constant 0 : index
    %474 = vector.load %arg11[%c0_121, %c0_122] : memref<1x8xf32, #tpu.memory_space<vmem>>, vector<1x8xf32>
    %475 = vector.broadcast %474 : vector<1x8xf32> to vector<2x8xf32>
    %476 = arith.addf %473, %475 : vector<2x8xf32>
    %cst_123 = arith.constant 0.000000e+00 : f32
    %477 = vector.broadcast %cst_123 : f32 to vector<2x8xf32>
    %478 = arith.maximumf %476, %477 : vector<2x8xf32>
    %c0_124 = arith.constant 0 : index
    %c0_125 = arith.constant 0 : index
    %479 = vector.load %arg12[%c0_124, %c0_125] : memref<8x1xf32, #tpu.memory_space<vmem>>, vector<8x1xf32>
    %cst_126 = arith.constant dense<0.000000e+00> : vector<2x1xf32>
    %480 = tpu.matmul %478, %479, %cst_126 {dimension_numbers = #tpu.dot_dimension_numbers<[1], [0], [0], [1], [0, 0, 1, 1], [], []>} : vector<2x8xf32>, vector<8x1xf32>, vector<2x1xf32> -> vector<2x1xf32>
    %c0_127 = arith.constant 0 : index
    %c0_128 = arith.constant 0 : index
    %481 = vector.load %arg13[%c0_127, %c0_128] : memref<1x1xf32, #tpu.memory_space<vmem>>, vector<1x1xf32>
    %482 = vector.broadcast %481 : vector<1x1xf32> to vector<2x1xf32>
    %483 = arith.addf %480, %482 : vector<2x1xf32>
    %c0_129 = arith.constant 0 : index
    %c0_130 = arith.constant 0 : index
    %484 = vector.load %arg14[%c0_129, %c0_130] : memref<2x1xf32, #tpu.memory_space<vmem>>, vector<2x1xf32>
    tpu.vector_store %arg14[%c0_129, %c0_130], %483 {strides = array<i32>} : memref<2x1xf32, #tpu.memory_space<vmem>>, vector<2x1xf32>,
    return
  }
}

</mosaic_0001>

<bundles_post_ra>
// kernel: lstm_model_forward.1
= control target key start
LH: loop header
LB: loop body
LE: loop exit
PB: predicated region body
PF: predicated region fallthrough
CT: control target
= control target key end

     0   :  { %v2873_v60 = vmov 0.0   ;;  %s2874_s21 = smov 96   ;;  %s2876_s28 = smov 32   ;;  %s4759_s3 = inlined_call_operand.vmem [shape: f32[128,512], index: 3, kind: input, shape index: {}]   ;;  %s4760_s0 = inlined_call_operand.vmem [shape: f32[8,8,512], index: 0, kind: input, shape index: {}]   ;;  %s4761_s1 = inlined_call_operand.vmem [shape: s32[8,128], index: 1, kind: input, shape index: {}]   ;;  %s4762_s4 = inlined_call_operand.vmem [shape: f32[2,32,8], index: 4, kind: input, shape index: {}]   ;;  %s4763_s5 = inlined_call_operand.vmem [shape: f32[2,1,8], index: 5, kind: input, shape index: {}]   ;;  %s4764_s2 = inlined_call_operand.vmem [shape: f32[8,128], index: 2, kind: input, shape index: {}]   ;;  %s4765_s6 = inlined_call_operand.vmem [shape: f32[2,8,32], index: 6, kind: input, shape index: {}]   ;;  %s4766_s7 = inlined_call_operand.vmem [shape: f32[2,256,16], index: 7, kind: input, shape index: {}]   ;;  %s4767_s8 = inlined_call_operand.vmem [shape: f32[2,16,16], index: 8, kind: input, shape index: {}]   ;;  %s4768_s9 = inlined_call_operand.vmem [shape: f32[2,1,16], index: 9, kind: input, shape index: {}]   ;;  %s4769_s10 = inlined_call_operand.vmem [shape: f32[32,8], index: 10, kind: input, shape index: {}]   ;;  %s4770_s11 = inlined_call_operand.vmem [shape: f32[1,8], index: 11, kind: input, shape index: {}]   ;;  %s4771_s12 = inlined_call_operand.vmem [shape: f32[8,1], index: 12, kind: input, shape index: {}]   ;;  %s4772_s13 = inlined_call_operand.<no memory space> [shape: f32[1,1], index: 13, kind: input, shape index: {}]   ;;  %s4773_s14 = inlined_call_operand.vmem [shape: f32[2,1], index: 14, kind: output, shape index: {}]  }
   0x1   :  { %v2955_v0 = vld [vmem:[%s4759_s3 + $0x1e0] sm:$0xff]  ;;  %v2960_v1 = vld [vmem:[%s4759_s3 + $0x1e8] sm:$0xff]  ;;  %v2965_v2 = vld [vmem:[%s4759_s3 + $0x1f0] sm:$0xff] }
   0x2   :  { %4884 = vst [vmem:[#allocation3_spill] sm:$0xff] %v2965_v2  ;;  %126 = vmatpush.msra.mxu0 %v2955_v0  ;;  %146 = vmatpush.msra.mxu1 %v2960_v1  ;;  %v2972_v3 = vld [vmem:[%s4759_s3 + $0x1c0] sm:$0xff]  ;;  %v2977_v4 = vld [vmem:[%s4759_s3 + $0x1c8] sm:$0xff]  ;;  %v2982_v5 = vld [vmem:[%s4759_s3 + $0x1d0] sm:$0xff] }
   0x3   :  { %166 = vmatpush.msra.mxu2 %v2965_v2  ;;  %v2988_v6 = vld [vmem:[%s4759_s3 + $0x1a0] sm:$0xff]  ;;  %v2993_v7 = vld [vmem:[%s4759_s3 + $0x1a8] sm:$0xff]  ;;  %v3000_v8 = vld [vmem:[%s4759_s3 + $0x1b0] sm:$0xff] }
   0x4   :  { %127 = vmatpush.msra.mxu0 %v2972_v3  ;;  %147 = vmatpush.msra.mxu1 %v2977_v4  ;;  %v3006_v9 = vld [vmem:[%s4759_s3 + $0x180] sm:$0xff]  ;;  %v3011_v10 = vld [vmem:[%s4759_s3 + $0x188] sm:$0xff]  ;;  %v3018_v11 = vld [vmem:[%s4759_s3 + $0x190] sm:$0xff] }
   0x5   :  { %167 = vmatpush.msra.mxu2 %v2982_v5  ;;  %v3024_v12 = vld [vmem:[%s4759_s3 + $0x160] sm:$0xff]  ;;  %v3029_v13 = vld [vmem:[%s4759_s3 + $0x168] sm:$0xff]  ;;  %v3036_v14 = vld [vmem:[%s4759_s3 + $0x170] sm:$0xff] }
   0x6   :  { %128 = vmatpush.msra.mxu0 %v2988_v6  ;;  %148 = vmatpush.msra.mxu1 %v2993_v7  ;;  %v3042_v15 = vld [vmem:[%s4759_s3 + $0x140] sm:$0xff]  ;;  %v3047_v16 = vld [vmem:[%s4759_s3 + $0x148] sm:$0xff]  ;;  %v3052_v17 = vld [vmem:[%s4759_s3 + $0x1f8] sm:$0xff] }
   0x7   :  { %168 = vmatpush.msra.mxu2 %v3000_v8  ;;  %v3059_v18 = vld [vmem:[%s4759_s3 + $0x150] sm:$0xff]  ;;  %v3064_v19 = vld [vmem:[%s4759_s3 + $0x1d8] sm:$0xff]  ;;  %v3070_v20 = vld [vmem:[%s4759_s3 + $0x120] sm:$0xff]  ;;  %186 = vmatpush.msra.mxu3 %v3052_v17 }
   0x8   :  { %129 = vmatpush.msra.mxu0 %v3006_v9  ;;  %149 = vmatpush.msra.mxu1 %v3011_v10  ;;  %v3075_v21 = vld [vmem:[%s4759_s3 + $0x128] sm:$0xff]  ;;  %v3083_v22 = vld [vmem:[%s4759_s3 + $0x130] sm:$0xff]  ;;  %v3088_v23 = vld [vmem:[%s4759_s3 + $0x1b8] sm:$0xff] }
   0x9   :  { %169 = vmatpush.msra.mxu2 %v3018_v11  ;;  %v3094_v24 = vld [vmem:[%s4759_s3 + $0x100] sm:$0xff]  ;;  %v3099_v25 = vld [vmem:[%s4759_s3 + $0x108] sm:$0xff]  ;;  %187 = vmatpush.msra.mxu3 %v3064_v19  ;;  %v3107_v26 = vld [vmem:[%s4759_s3 + $0x110] sm:$0xff] }
   0xa   :  { %130 = vmatpush.msra.mxu0 %v3024_v12  ;;  %150 = vmatpush.msra.mxu1 %v3029_v13  ;;  %v3112_v27 = vld [vmem:[%s4759_s3 + $0x198] sm:$0xff]  ;;  %v3118_v28 = vld [vmem:[%s4759_s3 + $0xe0] sm:$0xff]  ;;  %v3123_v29 = vld [vmem:[%s4759_s3 + $0xe8] sm:$0xff] }
   0xb   :  { %170 = vmatpush.msra.mxu2 %v3036_v14  ;;  %188 = vmatpush.msra.mxu3 %v3088_v23  ;;  %v3131_v30 = vld [vmem:[%s4759_s3 + $0xf0] sm:$0xff]  ;;  %v3136_v31 = vld [vmem:[%s4759_s3 + $0x178] sm:$0xff]  ;;  %v3142_v32 = vld [vmem:[%s4759_s3 + $0xc0] sm:$0xff] }
   0xc   :  { %131 = vmatpush.msra.mxu0 %v3042_v15  ;;  %151 = vmatpush.msra.mxu1 %v3047_v16  ;;  %4885 = vst [vmem:[#allocation4_spill] sm:$0xff] %v3142_v32  ;;  %v3147_v33 = vld [vmem:[%s4759_s3 + $0xc8] sm:$0xff]  ;;  %v3155_v34 = vld [vmem:[%s4759_s3 + $0xd0] sm:$0xff]  ;;  %v3160_v35 = vld [vmem:[%s4759_s3 + $0x158] sm:$0xff] }
   0xd   :  { %171 = vmatpush.msra.mxu2 %v3059_v18  ;;  %4886 = vst [vmem:[#allocation5_spill] sm:$0xff] %v3147_v33  ;;  %189 = vmatpush.msra.mxu3 %v3112_v27  ;;  %v3166_v36 = vld [vmem:[%s4759_s3 + $0xa0] sm:$0xff]  ;;  %v3171_v37 = vld [vmem:[%s4759_s3 + $0xa8] sm:$0xff]  ;;  %v3179_v38 = vld [vmem:[%s4759_s3 + $0xb0] sm:$0xff] }
   0xe   :  { %132 = vmatpush.msra.mxu0 %v3070_v20  ;;  %152 = vmatpush.msra.mxu1 %v3075_v21  ;;  %4887 = vst [vmem:[#allocation6_spill] sm:$0xff] %v3155_v34  ;;  %v3184_v39 = vld [vmem:[%s4759_s3 + $0x138] sm:$0xff]  ;;  %v3190_v40 = vld [vmem:[%s4759_s3 + $0x80] sm:$0xff]  ;;  %v3195_v41 = vld [vmem:[%s4759_s3 + $0x88] sm:$0xff] }
   0xf   :  { %172 = vmatpush.msra.mxu2 %v3083_v22  ;;  %4888 = vst [vmem:[#allocation7_spill] sm:$0xff] %v3166_v36  ;;  %190 = vmatpush.msra.mxu3 %v3136_v31  ;;  %v3203_v42 = vld [vmem:[%s4759_s3 + $0x90] sm:$0xff]  ;;  %v3208_v43 = vld [vmem:[%s4759_s3 + $0x118] sm:$0xff]  ;;  %v3214_v44 = vld [vmem:[%s4759_s3 + $0x60] sm:$0xff] }
  0x10   :  { %133 = vmatpush.msra.mxu0 %v3094_v24  ;;  %153 = vmatpush.msra.mxu1 %v3099_v25  ;;  %4889 = vst [vmem:[#allocation8_spill] sm:$0xff] %v3171_v37  ;;  %v3219_v45 = vld [vmem:[%s4759_s3 + $0x68] sm:$0xff]  ;;  %v3227_v46 = vld [vmem:[%s4759_s3 + $0x70] sm:$0xff]  ;;  %v3232_v47 = vld [vmem:[%s4759_s3 + $0xf8] sm:$0xff] }
  0x11   :  { %173 = vmatpush.msra.mxu2 %v3107_v26  ;;  %4890 = vst [vmem:[#allocation9_spill] sm:$0xff] %v3179_v38  ;;  %191 = vmatpush.msra.mxu3 %v3160_v35  ;;  %v3238_v48 = vld [vmem:[%s4759_s3 + $0x40] sm:$0xff]  ;;  %v3243_v49 = vld [vmem:[%s4759_s3 + $0x48] sm:$0xff]  ;;  %v3251_v50 = vld [vmem:[%s4759_s3 + $0x50] sm:$0xff] }
  0x12   :  { %134 = vmatpush.msra.mxu0 %v3118_v28  ;;  %154 = vmatpush.msra.mxu1 %v3123_v29  ;;  %4891 = vst [vmem:[#allocation10_spill] sm:$0xff] %v3190_v40  ;;  %v3256_v51 = vld [vmem:[%s4759_s3 + $0xd8] sm:$0xff]  ;;  %v3262_v52 = vld [vmem:[%s4759_s3 + $0x20] sm:$0xff]  ;;  %v3267_v53 = vld [vmem:[%s4759_s3 + $0x28] sm:$0xff] }
  0x13   :  { %174 = vmatpush.msra.mxu2 %v3131_v30  ;;  %4892 = vst [vmem:[#allocation11_spill] sm:$0xff] %v3195_v41  ;;  %192 = vmatpush.msra.mxu3 %v3184_v39  ;;  %v3275_v54 = vld [vmem:[%s4759_s3 + $0x30] sm:$0xff]  ;;  %v3280_v55 = vld [vmem:[%s4759_s3 + $0xb8] sm:$0xff]  ;;  %v3286_v56 = vld [vmem:[%s4759_s3] sm:$0xff] }
  0x14   :  { %135 = vmatpush.msra.mxu0 %v3142_v32  ;;  %155 = vmatpush.msra.mxu1 %v3147_v33  ;;  %4893 = vst [vmem:[#allocation12_spill] sm:$0xff] %v3203_v42  ;;  %v3291_v57 = vld [vmem:[%s4759_s3 + $0x8] sm:$0xff]  ;;  %v3299_v58 = vld [vmem:[%s4759_s3 + $0x10] sm:$0xff]  ;;  %v3308_v59 = vld [vmem:[%s4759_s3 + $0x98] sm:$0xff] }
  0x15   :  { %175 = vmatpush.msra.mxu2 %v3155_v34  ;;  %4894 = vst [vmem:[#allocation13_spill] sm:$0xff] %v3214_v44  ;;  %193 = vmatpush.msra.mxu3 %v3208_v43  ;;  %v3314_v61 = vld [vmem:[%s4759_s3 + $0x78] sm:$0xff] }
  0x16   :  { %136 = vmatpush.msra.mxu0 %v3166_v36  ;;  %156 = vmatpush.msra.mxu1 %v3171_v37  ;;  %4895 = vst [vmem:[#allocation14_spill] sm:$0xff] %v3219_v45  ;;  %v3321_v62 = vld [vmem:[%s4759_s3 + $0x58] sm:$0xff] }
  0x17   :  { %176 = vmatpush.msra.mxu2 %v3179_v38  ;;  %4896 = vst [vmem:[#allocation15_spill] sm:$0xff] %v3227_v46  ;;  %194 = vmatpush.msra.mxu3 %v3232_v47  ;;  %v3330_v63 = vld [vmem:[%s4759_s3 + $0x38] sm:$0xff] }
  0x18   :  { %137 = vmatpush.msra.mxu0 %v3190_v40  ;;  %157 = vmatpush.msra.mxu1 %v3195_v41  ;;  %4897 = vst [vmem:[#allocation16_spill] sm:$0xff] %v3238_v48 }
  0x19   :  { %177 = vmatpush.msra.mxu2 %v3203_v42  ;;  %4898 = vst [vmem:[#allocation17_spill] sm:$0xff] %v3243_v49  ;;  %195 = vmatpush.msra.mxu3 %v3256_v51 }
  0x1a   :  { %138 = vmatpush.msra.mxu0 %v3214_v44  ;;  %158 = vmatpush.msra.mxu1 %v3219_v45  ;;  %4899 = vst [vmem:[#allocation18_spill] sm:$0xff] %v3251_v50 }
  0x1b   :  { %4900 = vst [vmem:[#allocation19_spill] sm:$0xff] %v3256_v51  ;;  %178 = vmatpush.msra.mxu2 %v3227_v46  ;;  %196 = vmatpush.msra.mxu3 %v3280_v55 }
  0x1c   :  { %4901 = vst [vmem:[#allocation20_spill] sm:$0xff] %v3262_v52  ;;  %139 = vmatpush.msra.mxu0 %v3238_v48  ;;  %159 = vmatpush.msra.mxu1 %v3243_v49 }
  0x1d   :  { %4902 = vst [vmem:[#allocation21_spill] sm:$0xff] %v3267_v53  ;;  %179 = vmatpush.msra.mxu2 %v3251_v50  ;;  %197 = vmatpush.msra.mxu3 %v3308_v59 }
  0x1e   :  { %4903 = vst [vmem:[#allocation22_spill] sm:$0xff] %v3275_v54  ;;  %140 = vmatpush.msra.mxu0 %v3262_v52  ;;  %160 = vmatpush.msra.mxu1 %v3267_v53 }
  0x1f   :  { %4904 = vst [vmem:[#allocation23_spill] sm:$0xff] %v3280_v55  ;;  %180 = vmatpush.msra.mxu2 %v3275_v54  ;;  %198 = vmatpush.msra.mxu3 %v3314_v61 }
  0x20   :  { %4905 = vst [vmem:[#allocation24_spill] sm:$0xff] %v3286_v56  ;;  %141 = vmatpush.msra.mxu0 %v3286_v56  ;;  %161 = vmatpush.msra.mxu1 %v3291_v57 }
  0x21   :  { %4906 = vst [vmem:[#allocation25_spill] sm:$0xff] %v3291_v57  ;;  %181 = vmatpush.msra.mxu2 %v3299_v58  ;;  %142 = vmatmul.f32.vlgmr.msra.gmra.mxu0 %v2873_v60 }
  0x22   :  { %4907 = vst [vmem:[#allocation26_spill] sm:$0xff] %v3299_v58  ;;  %162 = vmatmul.f32.vlgmr.msra.gmra.mxu1 %v2873_v60  ;;  %182 = vmatmul.f32.vlgmr.msra.gmra.mxu2 %v2873_v60 }
  0x23   :  { %4908 = vst [vmem:[#allocation27_spill] sm:$0xff] %v3308_v59  ;;  %280 = vmatpush.msrb.mxu0 %v2955_v0  ;;  %300 = vmatpush.msrb.mxu1 %v2960_v1 }
  0x24   :  { %4909 = vst [vmem:[#allocation28_spill] sm:$0xff] %v3314_v61  ;;  %320 = vmatpush.msrb.mxu2 %v2965_v2  ;;  %199 = vmatpush.msra.mxu3 %v3321_v62  ;;  %v3339_v2 = vld [vmem:[%s4759_s3 + $0x18] sm:$0xff] }
  0x25   :  { %4910 = vst [vmem:[#allocation29_spill] sm:$0xff] %v3321_v62  ;;  %281 = vmatpush.msrb.mxu0 %v2972_v3  ;;  %301 = vmatpush.msrb.mxu1 %v2977_v4 }
  0x26   :  { %4911 = vst [vmem:[#allocation30_spill] sm:$0xff] %v3330_v63  ;;  %321 = vmatpush.msrb.mxu2 %v2982_v5  ;;  %200 = vmatpush.msra.mxu3 %v3330_v63 }
  0x27   :  { %282 = vmatpush.msrb.mxu0 %v2988_v6  ;;  %4912 = vst [vmem:[#allocation31_spill] sm:$0xff] %v3339_v2  ;;  %302 = vmatpush.msrb.mxu1 %v2993_v7 }
  0x28   :  { %322 = vmatpush.msrb.mxu2 %v3000_v8  ;;  %201 = vmatpush.msra.mxu3 %v3339_v2 }
  0x29   :  { %283 = vmatpush.msrb.mxu0 %v3006_v9  ;;  %303 = vmatpush.msrb.mxu1 %v3011_v10 }
  0x2a   :  { %323 = vmatpush.msrb.mxu2 %v3018_v11  ;;  %202 = vmatmul.f32.vlgmr.msra.gmra.mxu3 %v2873_v60  ;;  %v4913_v60 = vld [vmem:[#allocation3_spill] sm:$0xff] }
  0x2b   :  { %284 = vmatpush.msrb.mxu0 %v3024_v12  ;;  %304 = vmatpush.msrb.mxu1 %v3029_v13 }
  0x2c   :  { %340 = vmatpush.msrb.mxu3 %v3052_v17  ;;  %324 = vmatpush.msrb.mxu2 %v3036_v14 }
  0x2d   :  { %285 = vmatpush.msrb.mxu0 %v3042_v15  ;;  %305 = vmatpush.msrb.mxu1 %v3047_v16 }
  0x2e   :  { %341 = vmatpush.msrb.mxu3 %v3064_v19  ;;  %325 = vmatpush.msrb.mxu2 %v3059_v18 }
  0x2f   :  { %286 = vmatpush.msrb.mxu0 %v3070_v20  ;;  %306 = vmatpush.msrb.mxu1 %v3075_v21 }
  0x30   :  { %342 = vmatpush.msrb.mxu3 %v3088_v23  ;;  %326 = vmatpush.msrb.mxu2 %v3083_v22 }
  0x31   :  { %287 = vmatpush.msrb.mxu0 %v3094_v24  ;;  %307 = vmatpush.msrb.mxu1 %v3099_v25 }
  0x32   :  { %343 = vmatpush.msrb.mxu3 %v3112_v27  ;;  %327 = vmatpush.msrb.mxu2 %v3107_v26 }
  0x33   :  { %288 = vmatpush.msrb.mxu0 %v3118_v28  ;;  %308 = vmatpush.msrb.mxu1 %v3123_v29 }
  0x34   :  { %344 = vmatpush.msrb.mxu3 %v3136_v31  ;;  %328 = vmatpush.msrb.mxu2 %v3131_v30 }
  0x35   :  { %289 = vmatpush.msrb.mxu0 %v3142_v32  ;;  %309 = vmatpush.msrb.mxu1 %v3147_v33 }
  0x36   :  { %345 = vmatpush.msrb.mxu3 %v3160_v35  ;;  %329 = vmatpush.msrb.mxu2 %v3155_v34 }
  0x37   :  { %290 = vmatpush.msrb.mxu0 %v3166_v36  ;;  %310 = vmatpush.msrb.mxu1 %v3171_v37 }
  0x38   :  { %346 = vmatpush.msrb.mxu3 %v3184_v39  ;;  %330 = vmatpush.msrb.mxu2 %v3179_v38 }
  0x39   :  { %291 = vmatpush.msrb.mxu0 %v3190_v40  ;;  %311 = vmatpush.msrb.mxu1 %v3195_v41 }
  0x3a   :  { %347 = vmatpush.msrb.mxu3 %v3208_v43  ;;  %331 = vmatpush.msrb.mxu2 %v3203_v42 }
  0x3b   :  { %292 = vmatpush.msrb.mxu0 %v3214_v44  ;;  %312 = vmatpush.msrb.mxu1 %v3219_v45 }
  0x3c   :  { %348 = vmatpush.msrb.mxu3 %v3232_v47  ;;  %332 = vmatpush.msrb.mxu2 %v3227_v46 }
  0x3d   :  { %293 = vmatpush.msrb.mxu0 %v3238_v48  ;;  %313 = vmatpush.msrb.mxu1 %v3243_v49 }
  0x3e   :  { %349 = vmatpush.msrb.mxu3 %v3256_v51  ;;  %333 = vmatpush.msrb.mxu2 %v3251_v50 }
  0x3f   :  { %294 = vmatpush.msrb.mxu0 %v3262_v52  ;;  %314 = vmatpush.msrb.mxu1 %v3267_v53 }
  0x40   :  { %350 = vmatpush.msrb.mxu3 %v3280_v55  ;;  %334 = vmatpush.msrb.mxu2 %v3275_v54 }
  0x41   :  { %295 = vmatpush.msrb.mxu0 %v3286_v56  ;;  %315 = vmatpush.msrb.mxu1 %v3291_v57 }
  0x42   :  { %351 = vmatpush.msrb.mxu3 %v3308_v59  ;;  %335 = vmatpush.msrb.mxu2 %v3299_v58 }
  0x43   :  { %434 = vmatpush.msra.mxu0 %v2955_v0  ;;  %454 = vmatpush.msra.mxu1 %v2960_v1 }
  0x44   :  { %352 = vmatpush.msrb.mxu3 %v3314_v61  ;;  %474 = vmatpush.msra.mxu2 %v4913_v60 }
  0x45   :  { %435 = vmatpush.msra.mxu0 %v2972_v3  ;;  %455 = vmatpush.msra.mxu1 %v2977_v4 }
  0x46   :  { %353 = vmatpush.msrb.mxu3 %v3321_v62  ;;  %475 = vmatpush.msra.mxu2 %v2982_v5 }
  0x47   :  { %436 = vmatpush.msra.mxu0 %v2988_v6  ;;  %456 = vmatpush.msra.mxu1 %v2993_v7 }
  0x48   :  { %354 = vmatpush.msrb.mxu3 %v3330_v63  ;;  %476 = vmatpush.msra.mxu2 %v3000_v8 }
  0x49   :  { %437 = vmatpush.msra.mxu0 %v3006_v9  ;;  %457 = vmatpush.msra.mxu1 %v3011_v10 }
  0x4a   :  { %355 = vmatpush.msrb.mxu3 %v3339_v2  ;;  %477 = vmatpush.msra.mxu2 %v3018_v11 }
  0x4b   :  { %438 = vmatpush.msra.mxu0 %v3024_v12  ;;  %458 = vmatpush.msra.mxu1 %v3029_v13 }
  0x4c   :  { %494 = vmatpush.msra.mxu3 %v3052_v17  ;;  %478 = vmatpush.msra.mxu2 %v3036_v14 }
  0x4d   :  { %439 = vmatpush.msra.mxu0 %v3042_v15  ;;  %459 = vmatpush.msra.mxu1 %v3047_v16 }
  0x4e   :  { %495 = vmatpush.msra.mxu3 %v3064_v19  ;;  %479 = vmatpush.msra.mxu2 %v3059_v18 }
  0x4f   :  { %440 = vmatpush.msra.mxu0 %v3070_v20  ;;  %460 = vmatpush.msra.mxu1 %v3075_v21 }
  0x50   :  { %496 = vmatpush.msra.mxu3 %v3088_v23  ;;  %480 = vmatpush.msra.mxu2 %v3083_v22 }
  0x51   :  { %441 = vmatpush.msra.mxu0 %v3094_v24  ;;  %461 = vmatpush.msra.mxu1 %v3099_v25 }
  0x52   :  { %497 = vmatpush.msra.mxu3 %v3112_v27  ;;  %481 = vmatpush.msra.mxu2 %v3107_v26 }
  0x53   :  { %442 = vmatpush.msra.mxu0 %v3118_v28  ;;  %462 = vmatpush.msra.mxu1 %v3123_v29 }
  0x54   :  { %498 = vmatpush.msra.mxu3 %v3136_v31  ;;  %482 = vmatpush.msra.mxu2 %v3131_v30 }
  0x55   :  { %443 = vmatpush.msra.mxu0 %v3142_v32  ;;  %463 = vmatpush.msra.mxu1 %v3147_v33 }
  0x56   :  { %499 = vmatpush.msra.mxu3 %v3160_v35  ;;  %483 = vmatpush.msra.mxu2 %v3155_v34 }
  0x57   :  { %444 = vmatpush.msra.mxu0 %v3166_v36  ;;  %464 = vmatpush.msra.mxu1 %v3171_v37 }
  0x58   :  { %500 = vmatpush.msra.mxu3 %v3184_v39  ;;  %484 = vmatpush.msra.mxu2 %v3179_v38 }
  0x59   :  { %445 = vmatpush.msra.mxu0 %v3190_v40  ;;  %465 = vmatpush.msra.mxu1 %v3195_v41 }
  0x5a   :  { %501 = vmatpush.msra.mxu3 %v3208_v43  ;;  %485 = vmatpush.msra.mxu2 %v3203_v42 }
  0x5b   :  { %446 = vmatpush.msra.mxu0 %v3214_v44  ;;  %466 = vmatpush.msra.mxu1 %v3219_v45 }
  0x5c   :  { %502 = vmatpush.msra.mxu3 %v3232_v47  ;;  %486 = vmatpush.msra.mxu2 %v3227_v46 }
  0x5d   :  { %447 = vmatpush.msra.mxu0 %v3238_v48  ;;  %467 = vmatpush.msra.mxu1 %v3243_v49 }
  0x5e   :  { %503 = vmatpush.msra.mxu3 %v3256_v51  ;;  %487 = vmatpush.msra.mxu2 %v3251_v50 }
  0x5f   :  { %448 = vmatpush.msra.mxu0 %v3262_v52  ;;  %468 = vmatpush.msra.mxu1 %v3267_v53 }
  0x60   :  { %504 = vmatpush.msra.mxu3 %v3280_v55  ;;  %488 = vmatpush.msra.mxu2 %v3275_v54  ;;  %v58_v54 = vld [vmem:[%s4760_s0] sm:$0xff] }
  0x61   :  { %449 = vmatpush.msra.mxu0 %v3286_v56  ;;  %469 = vmatpush.msra.mxu1 %v3291_v57  ;;  %v59_v56 = vld [vmem:[%s4760_s0 + $0x8] sm:$0xff] }
  0x62   :  { %505 = vmatpush.msra.mxu3 %v3308_v59  ;;  %489 = vmatpush.msra.mxu2 %v3299_v58 }
  0x64   :  { %506 = vmatpush.msra.mxu3 %v3314_v61 }
  0x66   :  { %507 = vmatpush.msra.mxu3 %v3321_v62 }
  0x68   :  { %508 = vmatpush.msra.mxu3 %v3330_v63  ;;  %v60_v63 = vld [vmem:[%s4760_s0 + $0x10] sm:$0xff] }
  0x6a   :  { %509 = vmatpush.msra.mxu3 %v3339_v2 }
  0x9e   :  { %v143_v53 = vpop.f32.mrf.mxu0 }
  0x9f   :  { %v206_v57 = vadd.f32 %v143_v53, %v58_v54  ;;  %v163_v52 = vpop.f32.mrf.mxu1 }
  0xa0   :  { %v207_v58 = vadd.f32 %v163_v52, %v59_v56  ;;  %v61_v52 = vld [vmem:[%s4760_s0 + $0x18] sm:$0xff] }
  0xa1   :  { %v2489_v50 = vmul.f32 -1.442695, %v206_v57 }
  0xa2   :  { %v2490_v49 = vmul.f32 -1.442695, %v207_v58 }
  0xa3   :  { %2640 = vpow2.f32 %v2489_v50 }
  0xa4   :  { %2642 = vpow2.f32 %v2490_v49 }
  0xa5   :  { %v183_v2 = vpop.f32.mrf.mxu2 }
  0xa6   :  { %v208_v62 = vadd.f32 %v183_v2, %v60_v63 }
  0xa8   :  { %v2491_v48 = vmul.f32 -1.442695, %v208_v62 }
  0xa9   :  { %v2641_v61 = vpop.eup %2640 }
  0xaa   :  { %v2643_v46 = vpop.eup %2642  ;;  %v219_v45 = vadd.f32 1.0, %v2641_v61  ;;  %2644 = vpow2.f32 %v2491_v48 }
  0xab   :  { %v220_v44 = vadd.f32 1.0, %v2643_v46 }
  0xac   :  { %2646 = vrcp.f32 %v219_v45  ;;  %v233_v48 = vand.u32 2147483648, %v219_v45  ;;  %v231_v59 = vand.u32 2147483647, %v219_v45  ;;  %vm227_vm2 = vweird.f32 %v219_v45 }
  0xad   :  { %2648 = vrcp.f32 %v220_v44  ;;  %v203_v50 = vpop.f32.mrf.mxu3  ;;  %v248_v46 = vand.u32 2147483648, %v220_v44  ;;  %v246_v41 = vand.u32 2147483647, %v220_v44  ;;  %vm242_vm3 = vweird.f32 %v220_v44 }
  0xae   :  { %v209_v54 = vadd.f32 %v203_v50, %v61_v52  ;;  %vm232_vm5 = vcmp.eq.f32.partialorder %v231_v59, 8.507059e+37 }
  0xaf   :  { %vm247_vm7 = vcmp.eq.f32.partialorder %v246_v41, 8.507059e+37 }
  0xb0   :  { %v2645_v53 = vpop.eup %2644 }
  0xb1   :  { %v221_v56 = vadd.f32 1.0, %v2645_v53  ;;  %v234_v53 = vor.u32 1.1754944e-38, %v233_v48 }
  0xb2   :  { %v2647_v57 = vpop.eup %2646 }
  0xb3   :  { %v2649_v49 = vpop.eup %2648  ;;  %v223_v58 = vmul.f32 %v2647_v57, %v219_v45  ;;  %2650 = vrcp.f32 %v221_v56  ;;  %vm228_vm0 = vweird.f32 %v2647_v57  ;;  %v263_v59 = vand.u32 2147483648, %v221_v56 }
  0xb4   :  { %v238_v2 = vmul.f32 %v2649_v49, %v220_v44  ;;  %2652 = vtanh.f32 %v209_v54  ;;  %vm243_vm1 = vweird.f32 %v2649_v49  ;;  %vm229_vm4 = vmor %vm227_vm2, %vm228_vm0  ;;  %v249_v54 = vor.u32 1.1754944e-38, %v248_v46 }
  0xb5   :  { %v224_v62 = vsub.f32 1.0, %v223_v58  ;;  %vm244_vm6 = vmor %vm242_vm3, %vm243_vm1  ;;  %vm257_vm10 = vweird.f32 %v221_v56  ;;  %v261_v41 = vand.u32 2147483647, %v221_v56 }
  0xb6   :  { %v239_v61 = vsub.f32 1.0, %v238_v2 }
  0xb7   :  { %v225_v63 = vmul.f32 %v2647_v57, %v224_v62  ;;  %vm262_vm12 = vcmp.eq.f32.partialorder %v261_v41, 8.507059e+37  ;;  %v4929_v41 = vld [vmem:[#allocation29_spill] sm:$0xff] }
  0xb8   :  { %v240_v42 = vmul.f32 %v2649_v49, %v239_v61  ;;  %v3480_v61 = vld [vmem:[%s4761_s1] sm:$0xff] }
  0xb9   :  { %v2651_v40 = vpop.eup %2650  ;;  %v226_v55 = vadd.f32 %v2647_v57, %v225_v63  ;;  %vm50_vm8 = vcmp.gt.s32.totalorder %v3480_v61, 0 }
  0xba   :  { %v2653_v52 = vpop.eup %2652  ;;  %v253_v50 = vmul.f32 %v2651_v40, %v221_v56  ;;  %v241_v38 = vadd.f32 %v2649_v49, %v240_v42  ;;  %vm258_vm9 = vweird.f32 %v2651_v40  ;;  %v4915_v56 = vld [vmem:[#allocation8_spill] sm:$0xff] }
  0xbb   :  { %v230_v58 = vsel %vm229_vm4, %v2647_v57, %v226_v55  ;;  %vm259_vm11 = vmor %vm257_vm10, %vm258_vm9 }
  0xbc   :  { %v254_v2 = vsub.f32 1.0, %v253_v50  ;;  %v235_v62 = vsel %vm232_vm5, %v234_v53, %v230_v58  ;;  %v245_v37 = vsel %vm244_vm6, %v2649_v49, %v241_v38  ;;  %v264_v49 = vor.u32 1.1754944e-38, %v263_v59  ;;  %v4917_v50 = vld [vmem:[#allocation23_spill] sm:$0xff]  ;;  %v4918_v53 = vld [vmem:[#allocation10_spill] sm:$0xff]  ;;  %v4920_v58 = vld [vmem:[#allocation12_spill] sm:$0xff] }
  0xbd   :  { %v250_v45 = vsel %vm247_vm7, %v249_v54, %v245_v37  ;;  %v269_v44 = vmul.f32 %v2653_v52, %v235_v62  ;;  %v4916_v52 = vld [vmem:[#allocation9_spill] sm:$0xff]  ;;  %v4919_v54 = vld [vmem:[#allocation11_spill] sm:$0xff]  ;;  %v4928_v59 = vld [vmem:[#allocation18_spill] sm:$0xff]  ;;  %vm51_vm5 = vcmp.gt.s32.totalorder %v3480_v61, 1 }
  0xbe   :  { %v255_v63 = vmul.f32 %v2651_v40, %v254_v2  ;;  %v268_v36 = vmul.f32 0.0, %v250_v45  ;;  %v4921_v2 = vld [vmem:[#allocation27_spill] sm:$0xff]  ;;  %v4922_v62 = vld [vmem:[#allocation13_spill] sm:$0xff]  ;;  %v4923_v45 = vld [vmem:[#allocation14_spill] sm:$0xff] }
  0xc0   :  { %v270_v42 = vadd.f32 %v269_v44, %v268_v36  ;;  %v256_v55 = vadd.f32 %v2651_v40, %v255_v63  ;;  %v4924_v44 = vld [vmem:[#allocation15_spill] sm:$0xff]  ;;  %v4925_v63 = vld [vmem:[#allocation28_spill] sm:$0xff] }
  0xc2   :  { %2654 = vtanh.f32 %v270_v42  ;;  %v3485_v38 = vsel %vm50_vm8, %v270_v42, 0.0  ;;  %v260_v57 = vsel %vm259_vm11, %v2651_v40, %v256_v55  ;;  %v4914_v40 = vld [vmem:[#allocation7_spill] sm:$0xff]  ;;  %v4926_v42 = vld [vmem:[#allocation16_spill] sm:$0xff]  ;;  %v4927_v55 = vld [vmem:[#allocation17_spill] sm:$0xff] }
  0xc3   :  { %v265_v48 = vsel %vm262_vm12, %v264_v49, %v260_v57  ;;  %v4930_v57 = vld [vmem:[#allocation20_spill] sm:$0xff]  ;;  %v4931_v49 = vld [vmem:[#allocation21_spill] sm:$0xff] }
  0xc8   :  { %v2655_v37 = vpop.eup %2654 }
  0xc9   :  { %v272_v46 = vmul.f32 %v2655_v37, %v265_v48  ;;  %v4932_v37 = vld [vmem:[#allocation22_spill] sm:$0xff] }
  0xca   :  { %v4933_v48 = vld [vmem:[#allocation30_spill] sm:$0xff] }
  0xcb   :  { %2496 = vmatmul.msk.f32.vlgmr.msrb.gmra.mxu0 %vm50_vm8, %v272_v46  ;;  %2497 = vmatmul.msk.f32.vlgmr.msrb.gmra.mxu1 %vm50_vm8, %v272_v46  ;;  %v3493_v36 = vsel %vm50_vm8, %v272_v46, 0.0 }
  0xcc   :  { %2498 = vmatmul.msk.f32.vlgmr.msrb.gmra.mxu2 %vm50_vm8, %v272_v46  ;;  %2499 = vmatmul.msk.f32.vlgmr.msrb.gmra.mxu3 %vm50_vm8, %v272_v46  ;;  %v4934_v46 = vld [vmem:[#allocation24_spill] sm:$0xff] }
  0xcd   :  { %588 = vmatpush.msrb.mxu0 %v2955_v0  ;;  %608 = vmatpush.msrb.mxu1 %v2960_v1 }
  0xce   :  { %628 = vmatpush.msrb.mxu2 %v4913_v60  ;;  %648 = vmatpush.msrb.mxu3 %v3052_v17 }
  0xcf   :  { %589 = vmatpush.msrb.mxu0 %v2972_v3  ;;  %609 = vmatpush.msrb.mxu1 %v2977_v4 }
  0xd0   :  { %629 = vmatpush.msrb.mxu2 %v2982_v5  ;;  %649 = vmatpush.msrb.mxu3 %v3064_v19 }
  0xd1   :  { %590 = vmatpush.msrb.mxu0 %v2988_v6  ;;  %610 = vmatpush.msrb.mxu1 %v2993_v7 }
  0xd2   :  { %630 = vmatpush.msrb.mxu2 %v3000_v8  ;;  %650 = vmatpush.msrb.mxu3 %v3088_v23 }
  0xd3   :  { %591 = vmatpush.msrb.mxu0 %v3006_v9  ;;  %611 = vmatpush.msrb.mxu1 %v3011_v10 }
  0xd4   :  { %631 = vmatpush.msrb.mxu2 %v3018_v11  ;;  %651 = vmatpush.msrb.mxu3 %v3112_v27 }
  0xd5   :  { %592 = vmatpush.msrb.mxu0 %v3024_v12  ;;  %612 = vmatpush.msrb.mxu1 %v3029_v13 }
  0xd6   :  { %632 = vmatpush.msrb.mxu2 %v3036_v14  ;;  %652 = vmatpush.msrb.mxu3 %v3136_v31 }
  0xd7   :  { %593 = vmatpush.msrb.mxu0 %v3042_v15  ;;  %613 = vmatpush.msrb.mxu1 %v3047_v16 }
  0xd8   :  { %633 = vmatpush.msrb.mxu2 %v3059_v18  ;;  %653 = vmatpush.msrb.mxu3 %v3160_v35 }
  0xd9   :  { %594 = vmatpush.msrb.mxu0 %v3070_v20  ;;  %614 = vmatpush.msrb.mxu1 %v3075_v21 }
  0xda   :  { %634 = vmatpush.msrb.mxu2 %v3083_v22  ;;  %654 = vmatpush.msrb.mxu3 %v3184_v39 }
  0xdb   :  { %595 = vmatpush.msrb.mxu0 %v3094_v24  ;;  %615 = vmatpush.msrb.mxu1 %v3099_v25 }
  0xdc   :  { %635 = vmatpush.msrb.mxu2 %v3107_v26  ;;  %655 = vmatpush.msrb.mxu3 %v3208_v43 }
  0xdd   :  { %596 = vmatpush.msrb.mxu0 %v3118_v28  ;;  %616 = vmatpush.msrb.mxu1 %v3123_v29 }
  0xde   :  { %636 = vmatpush.msrb.mxu2 %v3131_v30  ;;  %656 = vmatpush.msrb.mxu3 %v3232_v47 }
  0xdf   :  { %597 = vmatpush.msrb.mxu0 %v3142_v32  ;;  %617 = vmatpush.msrb.mxu1 %v3147_v33 }
  0xe0   :  { %637 = vmatpush.msrb.mxu2 %v3155_v34  ;;  %657 = vmatpush.msrb.mxu3 %v3256_v51 }
  0xe1   :  { %598 = vmatpush.msrb.mxu0 %v4914_v40  ;;  %618 = vmatpush.msrb.mxu1 %v4915_v56 }
  0xe2   :  { %638 = vmatpush.msrb.mxu2 %v4916_v52  ;;  %658 = vmatpush.msrb.mxu3 %v4917_v50 }
  0xe3   :  { %599 = vmatpush.msrb.mxu0 %v4918_v53  ;;  %619 = vmatpush.msrb.mxu1 %v4919_v54 }
  0xe4   :  { %639 = vmatpush.msrb.mxu2 %v4920_v58  ;;  %659 = vmatpush.msrb.mxu3 %v4921_v2 }
  0xe5   :  { %600 = vmatpush.msrb.mxu0 %v4922_v62  ;;  %620 = vmatpush.msrb.mxu1 %v4923_v45 }
  0xe6   :  { %640 = vmatpush.msrb.mxu2 %v4924_v44  ;;  %660 = vmatpush.msrb.mxu3 %v4925_v63  ;;  %v4935_v44 = vld [vmem:[#allocation25_spill] sm:$0xff]  ;;  %v4936_v63 = vld [vmem:[#allocation26_spill] sm:$0xff] }
  0xe7   :  { %601 = vmatpush.msrb.mxu0 %v4926_v42  ;;  %621 = vmatpush.msrb.mxu1 %v4927_v55  ;;  %v4937_v42 = vld [vmem:[#allocation31_spill] sm:$0xff] }
  0xe8   :  { %641 = vmatpush.msrb.mxu2 %v4928_v59  ;;  %661 = vmatpush.msrb.mxu3 %v4929_v41  ;;  %v2492_v41 = vld [vmem:[%s4760_s0 + $0x20] sm:$0xff] }
  0xe9   :  { %602 = vmatpush.msrb.mxu0 %v4930_v57  ;;  %622 = vmatpush.msrb.mxu1 %v4931_v49  ;;  %v2493_v49 = vld [vmem:[%s4760_s0 + $0x28] sm:$0xff] }
  0xea   :  { %642 = vmatpush.msrb.mxu2 %v4932_v37  ;;  %662 = vmatpush.msrb.mxu3 %v4933_v48 }
  0xeb   :  { %603 = vmatpush.msrb.mxu0 %v4934_v46  ;;  %623 = vmatpush.msrb.mxu1 %v4935_v44 }
  0xec   :  { %643 = vmatpush.msrb.mxu2 %v4936_v63  ;;  %663 = vmatpush.msrb.mxu3 %v4937_v42  ;;  %v2494_v63 = vld [vmem:[%s4760_s0 + $0x30] sm:$0xff] }
 0x148   :  { %v297_v57 = vpop.f32.mrf.mxu0  ;;  %v317_v37 = vpop.f32.mrf.mxu1 }
 0x149   :  { %v360_v59 = vadd.f32 %v2492_v41, %v297_v57  ;;  %v361_v48 = vadd.f32 %v2493_v49, %v317_v37 }
 0x14b   :  { %v2500_v55 = vmul.f32 -1.442695, %v360_v59  ;;  %v2501_v46 = vmul.f32 -1.442695, %v361_v48  ;;  %v2495_v59 = vld [vmem:[%s4760_s0 + $0x38] sm:$0xff] }
 0x14d   :  { %2656 = vpow2.f32 %v2500_v55 }
 0x14e   :  { %2658 = vpow2.f32 %v2501_v46 }
 0x14f   :  { %v337_v42 = vpop.f32.mrf.mxu2  ;;  %v357_v55 = vpop.f32.mrf.mxu3 }
 0x150   :  { %v362_v44 = vadd.f32 %v2494_v63, %v337_v42  ;;  %v363_v37 = vadd.f32 %v2495_v59, %v357_v55 }
 0x152   :  { %v2502_v45 = vmul.f32 -1.442695, %v362_v44 }
 0x153   :  { %v2657_v62 = vpop.eup %2656 }
 0x154   :  { %v2659_v2 = vpop.eup %2658  ;;  %v373_v58 = vadd.f32 1.0, %v2657_v62  ;;  %2660 = vpow2.f32 %v2502_v45 }
 0x155   :  { %v374_v54 = vadd.f32 1.0, %v2659_v2 }
 0x156   :  { %2662 = vrcp.f32 %v373_v58  ;;  %v387_v62 = vand.u32 2147483648, %v373_v58  ;;  %v385_v53 = vand.u32 2147483647, %v373_v58  ;;  %vm381_vm15 = vweird.f32 %v373_v58 }
 0x157   :  { %2664 = vrcp.f32 %v374_v54  ;;  %v402_v2 = vand.u32 2147483648, %v374_v54  ;;  %v400_v52 = vand.u32 2147483647, %v374_v54  ;;  %vm396_vm0 = vweird.f32 %v374_v54 }
 0x158   :  { %v388_v55 = vor.u32 1.1754944e-38, %v387_v62  ;;  %vm386_vm3 = vcmp.eq.f32.partialorder %v385_v53, 8.507059e+37 }
 0x159   :  { %vm401_vm4 = vcmp.eq.f32.partialorder %v400_v52, 8.507059e+37 }
 0x15a   :  { %v2661_v41 = vpop.eup %2660 }
 0x15b   :  { %v375_v57 = vadd.f32 1.0, %v2661_v41 }
 0x15c   :  { %v2663_v49 = vpop.eup %2662 }
 0x15d   :  { %v2665_v48 = vpop.eup %2664  ;;  %v377_v46 = vmul.f32 %v2663_v49, %v373_v58  ;;  %2666 = vrcp.f32 %v375_v57  ;;  %vm382_vm13 = vweird.f32 %v2663_v49  ;;  %vm411_vm7 = vweird.f32 %v375_v57 }
 0x15e   :  { %v392_v44 = vmul.f32 %v2665_v48, %v374_v54  ;;  %2668 = vtanh.f32 %v363_v37  ;;  %vm397_vm14 = vweird.f32 %v2665_v48  ;;  %vm383_vm1 = vmor %vm381_vm15, %vm382_vm13  ;;  %v415_v53 = vand.u32 2147483647, %v375_v57 }
 0x15f   :  { %v378_v63 = vsub.f32 1.0, %v377_v46  ;;  %vm398_vm2 = vmor %vm396_vm0, %vm397_vm14  ;;  %v403_v46 = vor.u32 1.1754944e-38, %v402_v2 }
 0x160   :  { %v393_v42 = vsub.f32 1.0, %v392_v44  ;;  %vm416_vm9 = vcmp.eq.f32.partialorder %v415_v53, 8.507059e+37 }
 0x161   :  { %v379_v45 = vmul.f32 %v2663_v49, %v378_v63 }
 0x162   :  { %v394_v50 = vmul.f32 %v2665_v48, %v393_v42 }
 0x163   :  { %v2667_v56 = vpop.eup %2666  ;;  %v380_v40 = vadd.f32 %v2663_v49, %v379_v45 }
 0x164   :  { %v407_v59 = vmul.f32 %v2667_v56, %v375_v57  ;;  %v395_v41 = vadd.f32 %v2665_v48, %v394_v50  ;;  %v2669_v37 = vpop.eup %2668  ;;  %vm412_vm6 = vweird.f32 %v2667_v56  ;;  %v417_v50 = vand.u32 2147483648, %v375_v57 }
 0x165   :  { %v384_v44 = vsel %vm383_vm1, %v2663_v49, %v380_v40  ;;  %vm413_vm8 = vmor %vm411_vm7, %vm412_vm6 }
 0x166   :  { %v408_v51 = vsub.f32 1.0, %v407_v59  ;;  %v389_v63 = vsel %vm386_vm3, %v388_v55, %v384_v44  ;;  %v399_v34 = vsel %vm398_vm2, %v2665_v48, %v395_v41  ;;  %v418_v52 = vor.u32 1.1754944e-38, %v417_v50  ;;  %v2506_v55 = vld [vmem:[%s4760_s0 + $0x58] sm:$0xff] }
 0x167   :  { %v404_v42 = vsel %vm401_vm4, %v403_v46, %v399_v34  ;;  %v423_v33 = vmul.f32 %v2669_v37, %v389_v63  ;;  %vm52_vm2 = vcmp.gt.s32.totalorder %v3480_v61, 2 }
 0x168   :  { %v409_v32 = vmul.f32 %v2667_v56, %v408_v51  ;;  %v422_v45 = vmul.f32 %v404_v42, %v3485_v38 }
 0x16a   :  { %v424_v54 = vadd.f32 %v423_v33, %v422_v45  ;;  %v410_v58 = vadd.f32 %v2667_v56, %v409_v32 }
 0x16c   :  { %2670 = vtanh.f32 %v424_v54  ;;  %v3580_v40 = vsel %vm51_vm5, %v424_v54, %v3485_v38  ;;  %v414_v34 = vsel %vm413_vm8, %v2667_v56, %v410_v58 }
 0x16d   :  { %v419_v49 = vsel %vm416_vm9, %v418_v52, %v414_v34 }
 0x172   :  { %v2671_v51 = vpop.eup %2670 }
 0x173   :  { %v426_v48 = vmul.f32 %v2671_v51, %v419_v49 }
 0x175   :  { %v3585_v32 = vsel %vm51_vm5, %v426_v48, %v3493_v36 }
 0x176   :  { %450 = vmatmul.f32.vlgmr.msra.gmra.mxu0 %v3585_v32  ;;  %470 = vmatmul.f32.vlgmr.msra.gmra.mxu1 %v3585_v32 }
 0x177   :  { %490 = vmatmul.f32.vlgmr.msra.gmra.mxu2 %v3585_v32  ;;  %510 = vmatmul.f32.vlgmr.msra.gmra.mxu3 %v3585_v32 }
 0x178   :  { %742 = vmatpush.msra.mxu0 %v2955_v0  ;;  %762 = vmatpush.msra.mxu1 %v2960_v1  ;;  %v4938_v0 = vld [vmem:[#allocation4_spill] sm:$0xff]  ;;  %v4939_v1 = vld [vmem:[#allocation5_spill] sm:$0xff] }
 0x179   :  { %782 = vmatpush.msra.mxu2 %v4913_v60  ;;  %802 = vmatpush.msra.mxu3 %v3052_v17  ;;  %v4954_v17 = vld [vmem:[#allocation16_spill] sm:$0xff] }
 0x17a   :  { %743 = vmatpush.msra.mxu0 %v2972_v3  ;;  %763 = vmatpush.msra.mxu1 %v2977_v4  ;;  %v4940_v3 = vld [vmem:[#allocation6_spill] sm:$0xff]  ;;  %v4941_v4 = vld [vmem:[#allocation19_spill] sm:$0xff] }
 0x17b   :  { %783 = vmatpush.msra.mxu2 %v2982_v5  ;;  %803 = vmatpush.msra.mxu3 %v3064_v19  ;;  %v4942_v5 = vld [vmem:[#allocation7_spill] sm:$0xff]  ;;  %v4956_v19 = vld [vmem:[#allocation18_spill] sm:$0xff] }
 0x17c   :  { %744 = vmatpush.msra.mxu0 %v2988_v6  ;;  %764 = vmatpush.msra.mxu1 %v2993_v7  ;;  %v4943_v6 = vld [vmem:[#allocation8_spill] sm:$0xff]  ;;  %v4944_v7 = vld [vmem:[#allocation9_spill] sm:$0xff] }
 0x17d   :  { %784 = vmatpush.msra.mxu2 %v3000_v8  ;;  %804 = vmatpush.msra.mxu3 %v3088_v23  ;;  %v4945_v8 = vld [vmem:[#allocation23_spill] sm:$0xff]  ;;  %v4960_v23 = vld [vmem:[#allocation22_spill] sm:$0xff] }
 0x17e   :  { %745 = vmatpush.msra.mxu0 %v3006_v9  ;;  %765 = vmatpush.msra.mxu1 %v3011_v10  ;;  %v4946_v9 = vld [vmem:[#allocation10_spill] sm:$0xff]  ;;  %v4947_v10 = vld [vmem:[#allocation11_spill] sm:$0xff] }
 0x17f   :  { %785 = vmatpush.msra.mxu2 %v3018_v11  ;;  %805 = vmatpush.msra.mxu3 %v3112_v27  ;;  %v4948_v11 = vld [vmem:[#allocation12_spill] sm:$0xff]  ;;  %v4964_v27 = vld [vmem:[#allocation26_spill] sm:$0xff] }
 0x180   :  { %746 = vmatpush.msra.mxu0 %v3024_v12  ;;  %766 = vmatpush.msra.mxu1 %v3029_v13  ;;  %v4949_v12 = vld [vmem:[#allocation27_spill] sm:$0xff]  ;;  %v4950_v13 = vld [vmem:[#allocation13_spill] sm:$0xff] }
 0x181   :  { %786 = vmatpush.msra.mxu2 %v3036_v14  ;;  %806 = vmatpush.msra.mxu3 %v3136_v31  ;;  %v4951_v14 = vld [vmem:[#allocation14_spill] sm:$0xff]  ;;  %v2505_v60 = vld [vmem:[%s4760_s0 + $0x50] sm:$0xff] }
 0x182   :  { %747 = vmatpush.msra.mxu0 %v3042_v15  ;;  %767 = vmatpush.msra.mxu1 %v3047_v16  ;;  %v4952_v15 = vld [vmem:[#allocation15_spill] sm:$0xff]  ;;  %v4953_v16 = vld [vmem:[#allocation28_spill] sm:$0xff] }
 0x183   :  { %787 = vmatpush.msra.mxu2 %v3059_v18  ;;  %807 = vmatpush.msra.mxu3 %v3160_v35  ;;  %v4955_v18 = vld [vmem:[#allocation17_spill] sm:$0xff] }
 0x184   :  { %748 = vmatpush.msra.mxu0 %v3070_v20  ;;  %768 = vmatpush.msra.mxu1 %v3075_v21  ;;  %v4957_v20 = vld [vmem:[#allocation29_spill] sm:$0xff]  ;;  %v4958_v21 = vld [vmem:[#allocation20_spill] sm:$0xff] }
 0x185   :  { %788 = vmatpush.msra.mxu2 %v3083_v22  ;;  %808 = vmatpush.msra.mxu3 %v3184_v39  ;;  %v4959_v22 = vld [vmem:[#allocation21_spill] sm:$0xff] }
 0x186   :  { %749 = vmatpush.msra.mxu0 %v3094_v24  ;;  %769 = vmatpush.msra.mxu1 %v3099_v25  ;;  %v4961_v24 = vld [vmem:[#allocation30_spill] sm:$0xff]  ;;  %v4962_v25 = vld [vmem:[#allocation24_spill] sm:$0xff] }
 0x187   :  { %789 = vmatpush.msra.mxu2 %v3107_v26  ;;  %809 = vmatpush.msra.mxu3 %v3208_v43  ;;  %v4963_v26 = vld [vmem:[#allocation25_spill] sm:$0xff] }
 0x188   :  { %750 = vmatpush.msra.mxu0 %v3118_v28  ;;  %770 = vmatpush.msra.mxu1 %v3123_v29  ;;  %v4965_v28 = vld [vmem:[#allocation31_spill] sm:$0xff]  ;;  %v2503_v29 = vld [vmem:[%s4760_s0 + $0x40] sm:$0xff] }
 0x189   :  { %790 = vmatpush.msra.mxu2 %v3131_v30  ;;  %810 = vmatpush.msra.mxu3 %v3232_v47  ;;  %v2504_v30 = vld [vmem:[%s4760_s0 + $0x48] sm:$0xff] }
 0x18a   :  { %751 = vmatpush.msra.mxu0 %v4938_v0  ;;  %771 = vmatpush.msra.mxu1 %v4939_v1 }
 0x18b   :  { %791 = vmatpush.msra.mxu2 %v4940_v3  ;;  %811 = vmatpush.msra.mxu3 %v4941_v4 }
 0x18c   :  { %752 = vmatpush.msra.mxu0 %v4942_v5  ;;  %772 = vmatpush.msra.mxu1 %v4943_v6 }
 0x18d   :  { %792 = vmatpush.msra.mxu2 %v4944_v7  ;;  %812 = vmatpush.msra.mxu3 %v4945_v8 }
 0x18e   :  { %753 = vmatpush.msra.mxu0 %v4946_v9  ;;  %773 = vmatpush.msra.mxu1 %v4947_v10 }
 0x18f   :  { %793 = vmatpush.msra.mxu2 %v4948_v11  ;;  %813 = vmatpush.msra.mxu3 %v4949_v12 }
 0x190   :  { %754 = vmatpush.msra.mxu0 %v4950_v13  ;;  %774 = vmatpush.msra.mxu1 %v4951_v14 }
 0x191   :  { %794 = vmatpush.msra.mxu2 %v4952_v15  ;;  %814 = vmatpush.msra.mxu3 %v4953_v16 }
 0x192   :  { %755 = vmatpush.msra.mxu0 %v4954_v17  ;;  %775 = vmatpush.msra.mxu1 %v4955_v18 }
 0x193   :  { %795 = vmatpush.msra.mxu2 %v4956_v19  ;;  %815 = vmatpush.msra.mxu3 %v4957_v20 }
 0x194   :  { %756 = vmatpush.msra.mxu0 %v4958_v21  ;;  %776 = vmatpush.msra.mxu1 %v4959_v22 }
 0x195   :  { %796 = vmatpush.msra.mxu2 %v4960_v23  ;;  %816 = vmatpush.msra.mxu3 %v4961_v24 }
 0x196   :  { %757 = vmatpush.msra.mxu0 %v4962_v25  ;;  %777 = vmatpush.msra.mxu1 %v4963_v26 }
 0x197   :  { %797 = vmatpush.msra.mxu2 %v4964_v27  ;;  %817 = vmatpush.msra.mxu3 %v4965_v28  ;;  %v3698_v27 = vld [vmem:[%s4759_s3 + $0x1f0] sm:$0xff]  ;;  %v3704_v28 = vld [vmem:[%s4759_s3 + $0x1f8] sm:$0xff] }
 0x1f3   :  { %v451_v31 = vpop.f32.mrf.mxu0  ;;  %v471_v33 = vpop.f32.mrf.mxu1 }
 0x1f4   :  { %v514_v35 = vadd.f32 %v2503_v29, %v451_v31  ;;  %v515_v39 = vadd.f32 %v2504_v30, %v471_v33  ;;  %v3710_v29 = vld [vmem:[%s4759_s3 + $0x1c0] sm:$0xff]  ;;  %v3716_v30 = vld [vmem:[%s4759_s3 + $0x1c8] sm:$0xff]  ;;  %v3722_v31 = vld [vmem:[%s4759_s3 + $0x1d0] sm:$0xff] }
 0x1f5   :  { %v3728_v33 = vld [vmem:[%s4759_s3 + $0x1d8] sm:$0xff] }
 0x1f6   :  { %v2507_v43 = vmul.f32 -1.442695, %v514_v35  ;;  %v2508_v47 = vmul.f32 -1.442695, %v515_v39  ;;  %v3734_v35 = vld [vmem:[%s4759_s3 + $0x1a0] sm:$0xff]  ;;  %v3740_v39 = vld [vmem:[%s4759_s3 + $0x1a8] sm:$0xff] }
 0x1f8   :  { %2672 = vpow2.f32 %v2507_v43  ;;  %v3746_v43 = vld [vmem:[%s4759_s3 + $0x1b0] sm:$0xff] }
 0x1f9   :  { %2674 = vpow2.f32 %v2508_v47  ;;  %v3752_v47 = vld [vmem:[%s4759_s3 + $0x1b8] sm:$0xff] }
 0x1fa   :  { %v491_v38 = vpop.f32.mrf.mxu2  ;;  %v511_v41 = vpop.f32.mrf.mxu3 }
 0x1fb   :  { %v516_v36 = vadd.f32 %v2505_v60, %v491_v38  ;;  %v517_v63 = vadd.f32 %v2506_v55, %v511_v41  ;;  %v3758_v60 = vld [vmem:[%s4759_s3 + $0x180] sm:$0xff]  ;;  %v3764_v38 = vld [vmem:[%s4759_s3 + $0x188] sm:$0xff] }
 0x1fc   :  { %v3806_v55 = vld [vmem:[%s4759_s3 + $0x140] sm:$0xff]  ;;  %v3812_v41 = vld [vmem:[%s4759_s3 + $0x148] sm:$0xff] }
 0x1fd   :  { %v2509_v56 = vmul.f32 -1.442695, %v516_v36  ;;  %v3770_v36 = vld [vmem:[%s4759_s3 + $0x190] sm:$0xff] }
 0x1fe   :  { %v2673_v57 = vpop.eup %2672 }
 0x1ff   :  { %v2675_v62 = vpop.eup %2674  ;;  %v527_v2 = vadd.f32 1.0, %v2673_v57  ;;  %2676 = vpow2.f32 %v2509_v56  ;;  %v3776_v56 = vld [vmem:[%s4759_s3 + $0x198] sm:$0xff]  ;;  %v3782_v57 = vld [vmem:[%s4759_s3 + $0x160] sm:$0xff] }
 0x200   :  { %v528_v59 = vadd.f32 1.0, %v2675_v62  ;;  %v3788_v62 = vld [vmem:[%s4759_s3 + $0x168] sm:$0xff] }
 0x201   :  { %2678 = vrcp.f32 %v527_v2  ;;  %v541_v53 = vand.u32 2147483648, %v527_v2  ;;  %v539_v51 = vand.u32 2147483647, %v527_v2  ;;  %vm535_vm12 = vweird.f32 %v527_v2 }
 0x202   :  { %2680 = vrcp.f32 %v528_v59  ;;  %v556_v34 = vand.u32 2147483648, %v528_v59  ;;  %v554_v48 = vand.u32 2147483647, %v528_v59  ;;  %vm550_vm13 = vweird.f32 %v528_v59 }
 0x203   :  { %v542_v4 = vor.u32 1.1754944e-38, %v541_v53  ;;  %vm540_vm0 = vcmp.eq.f32.partialorder %v539_v51, 8.507059e+37  ;;  %v3872_v53 = vld [vmem:[%s4759_s3 + $0x118] sm:$0xff]  ;;  %v3890_v51 = vld [vmem:[%s4759_s3 + $0xf0] sm:$0xff] }
 0x204   :  { %v557_v6 = vor.u32 1.1754944e-38, %v556_v34  ;;  %vm555_vm1 = vcmp.eq.f32.partialorder %v554_v48, 8.507059e+37  ;;  %v3878_v34 = vld [vmem:[%s4759_s3 + $0xe0] sm:$0xff] }
 0x205   :  { %v2677_v46 = vpop.eup %2676  ;;  %v3902_v48 = vld [vmem:[%s4759_s3 + $0xc0] sm:$0xff] }
 0x206   :  { %v529_v44 = vadd.f32 1.0, %v2677_v46  ;;  %v3818_v46 = vld [vmem:[%s4759_s3 + $0x150] sm:$0xff]  ;;  %4966 = vst [vmem:[#allocation3_spill] sm:$0xff] %v3902_v48 }
 0x207   :  { %v2679_v37 = vpop.eup %2678 }
 0x208   :  { %v2681_v42 = vpop.eup %2680  ;;  %v531_v45 = vmul.f32 %v2679_v37, %v527_v2  ;;  %2682 = vrcp.f32 %v529_v44  ;;  %vm536_vm10 = vweird.f32 %v2679_v37  ;;  %v571_v18 = vand.u32 2147483648, %v529_v44  ;;  %v3794_v2 = vld [vmem:[%s4759_s3 + $0x170] sm:$0xff] }
 0x209   :  { %v546_v54 = vmul.f32 %v2681_v42, %v528_v59  ;;  %2684 = vtanh.f32 %v517_v63  ;;  %vm551_vm11 = vweird.f32 %v2681_v42  ;;  %vm537_vm14 = vmor %vm535_vm12, %vm536_vm10  ;;  %vm565_vm4 = vweird.f32 %v529_v44  ;;  %v3800_v59 = vld [vmem:[%s4759_s3 + $0x178] sm:$0xff]  ;;  %v3836_v63 = vld [vmem:[%s4759_s3 + $0x128] sm:$0xff] }
 0x20a   :  { %v532_v58 = vsub.f32 1.0, %v531_v45  ;;  %vm552_vm15 = vmor %vm550_vm13, %vm551_vm11  ;;  %v569_v20 = vand.u32 2147483647, %v529_v44  ;;  %v572_v22 = vor.u32 1.1754944e-38, %v571_v18  ;;  %v3848_v45 = vld [vmem:[%s4759_s3 + $0x138] sm:$0xff]  ;;  %v4010_v18 = vld [vmem:[%s4759_s3 + $0x50] sm:$0xff] }
 0x20b   :  { %v547_v50 = vsub.f32 1.0, %v546_v54  ;;  %v3854_v54 = vld [vmem:[%s4759_s3 + $0x100] sm:$0xff]  ;;  %4984 = vst [vmem:[#allocation17_spill] sm:$0xff] %v4010_v18 }
 0x20c   :  { %v533_v52 = vmul.f32 %v2679_v37, %v532_v58  ;;  %vm570_vm6 = vcmp.eq.f32.partialorder %v569_v20, 8.507059e+37  ;;  %v3860_v58 = vld [vmem:[%s4759_s3 + $0x108] sm:$0xff]  ;;  %v4016_v20 = vld [vmem:[%s4759_s3 + $0x58] sm:$0xff] }
 0x20d   :  { %v548_v49 = vmul.f32 %v2681_v42, %v547_v50  ;;  %v3866_v50 = vld [vmem:[%s4759_s3 + $0x110] sm:$0xff]  ;;  %4985 = vst [vmem:[#allocation18_spill] sm:$0xff] %v4016_v20 }
 0x20e   :  { %v2683_v0 = vpop.eup %2682  ;;  %v534_v1 = vadd.f32 %v2679_v37, %v533_v52  ;;  %v3884_v52 = vld [vmem:[%s4759_s3 + $0xe8] sm:$0xff] }
 0x20f   :  { %v561_v3 = vmul.f32 %v2683_v0, %v529_v44  ;;  %v549_v5 = vadd.f32 %v2681_v42, %v548_v49  ;;  %v2685_v8 = vpop.eup %2684  ;;  %vm566_vm3 = vweird.f32 %v2683_v0  ;;  %v3824_v44 = vld [vmem:[%s4759_s3 + $0x158] sm:$0xff] }
 0x210   :  { %v538_v7 = vsel %vm537_vm14, %v2679_v37, %v534_v1  ;;  %vm567_vm5 = vmor %vm565_vm4, %vm566_vm3  ;;  %v3830_v37 = vld [vmem:[%s4759_s3 + $0x120] sm:$0xff]  ;;  %v3896_v49 = vld [vmem:[%s4759_s3 + $0xf8] sm:$0xff] }
 0x211   :  { %v562_v9 = vsub.f32 1.0, %v561_v3  ;;  %v543_v10 = vsel %vm540_vm0, %v542_v4, %v538_v7  ;;  %v553_v11 = vsel %vm552_vm15, %v2681_v42, %v549_v5  ;;  %v3842_v42 = vld [vmem:[%s4759_s3 + $0x130] sm:$0xff]  ;;  %v3920_v3 = vld [vmem:[%s4759_s3 + $0xd8] sm:$0xff]  ;;  %v3926_v4 = vld [vmem:[%s4759_s3 + $0xa0] sm:$0xff]  ;;  %vm53_vm15 = vcmp.gt.s32.totalorder %v3480_v61, 3 }
 0x212   :  { %v558_v12 = vsel %vm555_vm1, %v557_v6, %v553_v11  ;;  %v577_v13 = vmul.f32 %v2685_v8, %v543_v10  ;;  %v3914_v1 = vld [vmem:[%s4759_s3 + $0xd0] sm:$0xff]  ;;  %4969 = vst [vmem:[#allocation6_spill] sm:$0xff] %v3920_v3  ;;  %v3932_v5 = vld [vmem:[%s4759_s3 + $0xa8] sm:$0xff]  ;;  %v3944_v7 = vld [vmem:[%s4759_s3 + $0xb8] sm:$0xff] }
 0x213   :  { %v563_v14 = vmul.f32 %v2683_v0, %v562_v9  ;;  %v576_v15 = vmul.f32 %v558_v12, %v3580_v40  ;;  %4968 = vst [vmem:[#allocation5_spill] sm:$0xff] %v3914_v1  ;;  %v3938_v6 = vld [vmem:[%s4759_s3 + $0xb0] sm:$0xff]  ;;  %v3950_v8 = vld [vmem:[%s4759_s3 + $0x80] sm:$0xff]  ;;  %v3956_v9 = vld [vmem:[%s4759_s3 + $0x88] sm:$0xff] }
 0x214   :  { %4970 = vst [vmem:[#allocation19_spill] sm:$0xff] %v3926_v4  ;;  %v3962_v10 = vld [vmem:[%s4759_s3 + $0x90] sm:$0xff]  ;;  %v3968_v11 = vld [vmem:[%s4759_s3 + $0x98] sm:$0xff]  ;;  %v3974_v12 = vld [vmem:[%s4759_s3 + $0x60] sm:$0xff] }
 0x215   :  { %v578_v16 = vadd.f32 %v577_v13, %v576_v15  ;;  %v564_v17 = vadd.f32 %v2683_v0, %v563_v14  ;;  %4971 = vst [vmem:[#allocation7_spill] sm:$0xff] %v3932_v5  ;;  %v3980_v13 = vld [vmem:[%s4759_s3 + $0x68] sm:$0xff]  ;;  %v3986_v14 = vld [vmem:[%s4759_s3 + $0x70] sm:$0xff]  ;;  %v3992_v15 = vld [vmem:[%s4759_s3 + $0x78] sm:$0xff] }
 0x216   :  { %4972 = vst [vmem:[#allocation8_spill] sm:$0xff] %v3938_v6  ;;  %v4994_v61 = vld [vmem:[#allocation3_spill] sm:$0xff] }
 0x217   :  { %2686 = vtanh.f32 %v578_v16  ;;  %v3672_v19 = vsel %vm52_vm2, %v578_v16, %v3580_v40  ;;  %v568_v21 = vsel %vm567_vm5, %v2683_v0, %v564_v17  ;;  %v3686_v40 = vld [vmem:[%s4759_s3 + $0x1e0] sm:$0xff]  ;;  %v3908_v0 = vld [vmem:[%s4759_s3 + $0xc8] sm:$0xff]  ;;  %4973 = vst [vmem:[#allocation9_spill] sm:$0xff] %v3944_v7 }
 0x218   :  { %v573_v24 = vsel %vm570_vm6, %v572_v22, %v568_v21  ;;  %4967 = vst [vmem:[#allocation4_spill] sm:$0xff] %v3908_v0  ;;  %v3998_v16 = vld [vmem:[%s4759_s3 + $0x40] sm:$0xff]  ;;  %v4004_v17 = vld [vmem:[%s4759_s3 + $0x48] sm:$0xff] }
 0x219   :  { %4974 = vst [vmem:[#allocation23_spill] sm:$0xff] %v3950_v8  ;;  %v4022_v21 = vld [vmem:[%s4759_s3 + $0x20] sm:$0xff]  ;;  %v4028_v22 = vld [vmem:[%s4759_s3 + $0x28] sm:$0xff] }
 0x21a   :  { %4975 = vst [vmem:[#allocation10_spill] sm:$0xff] %v3956_v9 }
 0x21b   :  { %4976 = vst [vmem:[#allocation11_spill] sm:$0xff] %v3962_v10 }
 0x21c   :  { %4977 = vst [vmem:[#allocation12_spill] sm:$0xff] %v3968_v11 }
 0x21d   :  { %v2687_v23 = vpop.eup %2686  ;;  %4978 = vst [vmem:[#allocation27_spill] sm:$0xff] %v3974_v12 }
 0x21e   :  { %v580_v25 = vmul.f32 %v2687_v23, %v573_v24  ;;  %4979 = vst [vmem:[#allocation13_spill] sm:$0xff] %v3980_v13  ;;  %v4034_v23 = vld [vmem:[%s4759_s3 + $0x30] sm:$0xff]  ;;  %v4040_v24 = vld [vmem:[%s4759_s3 + $0x38] sm:$0xff] }
 0x21f   :  { %4980 = vst [vmem:[#allocation14_spill] sm:$0xff] %v3986_v14 }
 0x220   :  { %v3677_v26 = vsel %vm52_vm2, %v580_v25, %v3585_v32  ;;  %v3692_v32 = vld [vmem:[%s4759_s3 + $0x1e8] sm:$0xff]  ;;  %4981 = vst [vmem:[#allocation15_spill] sm:$0xff] %v3992_v15  ;;  %v4046_v25 = vld [vmem:[%s4759_s3] sm:$0xff] }
 0x221   :  { %604 = vmatmul.f32.vlgmr.msrb.gmra.mxu0 %v3677_v26  ;;  %624 = vmatmul.f32.vlgmr.msrb.gmra.mxu1 %v3677_v26  ;;  %4982 = vst [vmem:[#allocation28_spill] sm:$0xff] %v3998_v16 }
 0x222   :  { %644 = vmatmul.f32.vlgmr.msrb.gmra.mxu2 %v3677_v26  ;;  %664 = vmatmul.f32.vlgmr.msrb.gmra.mxu3 %v3677_v26  ;;  %4983 = vst [vmem:[#allocation16_spill] sm:$0xff] %v4004_v17 }
 0x223   :  { %896 = vmatpush.msrb.mxu0 %v3686_v40  ;;  %916 = vmatpush.msrb.mxu1 %v3692_v32  ;;  %4986 = vst [vmem:[#allocation29_spill] sm:$0xff] %v4022_v21 }
 0x224   :  { %936 = vmatpush.msrb.mxu2 %v3698_v27  ;;  %956 = vmatpush.msrb.mxu3 %v3704_v28  ;;  %4987 = vst [vmem:[#allocation20_spill] sm:$0xff] %v4028_v22 }
 0x225   :  { %897 = vmatpush.msrb.mxu0 %v3710_v29  ;;  %917 = vmatpush.msrb.mxu1 %v3716_v30  ;;  %4988 = vst [vmem:[#allocation21_spill] sm:$0xff] %v4034_v23 }
 0x226   :  { %937 = vmatpush.msrb.mxu2 %v3722_v31  ;;  %957 = vmatpush.msrb.mxu3 %v3728_v33  ;;  %4989 = vst [vmem:[#allocation22_spill] sm:$0xff] %v4040_v24 }
 0x227   :  { %898 = vmatpush.msrb.mxu0 %v3734_v35  ;;  %918 = vmatpush.msrb.mxu1 %v3740_v39  ;;  %4990 = vst [vmem:[#allocation30_spill] sm:$0xff] %v4046_v25 }
 0x228   :  { %938 = vmatpush.msrb.mxu2 %v3746_v43  ;;  %958 = vmatpush.msrb.mxu3 %v3752_v47 }
 0x229   :  { %899 = vmatpush.msrb.mxu0 %v3758_v60  ;;  %919 = vmatpush.msrb.mxu1 %v3764_v38 }
 0x22a   :  { %939 = vmatpush.msrb.mxu2 %v3770_v36  ;;  %959 = vmatpush.msrb.mxu3 %v3776_v56 }
 0x22b   :  { %900 = vmatpush.msrb.mxu0 %v3782_v57  ;;  %920 = vmatpush.msrb.mxu1 %v3788_v62 }
 0x22c   :  { %940 = vmatpush.msrb.mxu2 %v3794_v2  ;;  %960 = vmatpush.msrb.mxu3 %v3800_v59 }
 0x22d   :  { %901 = vmatpush.msrb.mxu0 %v3806_v55  ;;  %921 = vmatpush.msrb.mxu1 %v3812_v41 }
 0x22e   :  { %941 = vmatpush.msrb.mxu2 %v3818_v46  ;;  %961 = vmatpush.msrb.mxu3 %v3824_v44 }
 0x22f   :  { %902 = vmatpush.msrb.mxu0 %v3830_v37  ;;  %922 = vmatpush.msrb.mxu1 %v3836_v63 }
 0x230   :  { %942 = vmatpush.msrb.mxu2 %v3842_v42  ;;  %962 = vmatpush.msrb.mxu3 %v3848_v45 }
 0x231   :  { %903 = vmatpush.msrb.mxu0 %v3854_v54  ;;  %923 = vmatpush.msrb.mxu1 %v3860_v58 }
 0x232   :  { %943 = vmatpush.msrb.mxu2 %v3866_v50  ;;  %963 = vmatpush.msrb.mxu3 %v3872_v53 }
 0x233   :  { %904 = vmatpush.msrb.mxu0 %v3878_v34  ;;  %924 = vmatpush.msrb.mxu1 %v3884_v52 }
 0x234   :  { %944 = vmatpush.msrb.mxu2 %v3890_v51  ;;  %964 = vmatpush.msrb.mxu3 %v3896_v49 }
 0x235   :  { %905 = vmatpush.msrb.mxu0 %v3902_v48  ;;  %925 = vmatpush.msrb.mxu1 %v3908_v0 }
 0x236   :  { %945 = vmatpush.msrb.mxu2 %v3914_v1  ;;  %965 = vmatpush.msrb.mxu3 %v3920_v3 }
 0x237   :  { %906 = vmatpush.msrb.mxu0 %v3926_v4  ;;  %926 = vmatpush.msrb.mxu1 %v3932_v5 }
 0x238   :  { %946 = vmatpush.msrb.mxu2 %v3938_v6  ;;  %966 = vmatpush.msrb.mxu3 %v3944_v7 }
 0x239   :  { %907 = vmatpush.msrb.mxu0 %v3950_v8  ;;  %927 = vmatpush.msrb.mxu1 %v3956_v9 }
 0x23a   :  { %947 = vmatpush.msrb.mxu2 %v3962_v10  ;;  %967 = vmatpush.msrb.mxu3 %v3968_v11 }
 0x23b   :  { %908 = vmatpush.msrb.mxu0 %v3974_v12  ;;  %928 = vmatpush.msrb.mxu1 %v3980_v13 }
 0x23c   :  { %948 = vmatpush.msrb.mxu2 %v3986_v14  ;;  %968 = vmatpush.msrb.mxu3 %v3992_v15  ;;  %v2512_v15 = vld [vmem:[%s4760_s0 + $0x70] sm:$0xff] }
 0x23d   :  { %909 = vmatpush.msrb.mxu0 %v3998_v16  ;;  %929 = vmatpush.msrb.mxu1 %v4004_v17 }
 0x23e   :  { %949 = vmatpush.msrb.mxu2 %v4010_v18  ;;  %969 = vmatpush.msrb.mxu3 %v4016_v20 }
 0x23f   :  { %910 = vmatpush.msrb.mxu0 %v4022_v21  ;;  %930 = vmatpush.msrb.mxu1 %v4028_v22  ;;  %v4052_v22 = vld [vmem:[%s4759_s3 + $0x8] sm:$0xff] }
 0x240   :  { %950 = vmatpush.msrb.mxu2 %v4034_v23  ;;  %970 = vmatpush.msrb.mxu3 %v4040_v24  ;;  %4991 = vst [vmem:[#allocation24_spill] sm:$0xff] %v4052_v22  ;;  %v4058_v23 = vld [vmem:[%s4759_s3 + $0x10] sm:$0xff]  ;;  %v4064_v24 = vld [vmem:[%s4759_s3 + $0x18] sm:$0xff]  ;;  %s2875_s3 = smov 64  }
 0x241   :  { %911 = vmatpush.msrb.mxu0 %v4046_v25  ;;  %931 = vmatpush.msrb.mxu1 %v4052_v22  ;;  %4992 = vst [vmem:[#allocation25_spill] sm:$0xff] %v4058_v23  ;;  %v2510_v25 = vld [vmem:[%s4760_s0 + $0x60] sm:$0xff]  ;;  %v2511_v22 = vld [vmem:[%s4760_s0 + $0x68] sm:$0xff] }
 0x242   :  { %951 = vmatpush.msrb.mxu2 %v4058_v23  ;;  %4993 = vst [vmem:[#allocation26_spill] sm:$0xff] %v4064_v24  ;;  %971 = vmatpush.msrb.mxu3 %v4064_v24 }
 0x29e   :  { %v605_v21 = vpop.f32.mrf.mxu0  ;;  %v625_v20 = vpop.f32.mrf.mxu1 }
 0x29f   :  { %v668_v18 = vadd.f32 %v2510_v25, %v605_v21  ;;  %v669_v17 = vadd.f32 %v2511_v22, %v625_v20 }
 0x2a1   :  { %v2514_v23 = vmul.f32 -1.442695, %v668_v18  ;;  %v2515_v16 = vmul.f32 -1.442695, %v669_v17  ;;  %v2513_v17 = vld [vmem:[%s4760_s0 + $0x78] sm:$0xff] }
 0x2a3   :  { %2688 = vpow2.f32 %v2514_v23 }
 0x2a4   :  { %2690 = vpow2.f32 %v2515_v16 }
 0x2a5   :  { %v645_v24 = vpop.f32.mrf.mxu2  ;;  %v665_v18 = vpop.f32.mrf.mxu3 }
 0x2a6   :  { %v670_v14 = vadd.f32 %v2512_v15, %v645_v24  ;;  %v671_v23 = vadd.f32 %v2513_v17, %v665_v18 }
 0x2a8   :  { %v2516_v13 = vmul.f32 -1.442695, %v670_v14 }
 0x2a9   :  { %v2689_v12 = vpop.eup %2688 }
 0x2aa   :  { %v2691_v11 = vpop.eup %2690  ;;  %v681_v10 = vadd.f32 1.0, %v2689_v12  ;;  %2692 = vpow2.f32 %v2516_v13 }
 0x2ab   :  { %v682_v9 = vadd.f32 1.0, %v2691_v11 }
 0x2ac   :  { %2694 = vrcp.f32 %v681_v10  ;;  %v695_v12 = vand.u32 2147483648, %v681_v10  ;;  %v693_v8 = vand.u32 2147483647, %v681_v10  ;;  %vm689_vm9 = vweird.f32 %v681_v10 }
 0x2ad   :  { %2696 = vrcp.f32 %v682_v9  ;;  %v710_v11 = vand.u32 2147483648, %v682_v9  ;;  %v708_v6 = vand.u32 2147483647, %v682_v9  ;;  %vm704_vm10 = vweird.f32 %v682_v9 }
 0x2ae   :  { %v696_v18 = vor.u32 1.1754944e-38, %v695_v12  ;;  %vm694_vm13 = vcmp.eq.f32.partialorder %v693_v8, 8.507059e+37  ;;  %v5000_v12 = vld [vmem:[#allocation8_spill] sm:$0xff] }
 0x2af   :  { %vm709_vm14 = vcmp.eq.f32.partialorder %v708_v6, 8.507059e+37 }
 0x2b0   :  { %v2693_v20 = vpop.eup %2692 }
 0x2b1   :  { %v683_v21 = vadd.f32 1.0, %v2693_v20 }
 0x2b2   :  { %v2695_v22 = vpop.eup %2694 }
 0x2b3   :  { %v2697_v16 = vpop.eup %2696  ;;  %v685_v25 = vmul.f32 %v2695_v22, %v681_v10  ;;  %2698 = vrcp.f32 %v683_v21  ;;  %vm690_vm7 = vweird.f32 %v2695_v22  ;;  %vm719_vm1 = vweird.f32 %v683_v21 }
 0x2b4   :  { %v700_v14 = vmul.f32 %v2697_v16, %v682_v9  ;;  %2700 = vtanh.f32 %v671_v23  ;;  %vm705_vm8 = vweird.f32 %v2697_v16  ;;  %vm691_vm11 = vmor %vm689_vm9, %vm690_vm7  ;;  %v723_v8 = vand.u32 2147483647, %v683_v21 }
 0x2b5   :  { %v686_v15 = vsub.f32 1.0, %v685_v25  ;;  %vm706_vm12 = vmor %vm704_vm10, %vm705_vm8  ;;  %v711_v25 = vor.u32 1.1754944e-38, %v710_v11  ;;  %v5001_v11 = vld [vmem:[#allocation9_spill] sm:$0xff] }
 0x2b6   :  { %v701_v24 = vsub.f32 1.0, %v700_v14  ;;  %vm724_vm3 = vcmp.eq.f32.partialorder %v723_v8, 8.507059e+37  ;;  %v5014_v8 = vld [vmem:[#allocation29_spill] sm:$0xff] }
 0x2b7   :  { %v687_v13 = vmul.f32 %v2695_v22, %v686_v15 }
 0x2b8   :  { %v702_v7 = vmul.f32 %v2697_v16, %v701_v24 }
 0x2b9   :  { %v2699_v5 = vpop.eup %2698  ;;  %v688_v4 = vadd.f32 %v2695_v22, %v687_v13 }
 0x2ba   :  { %v715_v17 = vmul.f32 %v2699_v5, %v683_v21  ;;  %v703_v20 = vadd.f32 %v2697_v16, %v702_v7  ;;  %v2701_v23 = vpop.eup %2700  ;;  %vm720_vm0 = vweird.f32 %v2699_v5  ;;  %v725_v7 = vand.u32 2147483648, %v683_v21  ;;  %v4999_v21 = vld [vmem:[#allocation7_spill] sm:$0xff] }
 0x2bb   :  { %v692_v14 = vsel %vm691_vm11, %v2695_v22, %v688_v4  ;;  %vm721_vm2 = vmor %vm719_vm1, %vm720_vm0 }
 0x2bc   :  { %v716_v3 = vsub.f32 1.0, %v715_v17  ;;  %v697_v15 = vsel %vm694_vm13, %v696_v18, %v692_v14  ;;  %v707_v1 = vsel %vm706_vm12, %v2697_v16, %v703_v20  ;;  %v726_v6 = vor.u32 1.1754944e-38, %v725_v7  ;;  %v5002_v17 = vld [vmem:[#allocation23_spill] sm:$0xff]  ;;  %v5003_v18 = vld [vmem:[#allocation10_spill] sm:$0xff] }
 0x2bd   :  { %v712_v24 = vsel %vm709_vm14, %v711_v25, %v707_v1  ;;  %v731_v0 = vmul.f32 %v2701_v23, %v697_v15  ;;  %v5004_v20 = vld [vmem:[#allocation11_spill] sm:$0xff]  ;;  %v5005_v25 = vld [vmem:[#allocation12_spill] sm:$0xff]  ;;  %v5007_v23 = vld [vmem:[#allocation13_spill] sm:$0xff] }
 0x2be   :  { %v717_v48 = vmul.f32 %v2699_v5, %v716_v3  ;;  %v730_v13 = vmul.f32 %v712_v24, %v3672_v19  ;;  %v5006_v14 = vld [vmem:[#allocation27_spill] sm:$0xff]  ;;  %v5008_v15 = vld [vmem:[#allocation14_spill] sm:$0xff] }
 0x2bf   :  { %v5009_v24 = vld [vmem:[#allocation15_spill] sm:$0xff]  ;;  %v5013_v7 = vld [vmem:[#allocation18_spill] sm:$0xff] }
 0x2c0   :  { %v732_v9 = vadd.f32 %v731_v0, %v730_v13  ;;  %v718_v10 = vadd.f32 %v2699_v5, %v717_v48  ;;  %v4997_v0 = vld [vmem:[#allocation6_spill] sm:$0xff]  ;;  %v5010_v13 = vld [vmem:[#allocation28_spill] sm:$0xff] }
 0x2c2   :  { %2702 = vtanh.f32 %v732_v9  ;;  %v4084_v4 = vsel %vm53_vm15, %v732_v9, %v3672_v19  ;;  %v722_v1 = vsel %vm721_vm2, %v2699_v5, %v718_v10  ;;  %v4995_v19 = vld [vmem:[#allocation4_spill] sm:$0xff]  ;;  %v4998_v5 = vld [vmem:[#allocation19_spill] sm:$0xff]  ;;  %v5012_v10 = vld [vmem:[#allocation17_spill] sm:$0xff] }
 0x2c3   :  { %v727_v22 = vsel %vm724_vm3, %v726_v6, %v722_v1  ;;  %v5011_v9 = vld [vmem:[#allocation16_spill] sm:$0xff]  ;;  %v5016_v6 = vld [vmem:[#allocation21_spill] sm:$0xff] }
 0x2c4   :  { %v5015_v1 = vld [vmem:[#allocation20_spill] sm:$0xff] }
 0x2c8   :  { %v2703_v3 = vpop.eup %2702 }
 0x2c9   :  { %v734_v16 = vmul.f32 %v2703_v3, %v727_v22  ;;  %v5017_v3 = vld [vmem:[#allocation22_spill] sm:$0xff] }
 0x2ca   :  { %v5018_v22 = vld [vmem:[#allocation30_spill] sm:$0xff] }
 0x2cb   :  { %v4089_v48 = vsel %vm53_vm15, %v734_v16, %v3677_v26  ;;  %v4996_v26 = vld [vmem:[#allocation5_spill] sm:$0xff]  ;;  %v5019_v16 = vld [vmem:[#allocation24_spill] sm:$0xff] }
 0x2cc   :  { %758 = vmatmul.f32.vlgmr.msra.gmra.mxu0 %v4089_v48  ;;  %778 = vmatmul.f32.vlgmr.msra.gmra.mxu1 %v4089_v48 }
 0x2cd   :  { %798 = vmatmul.f32.vlgmr.msra.gmra.mxu2 %v4089_v48  ;;  %818 = vmatmul.f32.vlgmr.msra.gmra.mxu3 %v4089_v48 }
 0x2ce   :  { %1050 = vmatpush.msra.mxu0 %v3686_v40  ;;  %1070 = vmatpush.msra.mxu1 %v3692_v32 }
 0x2cf   :  { %1090 = vmatpush.msra.mxu2 %v3698_v27  ;;  %1110 = vmatpush.msra.mxu3 %v3704_v28 }
 0x2d0   :  { %1051 = vmatpush.msra.mxu0 %v3710_v29  ;;  %1071 = vmatpush.msra.mxu1 %v3716_v30 }
 0x2d1   :  { %1091 = vmatpush.msra.mxu2 %v3722_v31  ;;  %1111 = vmatpush.msra.mxu3 %v3728_v33 }
 0x2d2   :  { %1052 = vmatpush.msra.mxu0 %v3734_v35  ;;  %1072 = vmatpush.msra.mxu1 %v3740_v39 }
 0x2d3   :  { %1092 = vmatpush.msra.mxu2 %v3746_v43  ;;  %1112 = vmatpush.msra.mxu3 %v3752_v47 }
 0x2d4   :  { %1053 = vmatpush.msra.mxu0 %v3758_v60  ;;  %1073 = vmatpush.msra.mxu1 %v3764_v38 }
 0x2d5   :  { %1093 = vmatpush.msra.mxu2 %v3770_v36  ;;  %1113 = vmatpush.msra.mxu3 %v3776_v56 }
 0x2d6   :  { %1054 = vmatpush.msra.mxu0 %v3782_v57  ;;  %1074 = vmatpush.msra.mxu1 %v3788_v62 }
 0x2d7   :  { %1094 = vmatpush.msra.mxu2 %v3794_v2  ;;  %1114 = vmatpush.msra.mxu3 %v3800_v59 }
 0x2d8   :  { %1055 = vmatpush.msra.mxu0 %v3806_v55  ;;  %1075 = vmatpush.msra.mxu1 %v3812_v41 }
 0x2d9   :  { %1095 = vmatpush.msra.mxu2 %v3818_v46  ;;  %1115 = vmatpush.msra.mxu3 %v3824_v44 }
 0x2da   :  { %1056 = vmatpush.msra.mxu0 %v3830_v37  ;;  %1076 = vmatpush.msra.mxu1 %v3836_v63 }
 0x2db   :  { %1096 = vmatpush.msra.mxu2 %v3842_v42  ;;  %1116 = vmatpush.msra.mxu3 %v3848_v45 }
 0x2dc   :  { %1057 = vmatpush.msra.mxu0 %v3854_v54  ;;  %1077 = vmatpush.msra.mxu1 %v3860_v58 }
 0x2dd   :  { %1097 = vmatpush.msra.mxu2 %v3866_v50  ;;  %1117 = vmatpush.msra.mxu3 %v3872_v53 }
 0x2de   :  { %1058 = vmatpush.msra.mxu0 %v3878_v34  ;;  %1078 = vmatpush.msra.mxu1 %v3884_v52 }
 0x2df   :  { %1098 = vmatpush.msra.mxu2 %v3890_v51  ;;  %1118 = vmatpush.msra.mxu3 %v3896_v49 }
 0x2e0   :  { %1059 = vmatpush.msra.mxu0 %v4994_v61  ;;  %1079 = vmatpush.msra.mxu1 %v4995_v19 }
 0x2e1   :  { %1099 = vmatpush.msra.mxu2 %v4996_v26  ;;  %1119 = vmatpush.msra.mxu3 %v4997_v0 }
 0x2e2   :  { %1060 = vmatpush.msra.mxu0 %v4998_v5  ;;  %1080 = vmatpush.msra.mxu1 %v4999_v21 }
 0x2e3   :  { %1100 = vmatpush.msra.mxu2 %v5000_v12  ;;  %1120 = vmatpush.msra.mxu3 %v5001_v11 }
 0x2e4   :  { %1061 = vmatpush.msra.mxu0 %v5002_v17  ;;  %1081 = vmatpush.msra.mxu1 %v5003_v18 }
 0x2e5   :  { %1101 = vmatpush.msra.mxu2 %v5004_v20  ;;  %1121 = vmatpush.msra.mxu3 %v5005_v25 }
 0x2e6   :  { %1062 = vmatpush.msra.mxu0 %v5006_v14  ;;  %1082 = vmatpush.msra.mxu1 %v5007_v23 }
 0x2e7   :  { %1102 = vmatpush.msra.mxu2 %v5008_v15  ;;  %1122 = vmatpush.msra.mxu3 %v5009_v24  ;;  %v5020_v24 = vld [vmem:[#allocation25_spill] sm:$0xff] }
 0x2e8   :  { %1063 = vmatpush.msra.mxu0 %v5010_v13  ;;  %1083 = vmatpush.msra.mxu1 %v5011_v9  ;;  %v5021_v13 = vld [vmem:[#allocation26_spill] sm:$0xff] }
 0x2e9   :  { %1103 = vmatpush.msra.mxu2 %v5012_v10  ;;  %1123 = vmatpush.msra.mxu3 %v5013_v7  ;;  %v2517_v7 = vld [vmem:[%s4760_s0 + $0x80] sm:$0xff] }
 0x2ea   :  { %1064 = vmatpush.msra.mxu0 %v5014_v8  ;;  %1084 = vmatpush.msra.mxu1 %v5015_v1  ;;  %v2518_v1 = vld [vmem:[%s4760_s0 + $0x88] sm:$0xff] }
 0x2eb   :  { %1104 = vmatpush.msra.mxu2 %v5016_v6  ;;  %1124 = vmatpush.msra.mxu3 %v5017_v3 }
 0x2ec   :  { %1065 = vmatpush.msra.mxu0 %v5018_v22  ;;  %1085 = vmatpush.msra.mxu1 %v5019_v16 }
 0x2ed   :  { %1105 = vmatpush.msra.mxu2 %v5020_v24  ;;  %1125 = vmatpush.msra.mxu3 %v5021_v13  ;;  %v2519_v24 = vld [vmem:[%s4760_s0 + $0x90] sm:$0xff] }
 0x349   :  { %v759_v8 = vpop.f32.mrf.mxu0  ;;  %v779_v6 = vpop.f32.mrf.mxu1 }
 0x34a   :  { %v822_v10 = vadd.f32 %v2517_v7, %v759_v8  ;;  %v823_v3 = vadd.f32 %v2518_v1, %v779_v6 }
 0x34c   :  { %v2521_v9 = vmul.f32 -1.442695, %v822_v10  ;;  %v2522_v22 = vmul.f32 -1.442695, %v823_v3  ;;  %v2520_v10 = vld [vmem:[%s4760_s0 + $0x98] sm:$0xff] }
 0x34e   :  { %2704 = vpow2.f32 %v2521_v9 }
 0x34f   :  { %2706 = vpow2.f32 %v2522_v22 }
 0x350   :  { %v799_v13 = vpop.f32.mrf.mxu2  ;;  %v819_v9 = vpop.f32.mrf.mxu3 }
 0x351   :  { %v824_v16 = vadd.f32 %v2519_v24, %v799_v13  ;;  %v825_v6 = vadd.f32 %v2520_v10, %v819_v9 }
 0x353   :  { %v2523_v15 = vmul.f32 -1.442695, %v824_v16 }
 0x354   :  { %v2705_v23 = vpop.eup %2704 }
 0x355   :  { %v2707_v14 = vpop.eup %2706  ;;  %v835_v25 = vadd.f32 1.0, %v2705_v23  ;;  %2708 = vpow2.f32 %v2523_v15 }
 0x356   :  { %v836_v20 = vadd.f32 1.0, %v2707_v14 }
 0x357   :  { %2710 = vrcp.f32 %v835_v25  ;;  %v849_v23 = vand.u32 2147483648, %v835_v25  ;;  %v847_v18 = vand.u32 2147483647, %v835_v25  ;;  %vm843_vm6 = vweird.f32 %v835_v25 }
 0x358   :  { %2712 = vrcp.f32 %v836_v20  ;;  %v864_v14 = vand.u32 2147483648, %v836_v20  ;;  %v862_v11 = vand.u32 2147483647, %v836_v20  ;;  %vm858_vm7 = vweird.f32 %v836_v20 }
 0x359   :  { %v850_v9 = vor.u32 1.1754944e-38, %v849_v23  ;;  %vm848_vm10 = vcmp.eq.f32.partialorder %v847_v18, 8.507059e+37 }
 0x35a   :  { %vm863_vm11 = vcmp.eq.f32.partialorder %v862_v11, 8.507059e+37 }
 0x35b   :  { %v2709_v7 = vpop.eup %2708 }
 0x35c   :  { %v837_v8 = vadd.f32 1.0, %v2709_v7 }
 0x35d   :  { %v2711_v1 = vpop.eup %2710 }
 0x35e   :  { %v2713_v3 = vpop.eup %2712  ;;  %v839_v22 = vmul.f32 %v2711_v1, %v835_v25  ;;  %2714 = vrcp.f32 %v837_v8  ;;  %vm844_vm4 = vweird.f32 %v2711_v1  ;;  %v879_v18 = vand.u32 2147483648, %v837_v8 }
 0x35f   :  { %v854_v24 = vmul.f32 %v2713_v3, %v836_v20  ;;  %2716 = vtanh.f32 %v825_v6  ;;  %vm859_vm5 = vweird.f32 %v2713_v3  ;;  %vm845_vm8 = vmor %vm843_vm6, %vm844_vm4  ;;  %v4175_v20 = vld [vmem:[%s4761_s1] sm:$0xff]  ;;  %vm873_vm14 = vweird.f32 %v837_v8 }
 0x360   :  { %v840_v13 = vsub.f32 1.0, %v839_v22  ;;  %vm860_vm9 = vmor %vm858_vm7, %vm859_vm5  ;;  %v865_v22 = vor.u32 1.1754944e-38, %v864_v14  ;;  %vm54_vm12 = vcmp.gt.s32.totalorder %v4175_v20, 4  ;;  %v880_v25 = vor.u32 1.1754944e-38, %v879_v18 }
 0x361   :  { %v855_v16 = vsub.f32 1.0, %v854_v24 }
 0x362   :  { %v841_v15 = vmul.f32 %v2711_v1, %v840_v13 }
 0x363   :  { %v856_v17 = vmul.f32 %v2713_v3, %v855_v16 }
 0x364   :  { %v2715_v12 = vpop.eup %2714  ;;  %v842_v21 = vadd.f32 %v2711_v1, %v841_v15 }
 0x365   :  { %v869_v10 = vmul.f32 %v2715_v12, %v837_v8  ;;  %v857_v7 = vadd.f32 %v2713_v3, %v856_v17  ;;  %v2717_v6 = vpop.eup %2716  ;;  %vm874_vm13 = vweird.f32 %v2715_v12 }
 0x366   :  { %v846_v24 = vsel %vm845_vm8, %v2711_v1, %v842_v21  ;;  %vm875_vm15 = vmor %vm873_vm14, %vm874_vm13 }
 0x367   :  { %v870_v5 = vsub.f32 1.0, %v869_v10  ;;  %v851_v13 = vsel %vm848_vm10, %v850_v9, %v846_v24  ;;  %v861_v0 = vsel %vm860_vm9, %v2713_v3, %v857_v7  ;;  %v2527_v10 = vld [vmem:[%s4760_s0 + $0xb8] sm:$0xff]  ;;  %vm55_vm9 = vcmp.gt.s32.totalorder %v4175_v20, 5 }
 0x368   :  { %v866_v16 = vsel %vm863_vm11, %v865_v22, %v861_v0  ;;  %v885_v26 = vmul.f32 %v2717_v6, %v851_v13 }
 0x369   :  { %v871_v19 = vmul.f32 %v2715_v12, %v870_v5  ;;  %v884_v15 = vmul.f32 %v866_v16, %v4084_v4  ;;  %v877_v5 = vand.u32 2147483647, %v837_v8 }
 0x36b   :  { %v886_v17 = vadd.f32 %v885_v26, %v884_v15  ;;  %v872_v21 = vadd.f32 %v2715_v12, %v871_v19  ;;  %vm878_vm0 = vcmp.eq.f32.partialorder %v877_v5, 8.507059e+37 }
 0x36d   :  { %2718 = vtanh.f32 %v886_v17  ;;  %v4181_v0 = vsel %vm54_vm12, %v886_v17, %v4084_v4  ;;  %v876_v11 = vsel %vm875_vm15, %v2715_v12, %v872_v21 }
 0x36e   :  { %v881_v3 = vsel %vm878_vm0, %v880_v25, %v876_v11 }
 0x373   :  { %v2719_v1 = vpop.eup %2718 }
 0x374   :  { %v888_v23 = vmul.f32 %v2719_v1, %v881_v3 }
 0x376   :  { %v4186_v19 = vsel %vm54_vm12, %v888_v23, %v4089_v48 }
 0x377   :  { %912 = vmatmul.f32.vlgmr.msrb.gmra.mxu0 %v4186_v19  ;;  %932 = vmatmul.f32.vlgmr.msrb.gmra.mxu1 %v4186_v19 }
 0x378   :  { %952 = vmatmul.f32.vlgmr.msrb.gmra.mxu2 %v4186_v19  ;;  %972 = vmatmul.f32.vlgmr.msrb.gmra.mxu3 %v4186_v19 }
 0x379   :  { %1204 = vmatpush.msrb.mxu0 %v3686_v40  ;;  %1224 = vmatpush.msrb.mxu1 %v3692_v32  ;;  %v5022_v40 = vld [vmem:[#allocation4_spill] sm:$0xff]  ;;  %v5023_v32 = vld [vmem:[#allocation5_spill] sm:$0xff] }
 0x37a   :  { %1244 = vmatpush.msrb.mxu2 %v3698_v27  ;;  %1264 = vmatpush.msrb.mxu3 %v3704_v28  ;;  %v5024_v27 = vld [vmem:[#allocation6_spill] sm:$0xff]  ;;  %v5025_v28 = vld [vmem:[#allocation19_spill] sm:$0xff] }
 0x37b   :  { %1205 = vmatpush.msrb.mxu0 %v3710_v29  ;;  %1225 = vmatpush.msrb.mxu1 %v3716_v30  ;;  %v5026_v29 = vld [vmem:[#allocation7_spill] sm:$0xff]  ;;  %v5027_v30 = vld [vmem:[#allocation8_spill] sm:$0xff] }
 0x37c   :  { %1245 = vmatpush.msrb.mxu2 %v3722_v31  ;;  %1265 = vmatpush.msrb.mxu3 %v3728_v33  ;;  %v5028_v31 = vld [vmem:[#allocation9_spill] sm:$0xff]  ;;  %v5029_v33 = vld [vmem:[#allocation23_spill] sm:$0xff] }
 0x37d   :  { %1206 = vmatpush.msrb.mxu0 %v3734_v35  ;;  %1226 = vmatpush.msrb.mxu1 %v3740_v39  ;;  %v5030_v35 = vld [vmem:[#allocation10_spill] sm:$0xff]  ;;  %v5031_v39 = vld [vmem:[#allocation11_spill] sm:$0xff] }
 0x37e   :  { %1246 = vmatpush.msrb.mxu2 %v3746_v43  ;;  %1266 = vmatpush.msrb.mxu3 %v3752_v47  ;;  %v5032_v43 = vld [vmem:[#allocation12_spill] sm:$0xff]  ;;  %v5033_v47 = vld [vmem:[#allocation27_spill] sm:$0xff] }
 0x37f   :  { %1207 = vmatpush.msrb.mxu0 %v3758_v60  ;;  %1227 = vmatpush.msrb.mxu1 %v3764_v38  ;;  %v5034_v60 = vld [vmem:[#allocation13_spill] sm:$0xff]  ;;  %v5035_v38 = vld [vmem:[#allocation14_spill] sm:$0xff] }
 0x380   :  { %1247 = vmatpush.msrb.mxu2 %v3770_v36  ;;  %1267 = vmatpush.msrb.mxu3 %v3776_v56  ;;  %v5036_v36 = vld [vmem:[#allocation15_spill] sm:$0xff]  ;;  %v5037_v56 = vld [vmem:[#allocation28_spill] sm:$0xff] }
 0x381   :  { %1208 = vmatpush.msrb.mxu0 %v3782_v57  ;;  %1228 = vmatpush.msrb.mxu1 %v3788_v62  ;;  %v5038_v57 = vld [vmem:[#allocation16_spill] sm:$0xff]  ;;  %v5039_v62 = vld [vmem:[#allocation17_spill] sm:$0xff] }
 0x382   :  { %1248 = vmatpush.msrb.mxu2 %v3794_v2  ;;  %1268 = vmatpush.msrb.mxu3 %v3800_v59  ;;  %v5040_v2 = vld [vmem:[#allocation18_spill] sm:$0xff]  ;;  %v5041_v59 = vld [vmem:[#allocation29_spill] sm:$0xff] }
 0x383   :  { %1209 = vmatpush.msrb.mxu0 %v3806_v55  ;;  %1229 = vmatpush.msrb.mxu1 %v3812_v41  ;;  %v5042_v55 = vld [vmem:[#allocation20_spill] sm:$0xff]  ;;  %v5043_v41 = vld [vmem:[#allocation21_spill] sm:$0xff] }
 0x384   :  { %1249 = vmatpush.msrb.mxu2 %v3818_v46  ;;  %1269 = vmatpush.msrb.mxu3 %v3824_v44  ;;  %v5044_v46 = vld [vmem:[#allocation22_spill] sm:$0xff] }
 0x385   :  { %1210 = vmatpush.msrb.mxu0 %v3830_v37  ;;  %1230 = vmatpush.msrb.mxu1 %v3836_v63  ;;  %v5045_v44 = vld [vmem:[#allocation30_spill] sm:$0xff]  ;;  %v5046_v37 = vld [vmem:[#allocation24_spill] sm:$0xff]  ;;  %v5047_v63 = vld [vmem:[#allocation25_spill] sm:$0xff] }
 0x386   :  { %1250 = vmatpush.msrb.mxu2 %v3842_v42  ;;  %1270 = vmatpush.msrb.mxu3 %v3848_v45  ;;  %v5048_v42 = vld [vmem:[#allocation26_spill] sm:$0xff] }
 0x387   :  { %1211 = vmatpush.msrb.mxu0 %v3854_v54  ;;  %1231 = vmatpush.msrb.mxu1 %v3860_v58  ;;  %v2524_v45 = vld [vmem:[%s4760_s0 + $0xa0] sm:$0xff]  ;;  %v2525_v54 = vld [vmem:[%s4760_s0 + $0xa8] sm:$0xff] }
 0x388   :  { %1251 = vmatpush.msrb.mxu2 %v3866_v50  ;;  %1271 = vmatpush.msrb.mxu3 %v3872_v53 }
 0x389   :  { %1212 = vmatpush.msrb.mxu0 %v3878_v34  ;;  %1232 = vmatpush.msrb.mxu1 %v3884_v52 }
 0x38a   :  { %1252 = vmatpush.msrb.mxu2 %v3890_v51  ;;  %1272 = vmatpush.msrb.mxu3 %v3896_v49  ;;  %v2526_v49 = vld [vmem:[%s4760_s0 + $0xb0] sm:$0xff] }
 0x38b   :  { %1213 = vmatpush.msrb.mxu0 %v4994_v61  ;;  %1233 = vmatpush.msrb.mxu1 %v5022_v40 }
 0x38c   :  { %1253 = vmatpush.msrb.mxu2 %v5023_v32  ;;  %1273 = vmatpush.msrb.mxu3 %v5024_v27 }
 0x38d   :  { %1214 = vmatpush.msrb.mxu0 %v5025_v28  ;;  %1234 = vmatpush.msrb.mxu1 %v5026_v29 }
 0x38e   :  { %1254 = vmatpush.msrb.mxu2 %v5027_v30  ;;  %1274 = vmatpush.msrb.mxu3 %v5028_v31 }
 0x38f   :  { %1215 = vmatpush.msrb.mxu0 %v5029_v33  ;;  %1235 = vmatpush.msrb.mxu1 %v5030_v35 }
 0x390   :  { %1255 = vmatpush.msrb.mxu2 %v5031_v39  ;;  %1275 = vmatpush.msrb.mxu3 %v5032_v43 }
 0x391   :  { %1216 = vmatpush.msrb.mxu0 %v5033_v47  ;;  %1236 = vmatpush.msrb.mxu1 %v5034_v60 }
 0x392   :  { %1256 = vmatpush.msrb.mxu2 %v5035_v38  ;;  %1276 = vmatpush.msrb.mxu3 %v5036_v36 }
 0x393   :  { %1217 = vmatpush.msrb.mxu0 %v5037_v56  ;;  %1237 = vmatpush.msrb.mxu1 %v5038_v57 }
 0x394   :  { %1257 = vmatpush.msrb.mxu2 %v5039_v62  ;;  %1277 = vmatpush.msrb.mxu3 %v5040_v2 }
 0x395   :  { %1218 = vmatpush.msrb.mxu0 %v5041_v59  ;;  %1238 = vmatpush.msrb.mxu1 %v5042_v55 }
 0x396   :  { %1258 = vmatpush.msrb.mxu2 %v5043_v41  ;;  %1278 = vmatpush.msrb.mxu3 %v5044_v46 }
 0x397   :  { %1219 = vmatpush.msrb.mxu0 %v5045_v44  ;;  %1239 = vmatpush.msrb.mxu1 %v5046_v37 }
 0x398   :  { %1259 = vmatpush.msrb.mxu2 %v5047_v63  ;;  %1279 = vmatpush.msrb.mxu3 %v5048_v42  ;;  %v2532_v63 = vld [vmem:[%s4760_s0 + $0xc8] sm:$0xff] }
 0x3f4   :  { %v913_v58 = vpop.f32.mrf.mxu0  ;;  %v933_v50 = vpop.f32.mrf.mxu1 }
 0x3f5   :  { %v976_v53 = vadd.f32 %v2524_v45, %v913_v58  ;;  %v977_v34 = vadd.f32 %v2525_v54, %v933_v50 }
 0x3f7   :  { %v2528_v52 = vmul.f32 -1.442695, %v976_v53  ;;  %v2529_v51 = vmul.f32 -1.442695, %v977_v34  ;;  %v2533_v53 = vld [vmem:[%s4760_s0 + $0xd0] sm:$0xff] }
 0x3f9   :  { %2720 = vpow2.f32 %v2528_v52 }
 0x3fa   :  { %2722 = vpow2.f32 %v2529_v51 }
 0x3fb   :  { %v953_v4 = vpop.f32.mrf.mxu2  ;;  %v973_v9 = vpop.f32.mrf.mxu3 }
 0x3fc   :  { %v978_v48 = vadd.f32 %v2526_v49, %v953_v4  ;;  %v979_v6 = vadd.f32 %v2527_v10, %v973_v9 }
 0x3fe   :  { %v2530_v61 = vmul.f32 -1.442695, %v978_v48 }
 0x3ff   :  { %v2721_v26 = vpop.eup %2720 }
 0x400   :  { %v2723_v12 = vpop.eup %2722  ;;  %v989_v8 = vadd.f32 1.0, %v2721_v26  ;;  %2724 = vpow2.f32 %v2530_v61  ;;  %v2534_v26 = vld [vmem:[%s4760_s0 + $0xd8] sm:$0xff] }
 0x401   :  { %v990_v14 = vadd.f32 1.0, %v2723_v12 }
 0x402   :  { %2726 = vrcp.f32 %v989_v8  ;;  %v1003_v18 = vand.u32 2147483648, %v989_v8  ;;  %v1001_v25 = vand.u32 2147483647, %v989_v8  ;;  %vm997_vm3 = vweird.f32 %v989_v8 }
 0x403   :  { %2728 = vrcp.f32 %v990_v14  ;;  %v1018_v5 = vand.u32 2147483648, %v990_v14  ;;  %v1016_v3 = vand.u32 2147483647, %v990_v14  ;;  %vm1012_vm4 = vweird.f32 %v990_v14 }
 0x404   :  { %v1004_v27 = vor.u32 1.1754944e-38, %v1003_v18  ;;  %vm1002_vm7 = vcmp.eq.f32.partialorder %v1001_v25, 8.507059e+37 }
 0x405   :  { %v1019_v29 = vor.u32 1.1754944e-38, %v1018_v5  ;;  %vm1017_vm8 = vcmp.eq.f32.partialorder %v1016_v3, 8.507059e+37 }
 0x406   :  { %v2725_v7 = vpop.eup %2724 }
 0x407   :  { %v991_v22 = vadd.f32 1.0, %v2725_v7 }
 0x408   :  { %v2727_v24 = vpop.eup %2726 }
 0x409   :  { %v2729_v13 = vpop.eup %2728  ;;  %v993_v16 = vmul.f32 %v2727_v24, %v989_v8  ;;  %2730 = vrcp.f32 %v991_v22  ;;  %vm998_vm1 = vweird.f32 %v2727_v24  ;;  %v1033_v57 = vand.u32 2147483648, %v991_v22 }
 0x40a   :  { %v1008_v15 = vmul.f32 %v2729_v13, %v990_v14  ;;  %2732 = vtanh.f32 %v979_v6  ;;  %vm1013_vm2 = vweird.f32 %v2729_v13  ;;  %vm999_vm5 = vmor %vm997_vm3, %vm998_vm1  ;;  %vm1027_vm11 = vweird.f32 %v991_v22 }
 0x40b   :  { %v994_v17 = vsub.f32 1.0, %v993_v16  ;;  %vm1014_vm6 = vmor %vm1012_vm4, %vm1013_vm2  ;;  %v1031_v2 = vand.u32 2147483647, %v991_v22  ;;  %v1034_v55 = vor.u32 1.1754944e-38, %v1033_v57 }
 0x40c   :  { %v1009_v21 = vsub.f32 1.0, %v1008_v15 }
 0x40d   :  { %v995_v11 = vmul.f32 %v2727_v24, %v994_v17  ;;  %vm1032_vm13 = vcmp.eq.f32.partialorder %v1031_v2, 8.507059e+37 }
 0x40e   :  { %v1010_v1 = vmul.f32 %v2729_v13, %v1009_v21 }
 0x40f   :  { %v2731_v23 = vpop.eup %2730  ;;  %v996_v40 = vadd.f32 %v2727_v24, %v995_v11 }
 0x410   :  { %v1023_v32 = vmul.f32 %v2731_v23, %v991_v22  ;;  %v1011_v28 = vadd.f32 %v2729_v13, %v1010_v1  ;;  %v2733_v31 = vpop.eup %2732  ;;  %vm1028_vm10 = vweird.f32 %v2731_v23 }
 0x411   :  { %v1000_v30 = vsel %vm999_vm5, %v2727_v24, %v996_v40  ;;  %vm1029_vm12 = vmor %vm1027_vm11, %vm1028_vm10 }
 0x412   :  { %v1024_v33 = vsub.f32 1.0, %v1023_v32  ;;  %v1005_v35 = vsel %vm1002_vm7, %v1004_v27, %v1000_v30  ;;  %v1015_v39 = vsel %vm1014_vm6, %v2729_v13, %v1011_v28  ;;  %vm56_vm6 = vcmp.gt.s32.totalorder %v4175_v20, 6 }
 0x413   :  { %v1020_v43 = vsel %vm1017_vm8, %v1019_v29, %v1015_v39  ;;  %v1039_v47 = vmul.f32 %v2733_v31, %v1005_v35 }
 0x414   :  { %v1025_v60 = vmul.f32 %v2731_v23, %v1024_v33  ;;  %v1038_v38 = vmul.f32 %v1020_v43, %v4181_v0 }
 0x416   :  { %v1040_v36 = vadd.f32 %v1039_v47, %v1038_v38  ;;  %v1026_v56 = vadd.f32 %v2731_v23, %v1025_v60 }
 0x418   :  { %2734 = vtanh.f32 %v1040_v36  ;;  %v4273_v62 = vsel %vm55_vm9, %v1040_v36, %v4181_v0  ;;  %v1030_v59 = vsel %vm1029_vm12, %v2731_v23, %v1026_v56  ;;  %v2531_v0 = vld [vmem:[%s4760_s0 + $0xc0] sm:$0xff] }
 0x419   :  { %v1035_v46 = vsel %vm1032_vm13, %v1034_v55, %v1030_v59 }
 0x41e   :  { %v2735_v41 = vpop.eup %2734 }
 0x41f   :  { %v1042_v44 = vmul.f32 %v2735_v41, %v1035_v46  ;;  %v2539_v46 = vld [vmem:[%s4760_s0 + $0xe8] sm:$0xff] }
 0x421   :  { %v4278_v37 = vsel %vm55_vm9, %v1042_v44, %v4186_v19 }
 0x422   :  { %1066 = vmatmul.f32.vlgmr.msra.gmra.mxu0 %v4278_v37  ;;  %1086 = vmatmul.f32.vlgmr.msra.gmra.mxu1 %v4278_v37 }
 0x423   :  { %1106 = vmatmul.f32.vlgmr.msra.gmra.mxu2 %v4278_v37  ;;  %1126 = vmatmul.f32.vlgmr.msra.gmra.mxu3 %v4278_v37 }
 0x49f   :  { %v1067_v42 = vpop.f32.mrf.mxu0  ;;  %v1087_v45 = vpop.f32.mrf.mxu1 }
 0x4a0   :  { %v1130_v19 = vadd.f32 %v2531_v0, %v1067_v42  ;;  %v1131_v54 = vadd.f32 %v2532_v63, %v1087_v45 }
 0x4a2   :  { %v2535_v58 = vmul.f32 -1.442695, %v1130_v19  ;;  %v2536_v50 = vmul.f32 -1.442695, %v1131_v54  ;;  %v2540_v19 = vld [vmem:[%s4760_s0 + $0xf0] sm:$0xff] }
 0x4a4   :  { %2736 = vpow2.f32 %v2535_v58 }
 0x4a5   :  { %2738 = vpow2.f32 %v2536_v50  ;;  %v1357_v50 = vld [vmem:[%s4762_s4 + $0x18] sm:$0xff] }
 0x4a6   :  { %v1107_v34 = vpop.f32.mrf.mxu2  ;;  %v1127_v12 = vpop.f32.mrf.mxu3  ;;  %1379 = vmatpush.msra.mxu0 %v1357_v50  ;;  %1415 = vmatpush.msra.mxu1 %v1357_v50  ;;  %v2634_v50 = vld [vmem:[%s4763_s5] ss:$0 sm:$0xff] }
 0x4a7   :  { %v1132_v52 = vadd.f32 %v2533_v53, %v1107_v34  ;;  %v1133_v9 = vadd.f32 %v2534_v26, %v1127_v12  ;;  %v2541_v26 = vld [vmem:[%s4760_s0 + $0xf8] sm:$0xff] }
 0x4a9   :  { %v2537_v51 = vmul.f32 -1.442695, %v1132_v52  ;;  %v1356_v52 = vld [vmem:[%s4762_s4 + $0x10] sm:$0xff] }
 0x4aa   :  { %v2737_v49 = vpop.eup %2736  ;;  %1380 = vmatpush.msra.mxu0 %v1356_v52  ;;  %1416 = vmatpush.msra.mxu1 %v1356_v52 }
 0x4ab   :  { %v2739_v4 = vpop.eup %2738  ;;  %v1143_v48 = vadd.f32 1.0, %v2737_v49  ;;  %2740 = vpow2.f32 %v2537_v51 }
 0x4ac   :  { %v1144_v61 = vadd.f32 1.0, %v2739_v4 }
 0x4ad   :  { %2742 = vrcp.f32 %v1143_v48  ;;  %v1157_v16 = vand.u32 2147483648, %v1143_v48  ;;  %v1155_v21 = vand.u32 2147483647, %v1143_v48  ;;  %vm1151_vm0 = vweird.f32 %v1143_v48 }
 0x4ae   :  { %2744 = vrcp.f32 %v1144_v61  ;;  %v1172_v15 = vand.u32 2147483648, %v1144_v61  ;;  %v1170_v5 = vand.u32 2147483647, %v1144_v61  ;;  %vm1166_vm1 = vweird.f32 %v1144_v61 }
 0x4af   :  { %v1158_v3 = vor.u32 1.1754944e-38, %v1157_v16  ;;  %vm1156_vm4 = vcmp.eq.f32.partialorder %v1155_v21, 8.507059e+37 }
 0x4b0   :  { %v1173_v40 = vor.u32 1.1754944e-38, %v1172_v15  ;;  %vm1171_vm5 = vcmp.eq.f32.partialorder %v1170_v5, 8.507059e+37 }
 0x4b1   :  { %v2741_v8 = vpop.eup %2740 }
 0x4b2   :  { %v1145_v14 = vadd.f32 1.0, %v2741_v8 }
 0x4b3   :  { %v2743_v10 = vpop.eup %2742 }
 0x4b4   :  { %v2745_v7 = vpop.eup %2744  ;;  %v1147_v22 = vmul.f32 %v2743_v10, %v1143_v48  ;;  %2746 = vrcp.f32 %v1145_v14  ;;  %vm1152_vm14 = vweird.f32 %v2743_v10  ;;  %v1187_v60 = vand.u32 2147483648, %v1145_v14  ;;  %v1355_v48 = vld [vmem:[%s4762_s4 + $0x8] sm:$0xff] }
 0x4b5   :  { %v1162_v24 = vmul.f32 %v2745_v7, %v1144_v61  ;;  %2748 = vtanh.f32 %v1133_v9  ;;  %vm1167_vm15 = vweird.f32 %v2745_v7  ;;  %vm1153_vm2 = vmor %vm1151_vm0, %vm1152_vm14  ;;  %vm1181_vm8 = vweird.f32 %v1145_v14  ;;  %1381 = vmatpush.msra.mxu0 %v1355_v48  ;;  %1417 = vmatpush.msra.mxu1 %v1355_v48  ;;  %v1354_v61 = vld [vmem:[%s4762_s4] sm:$0xff] }
 0x4b6   :  { %v1148_v6 = vsub.f32 1.0, %v1147_v22  ;;  %vm1168_vm3 = vmor %vm1166_vm1, %vm1167_vm15  ;;  %v1185_v36 = vand.u32 2147483647, %v1145_v14  ;;  %v1188_v57 = vor.u32 1.1754944e-38, %v1187_v60 }
 0x4b7   :  { %v1163_v13 = vsub.f32 1.0, %v1162_v24  ;;  %1382 = vmatpush.msra.mxu0 %v1354_v61  ;;  %1418 = vmatpush.msra.mxu1 %v1354_v61 }
 0x4b8   :  { %v1149_v17 = vmul.f32 %v2743_v10, %v1148_v6  ;;  %vm1186_vm10 = vcmp.eq.f32.partialorder %v1185_v36, 8.507059e+37 }
 0x4b9   :  { %v1164_v18 = vmul.f32 %v2745_v7, %v1163_v13 }
 0x4ba   :  { %v2747_v11 = vpop.eup %2746  ;;  %v1150_v25 = vadd.f32 %v2743_v10, %v1149_v17 }
 0x4bb   :  { %v1177_v1 = vmul.f32 %v2747_v11, %v1145_v14  ;;  %v1165_v23 = vadd.f32 %v2745_v7, %v1164_v18  ;;  %v2749_v27 = vpop.eup %2748  ;;  %vm1182_vm7 = vweird.f32 %v2747_v11 }
 0x4bc   :  { %v1154_v32 = vsel %vm1153_vm2, %v2743_v10, %v1150_v25  ;;  %vm1183_vm9 = vmor %vm1181_vm8, %vm1182_vm7  ;;  %vm57_vm7 = vcmp.gt.s32.totalorder %v4175_v20, 7  ;;  %vm1363_vm8 = vcmask 261120  }
 0x4bd   :  { %v1178_v28 = vsub.f32 1.0, %v1177_v1  ;;  %v1159_v29 = vsel %vm1156_vm4, %v1158_v3, %v1154_v32  ;;  %v1169_v30 = vsel %vm1168_vm3, %v2745_v7, %v1165_v23 }
 0x4be   :  { %v1174_v31 = vsel %vm1171_vm5, %v1173_v40, %v1169_v30  ;;  %v1193_v33 = vmul.f32 %v2749_v27, %v1159_v29 }
 0x4bf   :  { %v1179_v35 = vmul.f32 %v2747_v11, %v1178_v28  ;;  %v1192_v39 = vmul.f32 %v1174_v31, %v4273_v62 }
 0x4c1   :  { %v1194_v43 = vadd.f32 %v1193_v33, %v1192_v39  ;;  %v1180_v47 = vadd.f32 %v2747_v11, %v1179_v35 }
 0x4c3   :  { %2750 = vtanh.f32 %v1194_v43  ;;  %v4301_v38 = vsel %vm56_vm6, %v1194_v43, %v4273_v62  ;;  %v1184_v56 = vsel %vm1183_vm9, %v2747_v11, %v1180_v47  ;;  %v2538_v62 = vld [vmem:[%s4760_s0 + $0xe0] sm:$0xff]  ;;  %vm1387_vm9 = vcmask 58368  }
 0x4c4   :  { %v1189_v59 = vsel %vm1186_vm10, %v1188_v57, %v1184_v56  ;;  %vm1423_vm10 = vcmask 64512  }
 0x4c9   :  { %v2751_v2 = vpop.eup %2750 }
 0x4ca   :  { %v1196_v55 = vmul.f32 %v2751_v2, %v1189_v59 }
 0x4cc   :  { %v4306_v41 = vsel %vm56_vm6, %v1196_v55, %v4278_v37 }
 0x4cd   :  { %1220 = vmatmul.f32.vlgmr.msrb.gmra.mxu0 %v4306_v41  ;;  %1240 = vmatmul.f32.vlgmr.msrb.gmra.mxu1 %v4306_v41 }
 0x4ce   :  { %1260 = vmatmul.f32.vlgmr.msrb.gmra.mxu2 %v4306_v41  ;;  %1280 = vmatmul.f32.vlgmr.msrb.gmra.mxu3 %v4306_v41 }
 0x54a   :  { %v1221_v44 = vpop.f32.mrf.mxu0  ;;  %v1241_v0 = vpop.f32.mrf.mxu1 }
 0x54b   :  { %v1284_v37 = vadd.f32 %v2538_v62, %v1221_v44  ;;  %v1285_v63 = vadd.f32 %v2539_v46, %v1241_v0 }
 0x54d   :  { %v2542_v42 = vmul.f32 -1.442695, %v1284_v37  ;;  %v2543_v45 = vmul.f32 -1.442695, %v1285_v63 }
 0x54f   :  { %2752 = vpow2.f32 %v2542_v42 }
 0x550   :  { %2754 = vpow2.f32 %v2543_v45 }
 0x551   :  { %v1261_v54 = vpop.f32.mrf.mxu2  ;;  %v1281_v12 = vpop.f32.mrf.mxu3 }
 0x552   :  { %v1286_v58 = vadd.f32 %v2540_v19, %v1261_v54  ;;  %v1287_v9 = vadd.f32 %v2541_v26, %v1281_v12 }
 0x554   :  { %v2544_v53 = vmul.f32 -1.442695, %v1286_v58 }
 0x555   :  { %v2753_v34 = vpop.eup %2752 }
 0x556   :  { %v2755_v51 = vpop.eup %2754  ;;  %v1297_v49 = vadd.f32 1.0, %v2753_v34  ;;  %2756 = vpow2.f32 %v2544_v53 }
 0x557   :  { %v1298_v4 = vadd.f32 1.0, %v2755_v51 }
 0x558   :  { %2758 = vrcp.f32 %v1297_v49  ;;  %v1311_v16 = vand.u32 2147483648, %v1297_v49  ;;  %v1309_v21 = vand.u32 2147483647, %v1297_v49  ;;  %vm1305_vm13 = vweird.f32 %v1297_v49 }
 0x559   :  { %2760 = vrcp.f32 %v1298_v4  ;;  %v1326_v15 = vand.u32 2147483648, %v1298_v4  ;;  %v1324_v5 = vand.u32 2147483647, %v1298_v4  ;;  %vm1320_vm14 = vweird.f32 %v1298_v4 }
 0x55a   :  { %v1312_v3 = vor.u32 1.1754944e-38, %v1311_v16  ;;  %vm1310_vm1 = vcmp.eq.f32.partialorder %v1309_v21, 8.507059e+37 }
 0x55b   :  { %v1327_v40 = vor.u32 1.1754944e-38, %v1326_v15  ;;  %vm1325_vm2 = vcmp.eq.f32.partialorder %v1324_v5, 8.507059e+37 }
 0x55c   :  { %v2757_v8 = vpop.eup %2756 }
 0x55d   :  { %v1299_v14 = vadd.f32 1.0, %v2757_v8 }
 0x55e   :  { %v2759_v10 = vpop.eup %2758 }
 0x55f   :  { %v2761_v7 = vpop.eup %2760  ;;  %v1301_v22 = vmul.f32 %v2759_v10, %v1297_v49  ;;  %2762 = vrcp.f32 %v1299_v14  ;;  %vm1306_vm11 = vweird.f32 %v2759_v10  ;;  %v1341_v60 = vand.u32 2147483648, %v1299_v14 }
 0x560   :  { %v1316_v24 = vmul.f32 %v2761_v7, %v1298_v4  ;;  %2764 = vtanh.f32 %v1287_v9  ;;  %vm1321_vm12 = vweird.f32 %v2761_v7  ;;  %vm1307_vm15 = vmor %vm1305_vm13, %vm1306_vm11  ;;  %vm1335_vm4 = vweird.f32 %v1299_v14 }
 0x561   :  { %v1302_v6 = vsub.f32 1.0, %v1301_v22  ;;  %vm1322_vm0 = vmor %vm1320_vm14, %vm1321_vm12  ;;  %v1339_v36 = vand.u32 2147483647, %v1299_v14  ;;  %v1342_v57 = vor.u32 1.1754944e-38, %v1341_v60 }
 0x562   :  { %v1317_v13 = vsub.f32 1.0, %v1316_v24  ;;  %v1436_v24 = vlaneseq }
 0x563   :  { %v1303_v17 = vmul.f32 %v2759_v10, %v1302_v6  ;;  %vm1340_vm6 = vcmp.eq.f32.partialorder %v1339_v36, 8.507059e+37 }
 0x564   :  { %v1318_v18 = vmul.f32 %v2761_v7, %v1317_v13  ;;  %v1437_v6 = vshrl.u32 %v1436_v24, 7 }
 0x565   :  { %v2763_v11 = vpop.eup %2762  ;;  %v1304_v25 = vadd.f32 %v2759_v10, %v1303_v17 }
 0x566   :  { %v1331_v1 = vmul.f32 %v2763_v11, %v1299_v14  ;;  %v1319_v23 = vadd.f32 %v2761_v7, %v1318_v18  ;;  %v2765_v27 = vpop.eup %2764  ;;  %vm1336_vm3 = vweird.f32 %v2763_v11  ;;  %2603 = vset.pattern.permute.xlu0 %v1437_v6  ;;  %2602 = vset.pattern.permute.xlu1 %v1437_v6 }
 0x567   :  { %v1308_v32 = vsel %vm1307_vm15, %v2759_v10, %v1304_v25  ;;  %vm1337_vm5 = vmor %vm1335_vm4, %vm1336_vm3  ;;  %2601 = vset.pattern.permute.xlu2 %v1437_v6  ;;  %v1359_v6 = vld [vmem:[%s4765_s6] sm:$0xff] }
 0x568   :  { %v1332_v28 = vsub.f32 1.0, %v1331_v1  ;;  %v1313_v29 = vsel %vm1310_vm1, %v1312_v3, %v1308_v32  ;;  %v1323_v30 = vsel %vm1322_vm0, %v2761_v7, %v1319_v23 }
 0x569   :  { %v1328_v31 = vsel %vm1325_vm2, %v1327_v40, %v1323_v30  ;;  %v1347_v33 = vmul.f32 %v2765_v27, %v1313_v29 }
 0x56a   :  { %v1333_v35 = vmul.f32 %v2763_v11, %v1332_v28  ;;  %v1346_v39 = vmul.f32 %v1328_v31, %v4301_v38  ;;  %v1352_v38 = vld [vmem:[%s4764_s2] sm:$0xff] }
 0x56c   :  { %v1348_v43 = vadd.f32 %v1347_v33, %v1346_v39  ;;  %v1334_v47 = vadd.f32 %v2763_v11, %v1333_v35 }
 0x56e   :  { %2766 = vtanh.f32 %v1348_v43  ;;  %v1338_v56 = vsel %vm1337_vm5, %v2763_v11, %v1334_v47 }
 0x56f   :  { %v1343_v59 = vsel %vm1340_vm6, %v1342_v57, %v1338_v56 }
 0x574   :  { %v2767_v2 = vpop.eup %2766 }
 0x575   :  { %v1350_v55 = vmul.f32 %v2767_v2, %v1343_v59 }
 0x577   :  { %v1351_v62 = vsel %vm57_vm7, %v1350_v55, %v4306_v41  ;;  %vm1695_vm7 = vcmask 1041409  }
 0x578   :  { %v4342_v46 = vmul.f32 %v1352_v38, %v1351_v62 }
 0x57a   :  { %1501 = vst [vmem:[#allocation1] sm:$0xff] %v4342_v46  ;;  %1399 = vrot.lane.b32.xlu0 %v4342_v46, %s2874_s21  ;;  %2545 = vmatmul.msk.f32.vlgmr.msra.gmra.mxu0 %vm1363_vm8, %v4342_v46  ;;  %v4383_v60 = vperm.slane %v4342_v46, 0  ;;  %v1449_v55 = vrot.slane %v4342_v46, 1 }
 0x57c   :  { %v4390_v38 = vperm.slane %v1449_v55, 0 }
 0x581   :  { %v4349_v20 = vld [vmem:[#allocation1 + $0x2] ss:$9 sm:$0xff] }
 0x582   :  { %v4351_v44 = vld [vmem:[#allocation1 + $0x3] ss:$9 sm:$0xff]  ;;  %v1506_v57 = vperm.slane %v4349_v20, 0 }
 0x583   :  { %1539 = vst [vmem:[#allocation1] sm:$0xff] %v4342_v46 }
 0x58a   :  { %v4354_v0 = vld [vmem:[#allocation1 + $0x4] ss:$9 sm:$0xff] }
 0x58b   :  { %v4356_v41 = vld [vmem:[#allocation1 + $0x5] ss:$9 sm:$0xff] }
 0x58c   :  { %1577 = vst [vmem:[#allocation1] sm:$0xff] %v4342_v46 }
 0x593   :  { %v4359_v37 = vld [vmem:[#allocation1 + $0x7] ss:$9 sm:$0xff] }
 0x594   :  { %v4361_v63 = vld [vmem:[#allocation1 + $0x6] ss:$9 sm:$0xff] }
 0x595   :  { %2010 = vst [vmem:[#allocation1] sm:$0xff] %v4342_v46 }
 0x59c   :  { %v4364_v42 = vld [vmem:[#allocation1 + $0x3] ss:$9 sm:$0xff] }
 0x59d   :  { %v4366_v45 = vld [vmem:[#allocation1 + $0x2] ss:$9 sm:$0xff] }
 0x59e   :  { %2048 = vst [vmem:[#allocation1] sm:$0xff] %v4342_v46 }
 0x5a5   :  { %v4369_v19 = vld [vmem:[#allocation1 + $0x5] ss:$9 sm:$0xff] }
 0x5a6   :  { %v4371_v54 = vld [vmem:[#allocation1 + $0x4] ss:$9 sm:$0xff] }
 0x5a7   :  { %2086 = vst [vmem:[#allocation1] sm:$0xff] %v4342_v46 }
 0x5ec   :  { %v1400_v58 = vpop.permute.xlu0 %1399 }
 0x5ed   :  { %2546 = vmatmul.msk.f32.vlgmr.msra.gmra.mxu1 %vm1363_vm8, %v1400_v58 }
 0x5f7   :  { %v1384_v53 = vpop.f32.mrf.mxu0 }
 0x5f8   :  { %v1385_v34 = vadd.f32 %v2634_v50, %v1384_v53  ;;  %v1507_v53 = vperm.slane %v4351_v44, 0 }
 0x5fa   :  { %v1388_v52 = vsel %vm1387_vm9, %v1385_v34, -inf }
 0x5fb   :  { %1389 = vmax.xlane.f32.xlu1 %v1388_v52 }
 0x66a   :  { %v1420_v51 = vpop.f32.mrf.mxu1 }
 0x66b   :  { %v1421_v49 = vadd.f32 %v2634_v50, %v1420_v51 }
 0x66d   :  { %v1424_v4 = vsel %vm1423_vm10, %v1421_v49, -inf }
 0x66e   :  { %1425 = vmax.xlane.f32.xlu0 %v1424_v4  ;;  %v1390_v48 = vpop.xlane.xlu1 %1389  ;;  %v1545_v4 = vperm.slane %v4356_v41, 0 }
 0x66f   :  { %v1391_v61 = vsub.f32 %v1385_v34, %v1390_v48  ;;  %v1544_v34 = vperm.slane %v4354_v0, 0  ;;  %v1582_v48 = vperm.slane %v4361_v63, 0  ;;  %v1583_v0 = vperm.slane %v4359_v37, 0 }
 0x671   :  { %v1392_v26 = vmul.f32 1.442695, %v1391_v61 }
 0x673   :  { %2768 = vpow2.f32 %v1392_v26 }
 0x679   :  { %v2769_v12 = vpop.eup %2768 }
 0x67a   :  { %v1394_v8 = vsel %vm1387_vm9, %v2769_v12, 0.0 }
 0x67b   :  { %1395 = vadd.xlane.f32.xlu2 %v1394_v8 }
 0x6e1   :  { %v1426_v14 = vpop.xlane.xlu0 %1425 }
 0x6e2   :  { %v1427_v10 = vsub.f32 %v1421_v49, %v1426_v14 }
 0x6e4   :  { %v1428_v9 = vmul.f32 1.442695, %v1427_v10 }
 0x6e6   :  { %2770 = vpow2.f32 %v1428_v9 }
 0x6ec   :  { %v2771_v7 = vpop.eup %2770 }
 0x6ed   :  { %v1430_v22 = vsel %vm1423_vm10, %v2771_v7, 0.0 }
 0x6ee   :  { %1431 = vadd.xlane.f32.xlu1 %v1430_v22  ;;  %v1396_v13 = vpop.xlane.xlu2 %1395 }
 0x6ef   :  { %2772 = vrcp.f32 %v1396_v13 }
 0x6f5   :  { %v2773_v15 = vpop.eup %2772 }
 0x6f6   :  { %v1398_v18 = vmul.f32 %v2773_v15, %v2769_v12 }
 0x6f8   :  { %v1442_v39 = vperm.slane %v1398_v18, 1  ;;  %v1435_v47 = vperm.slane %v1398_v18, 0 }
 0x761   :  { %v1432_v16 = vpop.xlane.xlu1 %1431 }
 0x762   :  { %2774 = vrcp.f32 %v1432_v16 }
 0x768   :  { %v2775_v17 = vpop.eup %2774 }
 0x769   :  { %v1434_v21 = vmul.f32 %v2775_v17, %v2771_v7 }
 0x76b   :  { %v1570_v5 = vperm.slane %v1434_v21, 7  ;;  %v1464_v11 = vperm.slane %v1434_v21, 1  ;;  %v1457_v25 = vperm.slane %v1434_v21, 0  ;;  %v1456_v1 = vadd.f32 %v1434_v21, %v1398_v18 }
 0x76c   :  { %v1484_v3 = vrot.slane %v1434_v21, 2  ;;  %v1522_v40 = vrot.slane %v1434_v21, 4  ;;  %v1560_v27 = vrot.slane %v1434_v21, 6  ;;  %v1525_v29 = vperm.slane %v1434_v21, 4 }
 0x76d   :  { %1575 = vperm.xlu0 %2603, %v1570_v5   ;;  %1469 = vperm.xlu1 %2602, %v1464_v11   ;;  %v1487_v30 = vperm.slane %v1434_v21, 2  ;;  %v1563_v33 = vperm.slane %v1434_v21, 6  ;;  %v1494_v35 = vperm.slane %v1434_v21, 3  ;;  %v1532_v43 = vperm.slane %v1434_v21, 5 }
 0x76e   :  { %1462 = vperm.xlu2 %2601, %v1457_v25   ;;  %v1486_v23 = vadd.f32 %v1484_v3, %v1456_v1 }
 0x770   :  { %v1524_v32 = vadd.f32 %v1522_v40, %v1486_v23 }
 0x772   :  { %v1562_v28 = vadd.f32 %v1560_v27, %v1524_v32 }
 0x774   :  { %v1598_v31 = vperm.slane %v1562_v28, 0  ;;  %v1605_v14 = vperm.slane %v1562_v28, 1 }
 0x775   :  { %1530 = vperm.xlu1 %2602, %v1525_v29  }
 0x776   :  { %1492 = vperm.xlu2 %2601, %v1487_v30   ;;  %1603 = vperm.xlu0 %2603, %v1598_v31  }
 0x77d   :  { %1568 = vperm.xlu1 %2602, %v1563_v33  }
 0x77e   :  { %1499 = vperm.xlu2 %2601, %v1494_v35  }
 0x785   :  { %1447 = vperm.xlu1 %2602, %v1442_v39  }
 0x786   :  { %1537 = vperm.xlu2 %2601, %v1532_v43  }
 0x78e   :  { %1440 = vperm.xlu2 %2601, %v1435_v47  }
 0x7c8   :  { %v1463_v36 = vpop.permute.xlu2 %1462 }
 0x7c9   :  { %v1471_v56 = vmul.f32 %v1463_v36, %v4383_v60 }
 0x7cb   :  { %1475 = vrot.lane.b32.xlu2 %v1471_v56, %s2874_s21 }
 0x7d0   :  { %v1493_v2 = vpop.permute.xlu2 %1492 }
 0x7d1   :  { %v1510_v59 = vmul.f32 %v1506_v57, %v1493_v2 }
 0x7d3   :  { %1514 = vrot.lane.b32.xlu2 %v1510_v59, %s2874_s21 }
 0x7d8   :  { %v1500_v50 = vpop.permute.xlu2 %1499 }
 0x7d9   :  { %v1511_v20 = vmul.f32 %v1507_v53, %v1500_v50 }
 0x7df   :  { %v1470_v62 = vpop.permute.xlu1 %1469  ;;  %v1576_v44 = vpop.permute.xlu0 %1575 }
 0x7e0   :  { %v1472_v58 = vmul.f32 %v1470_v62, %v4390_v38  ;;  %v1538_v49 = vpop.permute.xlu2 %1537  ;;  %v1587_v8 = vmul.f32 %v1583_v0, %v1576_v44 }
 0x7e1   :  { %v1549_v26 = vmul.f32 %v1545_v4, %v1538_v49 }
 0x7e2   :  { %1477 = vrot.lane.b32.xlu1 %v1472_v58, %s2874_s21 }
 0x7e7   :  { %v1531_v52 = vpop.permute.xlu1 %1530 }
 0x7e8   :  { %v1548_v51 = vmul.f32 %v1544_v34, %v1531_v52  ;;  %v1441_v10 = vpop.permute.xlu2 %1440  ;;  %v1604_v13 = vpop.permute.xlu0 %1603 }
 0x7e9   :  { %v1454_v63 = vmul.f32 %v4383_v60, %v1441_v10  ;;  %v1612_v17 = vmul.f32 %v1604_v13, %v1359_v6 }
 0x7ea   :  { %1552 = vrot.lane.b32.xlu2 %v1548_v51, %s2874_s21  ;;  %1516 = vrot.lane.b32.xlu1 %v1511_v20, %s2874_s21 }
 0x7ef   :  { %v1569_v61 = vpop.permute.xlu1 %1568 }
 0x7f0   :  { %v1586_v12 = vmul.f32 %v1582_v48, %v1569_v61 }
 0x7f2   :  { %1590 = vrot.lane.b32.xlu2 %v1586_v12, %s2874_s21  ;;  %1554 = vrot.lane.b32.xlu1 %v1549_v26, %s2874_s21 }
 0x7f7   :  { %v1448_v37 = vpop.permute.xlu1 %1447 }
 0x7f8   :  { %v1455_v23 = vmul.f32 %v4390_v38, %v1448_v37 }
 0x7fa   :  { %1592 = vrot.lane.b32.xlu1 %v1587_v8, %s2874_s21  ;;  %1610 = vperm.xlu2 %2601, %v1605_v14  }
 0x825   :  { %v1476_v9 = vpop.permute.xlu2 %1475 }
 0x826   :  { %v1481_v22 = vadd.f32 %v1476_v9, %v1454_v63 }
 0x82d   :  { %v1515_v41 = vpop.permute.xlu2 %1514 }
 0x82e   :  { %v1520_v24 = vadd.f32 %v1515_v41, %v1481_v22 }
 0x844   :  { %v1553_v7 = vpop.permute.xlu2 %1552 }
 0x845   :  { %v1558_v16 = vadd.f32 %v1553_v7, %v1520_v24 }
 0x84c   :  { %v1591_v15 = vpop.permute.xlu2 %1590 }
 0x84d   :  { %v1596_v21 = vadd.f32 %v1591_v15, %v1558_v16 }
 0x84f   :  { %v1614_v18 = vsub.f32 %v1596_v21, %v1612_v17 }
 0x851   :  { %v1616_v5 = vmul.f32 %v1614_v18, %v1614_v18 }
 0x853   :  { %v1618_v11 = vsel %vm1363_vm8, %v1616_v5, 0.0 }
 0x854   :  { %v1478_v25 = vpop.permute.xlu1 %1477  ;;  %1619 = vadd.xlane.f32.xlu1 %v1618_v11  ;;  %v1611_v27 = vpop.permute.xlu2 %1610 }
 0x855   :  { %v1482_v40 = vadd.f32 %v1478_v25, %v1455_v23  ;;  %v1613_v30 = vmul.f32 %v1611_v27, %v1359_v6  ;;  %v1760_v27 = vld [vmem:[%s4766_s7 + $0x78] sm:$0xff] }
 0x856   :  { %1777 = vmatpush.msra.mxu2 %v1760_v27  ;;  %v1747_v27 = vld [vmem:[%s4766_s7 + $0x10] sm:$0xff] }
 0x85c   :  { %v1517_v1 = vpop.permute.xlu1 %1516 }
 0x85d   :  { %v1521_v32 = vadd.f32 %v1517_v1, %v1482_v40 }
 0x864   :  { %v1555_v3 = vpop.permute.xlu1 %1554 }
 0x865   :  { %v1559_v28 = vadd.f32 %v1555_v3, %v1521_v32 }
 0x86c   :  { %v1593_v29 = vpop.permute.xlu1 %1592 }
 0x86d   :  { %v1597_v31 = vadd.f32 %v1593_v29, %v1559_v28  ;;  %v1776_v28 = vld [vmem:[%s4766_s7 + $0xf8] sm:$0xff] }
 0x86e   :  { %1797 = vmatpush.msra.mxu3 %v1776_v28  ;;  %v1763_v28 = vld [vmem:[%s4766_s7 + $0x90] sm:$0xff] }
 0x86f   :  { %v1615_v33 = vsub.f32 %v1597_v31, %v1613_v30 }
 0x871   :  { %v1617_v35 = vmul.f32 %v1615_v33, %v1615_v33 }
 0x873   :  { %v1621_v39 = vsel %vm1363_vm8, %v1617_v35, 0.0 }
 0x874   :  { %1622 = vadd.xlane.f32.xlu0 %v1621_v39 }
 0x8c7   :  { %v1620_v43 = vpop.xlane.xlu1 %1619 }
 0x8c8   :  { %v1624_v47 = vadd.f32 1e-12, %v1620_v43 }
 0x8ca   :  { %2776 = vrsqrt.f32 %v1624_v47  ;;  %vm1632_vm12 = vweird.f32 %v1624_v47 }
 0x8d0   :  { %v2777_v36 = vpop.eup %2776 }
 0x8d1   :  { %v1627_v56 = vmul.f32 %v2777_v36, %v1624_v47  ;;  %vm1633_vm11 = vweird.f32 %v2777_v36 }
 0x8d2   :  { %vm1634_vm13 = vmor %vm1632_vm12, %vm1633_vm11  ;;  %vm1738_vm11 = vcmask 523264   ;;  %vm1740_vm12 = vcmask 785408  }
 0x8d3   :  { %v1628_v57 = vmul.f32 %v2777_v36, %v1627_v56 }
 0x8d5   :  { %v1629_v2 = vmul.f32 0.5, %v1628_v57 }
 0x8d7   :  { %v1630_v59 = vsub.f32 1.5, %v1629_v2 }
 0x8d9   :  { %v1631_v55 = vmul.f32 %v2777_v36, %v1630_v59 }
 0x8db   :  { %v1635_v62 = vsel %vm1634_vm13, %v2777_v36, %v1631_v55  ;;  %vm1823_vm13 = vcmask 130048  }
 0x8dc   :  { %v1646_v58 = vmul.f32 %v1635_v62, %v1614_v18 }
 0x8de   :  { %v1648_v50 = vmul.f32 %v1646_v58, %v1646_v58 }
 0x8e0   :  { %v1650_v53 = vsel %vm1363_vm8, %v1648_v50, 0.0 }
 0x8e1   :  { %1651 = vadd.xlane.f32.xlu2 %v1650_v53 }
 0x8e7   :  { %v1623_v34 = vpop.xlane.xlu0 %1622 }
 0x8e8   :  { %v1625_v52 = vadd.f32 1e-12, %v1623_v34 }
 0x8ea   :  { %2778 = vrsqrt.f32 %v1625_v52  ;;  %vm1642_vm15 = vweird.f32 %v1625_v52 }
 0x8f0   :  { %v2779_v20 = vpop.eup %2778 }
 0x8f1   :  { %v1637_v51 = vmul.f32 %v2779_v20, %v1625_v52  ;;  %vm1643_vm14 = vweird.f32 %v2779_v20 }
 0x8f2   :  { %vm1644_vm0 = vmor %vm1642_vm15, %vm1643_vm14 }
 0x8f3   :  { %v1638_v49 = vmul.f32 %v2779_v20, %v1637_v51 }
 0x8f5   :  { %v1639_v4 = vmul.f32 0.5, %v1638_v49 }
 0x8f7   :  { %v1640_v48 = vsub.f32 1.5, %v1639_v4 }
 0x8f9   :  { %v1641_v61 = vmul.f32 %v2779_v20, %v1640_v48 }
 0x8fb   :  { %v1645_v26 = vsel %vm1644_vm0, %v2779_v20, %v1641_v61 }
 0x8fc   :  { %v1647_v12 = vmul.f32 %v1645_v26, %v1615_v33 }
 0x8fe   :  { %v1649_v44 = vmul.f32 %v1647_v12, %v1647_v12 }
 0x900   :  { %v1653_v0 = vsel %vm1363_vm8, %v1649_v44, 0.0 }
 0x901   :  { %1654 = vadd.xlane.f32.xlu1 %v1653_v0 }
 0x954   :  { %v1652_v8 = vpop.xlane.xlu2 %1651 }
 0x955   :  { %v1656_v14 = vrot.slane %v1652_v8, 4 }
 0x957   :  { %v1657_v10 = vadd.f32 %v1656_v14, %v1652_v8 }
 0x959   :  { %v1658_v9 = vrot.slane %v1657_v10, 2 }
 0x95b   :  { %v1659_v41 = vadd.f32 %v1658_v9, %v1657_v10  ;;  %v1759_v10 = vld [vmem:[%s4766_s7 + $0x70] sm:$0xff] }
 0x95c   :  { %v1775_v9 = vld [vmem:[%s4766_s7 + $0xf0] sm:$0xff]  ;;  %1778 = vmatpush.msra.mxu2 %v1759_v10 }
 0x95d   :  { %v1660_v7 = vrot.slane %v1659_v41, 1  ;;  %1798 = vmatpush.msra.mxu3 %v1775_v9 }
 0x95f   :  { %v1661_v63 = vadd.f32 %v1660_v7, %v1659_v41  ;;  %v1758_v41 = vld [vmem:[%s4766_s7 + $0x68] sm:$0xff] }
 0x960   :  { %v1774_v7 = vld [vmem:[%s4766_s7 + $0xe8] sm:$0xff]  ;;  %1779 = vmatpush.msra.mxu2 %v1758_v41 }
 0x961   :  { %v1668_v22 = vadd.f32 1e-12, %v1661_v63  ;;  %v1773_v63 = vld [vmem:[%s4766_s7 + $0xe0] sm:$0xff]  ;;  %1799 = vmatpush.msra.mxu3 %v1774_v7 }
 0x963   :  { %2780 = vrsqrt.f32 %v1668_v22  ;;  %vm1676_vm2 = vweird.f32 %v1668_v22  ;;  %1800 = vmatpush.msra.mxu3 %v1773_v63 }
 0x969   :  { %v2781_v13 = vpop.eup %2780 }
 0x96a   :  { %v1671_v15 = vmul.f32 %v2781_v13, %v1668_v22  ;;  %vm1677_vm1 = vweird.f32 %v2781_v13  ;;  %v1756_v22 = vld [vmem:[%s4766_s7 + $0x58] sm:$0xff] }
 0x96b   :  { %vm1678_vm3 = vmor %vm1676_vm2, %vm1677_vm1 }
 0x96c   :  { %v1672_v18 = vmul.f32 %v2781_v13, %v1671_v15  ;;  %v1753_v15 = vld [vmem:[%s4766_s7 + $0x40] sm:$0xff] }
 0x96e   :  { %v1673_v25 = vmul.f32 0.5, %v1672_v18  ;;  %v1768_v18 = vld [vmem:[%s4766_s7 + $0xb8] sm:$0xff] }
 0x970   :  { %v1674_v1 = vsub.f32 1.5, %v1673_v25  ;;  %v1750_v25 = vld [vmem:[%s4766_s7 + $0x28] sm:$0xff] }
 0x972   :  { %v1675_v23 = vmul.f32 %v2781_v13, %v1674_v1  ;;  %v1766_v1 = vld [vmem:[%s4766_s7 + $0xa8] sm:$0xff] }
 0x974   :  { %v1655_v24 = vpop.xlane.xlu1 %1654  ;;  %v1679_v29 = vsel %vm1678_vm3, %v2781_v13, %v1675_v23  ;;  %v1771_v13 = vld [vmem:[%s4766_s7 + $0xd0] sm:$0xff]  ;;  %v1765_v23 = vld [vmem:[%s4766_s7 + $0xa0] sm:$0xff] }
 0x975   :  { %v1662_v6 = vrot.slane %v1655_v24, 4  ;;  %v1690_v33 = vmul.f32 %v1679_v29, %v1646_v58  ;;  %v2552_v29 = vld [vmem:[%s4762_s4 + $0x38] sm:$0xff] }
 0x976   :  { %1895 = vmatpush.msrb.mxu1 %v2552_v29 }
 0x977   :  { %v1663_v16 = vadd.f32 %v1662_v6, %v1655_v24  ;;  %v1709_v47 = vrot.slane %v1690_v33, 3  ;;  %v1731_v36 = vrot.slane %v1690_v33, 7  ;;  %v1703_v56 = vrot.slane %v1690_v33, 2  ;;  %v1772_v24 = vld [vmem:[%s4766_s7 + $0xd8] sm:$0xff]  ;;  %v1755_v6 = vld [vmem:[%s4766_s7 + $0x50] sm:$0xff] }
 0x978   :  { %v1725_v57 = vrot.slane %v1690_v33, 6  ;;  %v1698_v2 = vrot.slane %v1690_v33, 1  ;;  %v1719_v59 = vrot.slane %v1690_v33, 5  ;;  %v1715_v55 = vrot.slane %v1690_v33, 4  ;;  %1801 = vmatpush.msra.mxu3 %v1772_v24 }
 0x979   :  { %v1664_v37 = vrot.slane %v1663_v16, 2 }
 0x97a   :  { %1802 = vmatpush.msra.mxu3 %v1771_v13 }
 0x97b   :  { %v1665_v17 = vadd.f32 %v1664_v37, %v1663_v16  ;;  %v1754_v16 = vld [vmem:[%s4766_s7 + $0x48] sm:$0xff] }
 0x97c   :  { %v1770_v37 = vld [vmem:[%s4766_s7 + $0xc8] sm:$0xff] }
 0x97d   :  { %v1666_v21 = vrot.slane %v1665_v17, 1  ;;  %1803 = vmatpush.msra.mxu3 %v1770_v37 }
 0x97f   :  { %v1667_v5 = vadd.f32 %v1666_v21, %v1665_v17  ;;  %v1769_v17 = vld [vmem:[%s4766_s7 + $0xc0] sm:$0xff]  ;;  %v1752_v21 = vld [vmem:[%s4766_s7 + $0x38] sm:$0xff] }
 0x980   :  { %1804 = vmatpush.msra.mxu3 %v1769_v17 }
 0x981   :  { %v1669_v11 = vadd.f32 1e-12, %v1667_v5  ;;  %v1751_v5 = vld [vmem:[%s4766_s7 + $0x30] sm:$0xff] }
 0x982   :  { %1805 = vmatpush.msra.mxu3 %v1768_v18 }
 0x983   :  { %2782 = vrsqrt.f32 %v1669_v11  ;;  %vm1686_vm5 = vweird.f32 %v1669_v11 }
 0x989   :  { %v2783_v3 = vpop.eup %2782 }
 0x98a   :  { %v1681_v40 = vmul.f32 %v2783_v3, %v1669_v11  ;;  %vm1687_vm4 = vweird.f32 %v2783_v3  ;;  %v1767_v11 = vld [vmem:[%s4766_s7 + $0xb0] sm:$0xff] }
 0x98b   :  { %vm1688_vm6 = vmor %vm1686_vm5, %vm1687_vm4  ;;  %1806 = vmatpush.msra.mxu3 %v1767_v11 }
 0x98c   :  { %v1682_v32 = vmul.f32 %v2783_v3, %v1681_v40  ;;  %v1748_v40 = vld [vmem:[%s4766_s7 + $0x18] sm:$0xff] }
 0x98d   :  { %1807 = vmatpush.msra.mxu3 %v1766_v1 }
 0x98e   :  { %v1683_v30 = vmul.f32 0.5, %v1682_v32  ;;  %v1764_v32 = vld [vmem:[%s4766_s7 + $0x98] sm:$0xff] }
 0x98f   :  { %1808 = vmatpush.msra.mxu3 %v1765_v23 }
 0x990   :  { %v1684_v31 = vsub.f32 1.5, %v1683_v30  ;;  %v1746_v30 = vld [vmem:[%s4766_s7 + $0x8] sm:$0xff] }
 0x991   :  { %1809 = vmatpush.msra.mxu3 %v1764_v32 }
 0x992   :  { %v1685_v35 = vmul.f32 %v2783_v3, %v1684_v31  ;;  %v1762_v31 = vld [vmem:[%s4766_s7 + $0x88] sm:$0xff] }
 0x993   :  { %1810 = vmatpush.msra.mxu3 %v1763_v28 }
 0x994   :  { %v1689_v39 = vsel %vm1688_vm6, %v2783_v3, %v1685_v35  ;;  %v1749_v3 = vld [vmem:[%s4766_s7 + $0x20] sm:$0xff] }
 0x995   :  { %v1691_v43 = vmul.f32 %v1689_v39, %v1647_v12  ;;  %1811 = vmatpush.msra.mxu3 %v1762_v31  ;;  %v1745_v35 = vld [vmem:[%s4766_s7] sm:$0xff] }
 0x996   :  { %v1761_v39 = vld [vmem:[%s4766_s7 + $0x80] sm:$0xff] }
 0x997   :  { %v1710_v62 = vrot.slane %v1691_v43, 2  ;;  %v1732_v50 = vrot.slane %v1691_v43, 6  ;;  %v1704_v53 = vrot.slane %v1691_v43, 1  ;;  %v1726_v34 = vrot.slane %v1691_v43, 5  ;;  %1812 = vmatpush.msra.mxu3 %v1761_v39 }
 0x998   :  { %v1699_v52 = vsel %vm1695_vm7, %v1691_v43, %v1698_v2  ;;  %v1720_v58 = vrot.slane %v1691_v43, 4  ;;  %v1716_v20 = vrot.slane %v1691_v43, 3  ;;  %v1694_v51 = vrot.slane %v1691_v43, 7  ;;  %v2550_v43 = vld [vmem:[%s4762_s4 + $0x28] sm:$0xff] }
 0x999   :  { %v1711_v49 = vsel %vm1695_vm7, %v1710_v62, %v1709_v47  ;;  %v1733_v4 = vsel %vm1695_vm7, %v1732_v50, %v1731_v36  ;;  %v1705_v48 = vsel %vm1695_vm7, %v1704_v53, %v1703_v56  ;;  %v1727_v61 = vsel %vm1695_vm7, %v1726_v34, %v1725_v57  ;;  %v2549_v47 = vld [vmem:[%s4762_s4 + $0x20] sm:$0xff]  ;;  %v1818_v36 = vld [vmem:[%s4767_s8 + $0x8] sm:$0xff] }
 0x99a   :  { %v2614_v26 = vpack.i.bf16 %v1733_v4, %v1711_v49  ;;  %v2609_v12 = vpack.i.bf16 %v1727_v61, %v1705_v48  ;;  %v1721_v44 = vsel %vm1695_vm7, %v1720_v58, %v1719_v59  ;;  %v4426_v0 = vsel %vm1695_vm7, %v1716_v20, %v1715_v55  ;;  %1841 = vmatpush.msrb.mxu0 %v1818_v36  ;;  %v1817_v61 = vld [vmem:[%s4767_s8] sm:$0xff] }
 0x99b   :  { %v2604_v8 = vpack.i.bf16 %v1721_v44, %v1699_v52  ;;  %v4429_v14 = vsel %vm1695_vm7, %v1694_v51, %v1690_v33  ;;  %v2551_v33 = vld [vmem:[%s4762_s4 + $0x30] sm:$0xff] }
 0x99c   :  { %2615 = vrot.lane.b32.xlu1 %v2614_v26, %s2874_s21  ;;  %2610 = vrot.lane.b32.xlu2 %v2609_v12, %s2875_s3  ;;  %v2635_v26 = vld [vmem:[%s4763_s5 + $0x1] ss:$0 sm:$0xff] }
 0x99d   :  { %2605 = vrot.lane.b32.xlu0 %v2604_v8, %s2876_s28  ;;  %1896 = vmatpush.msrb.mxu1 %v2551_v33 }
 0x99e   :  { %1842 = vmatpush.msrb.mxu0 %v1817_v61 }
 0x99f   :  { %1897 = vmatpush.msrb.mxu1 %v2550_v43 }
 0x9a0   :  { %1930 = vmatpush.msra.mxu0 %v2552_v29 }
 0x9a1   :  { %1898 = vmatpush.msrb.mxu1 %v2549_v47 }
 0x9a2   :  { %1931 = vmatpush.msra.mxu0 %v2551_v33 }
 0x9a4   :  { %1932 = vmatpush.msra.mxu0 %v2550_v43 }
 0x9a5   :  { %1879 = vrot.lane.b32.xlu0 %v4342_v46, %s2875_s3 }
 0x9a6   :  { %1933 = vmatpush.msra.mxu0 %v2549_v47 }
 0x9ad   :  { %1914 = vrot.lane.b32.xlu0 %v4342_v46, %s2876_s28  ;;  %v1757_v46 = vld [vmem:[%s4766_s7 + $0x60] sm:$0xff] }
 0x9ae   :  { %1780 = vmatpush.msra.mxu2 %v1757_v46 }
 0x9b0   :  { %1781 = vmatpush.msra.mxu2 %v1756_v22 }
 0x9b2   :  { %1782 = vmatpush.msra.mxu2 %v1755_v6 }
 0x9b4   :  { %1783 = vmatpush.msra.mxu2 %v1754_v16 }
 0x9b6   :  { %1784 = vmatpush.msra.mxu2 %v1753_v15 }
 0x9b8   :  { %1785 = vmatpush.msra.mxu2 %v1752_v21 }
 0x9ba   :  { %1786 = vmatpush.msra.mxu2 %v1751_v5 }
 0x9bc   :  { %1787 = vmatpush.msra.mxu2 %v1750_v25 }
 0x9be   :  { %1788 = vmatpush.msra.mxu2 %v1749_v3 }
 0x9c0   :  { %1789 = vmatpush.msra.mxu2 %v1748_v40 }
 0x9c2   :  { %1790 = vmatpush.msra.mxu2 %v1747_v27 }
 0x9c4   :  { %1791 = vmatpush.msra.mxu2 %v1746_v30 }
 0x9c6   :  { %1792 = vmatpush.msra.mxu2 %v1745_v35 }
 0x9f6   :  { %v2611_v56 = vpop.permute.xlu2 %2610 }
 0x9f7   :  { %v2613_v62 = vunpack.i.h.bf16 %v2611_v56  ;;  %v2612_v50 = vunpack.i.l.bf16 %v2611_v56 }
 0xa0e   :  { %v2616_v57 = vpop.permute.xlu1 %2615 }
 0xa0f   :  { %v2606_v2 = vpop.permute.xlu0 %2605  ;;  %v2618_v53 = vunpack.i.h.bf16 %v2616_v57  ;;  %v2617_v34 = vunpack.i.l.bf16 %v2616_v57 }
 0xa10   :  { %v2608_v59 = vunpack.i.h.bf16 %v2606_v2  ;;  %v2607_v55 = vunpack.i.l.bf16 %v2606_v2 }
 0xa12   :  { %v1742_v52 = vsel %vm1363_vm8, %v4426_v0, %v2608_v59  ;;  %v1737_v58 = vsel %vm1363_vm8, %v4429_v14, %v2607_v55 }
 0xa13   :  { %v1739_v20 = vsel %vm1738_vm11, %v1737_v58, %v2612_v50  ;;  %v1743_v51 = vsel %vm1738_vm11, %v1742_v52, %v2613_v62  ;;  %v2015_v50 = vperm.slane %v4366_v45, 0  ;;  %v2054_v52 = vperm.slane %v4369_v19, 0 }
 0xa14   :  { %v1741_v49 = vsel %vm1740_vm12, %v1739_v20, %v2617_v34  ;;  %v1744_v4 = vsel %vm1740_vm12, %v1743_v51, %v2618_v53  ;;  %v2554_v51 = vld [vmem:[%s4765_s6 + $0x8] sm:$0xff]  ;;  %v2016_v19 = vperm.slane %v4364_v42, 0 }
 0xa15   :  { %1793 = vmatmul.f32.vlgmr.msra.gmra.mxu2 %v1741_v49  ;;  %1813 = vmatmul.f32.vlgmr.msra.gmra.mxu3 %v1744_v4 }
 0xa17   :  { %v1880_v48 = vpop.permute.xlu0 %1879 }
 0xa18   :  { %2555 = vmatmul.msk.f32.vlgmr.msrb.gmra.mxu1 %vm1363_vm8, %v1880_v48 }
 0xa1f   :  { %v1915_v9 = vpop.permute.xlu0 %1914 }
 0xa95   :  { %v1900_v12 = vpop.f32.mrf.mxu1 }
 0xa96   :  { %v1901_v44 = vadd.f32 %v2635_v26, %v1900_v12 }
 0xa98   :  { %v1794_v0 = vpop.f32.mrf.mxu2  ;;  %v1814_v8 = vpop.f32.mrf.mxu3  ;;  %v1903_v14 = vsel %vm1387_vm9, %v1901_v44, -inf }
 0xa99   :  { %v4559_v10 = vadd.f32 %v1814_v8, %v1794_v0  ;;  %1904 = vmax.xlane.f32.xlu2 %v1903_v14 }
 0xa9b   :  { %2547 = vmatmul.msk.f32.vlgmr.msrb.gmra.mxu0 %vm1823_vm13, %v4559_v10 }
 0xaa3   :  { %2556 = vmatmul.msk.f32.vlgmr.msra.gmra.mxu0 %vm1363_vm8, %v1915_v9  ;;  %v2088_v9 = vld [vmem:[#allocation1 + $0x6] ss:$9 sm:$0xff] }
 0xb0c   :  { %v1905_v41 = vpop.xlane.xlu2 %1904 }
 0xb0d   :  { %v1906_v7 = vsub.f32 %v1901_v44, %v1905_v41  ;;  %v2053_v44 = vperm.slane %v4371_v54, 0  ;;  %v2090_v41 = vld [vmem:[#allocation1 + $0x7] ss:$9 sm:$0xff] }
 0xb0f   :  { %v1907_v46 = vmul.f32 1.442695, %v1906_v7  ;;  %v2091_v7 = vperm.slane %v2088_v9, 0 }
 0xb11   :  { %2784 = vpow2.f32 %v1907_v46 }
 0xb17   :  { %v2785_v63 = vpop.eup %2784 }
 0xb18   :  { %v4564_v22 = vpop.f32.mrf.mxu0  ;;  %v1909_v24 = vsel %vm1387_vm9, %v2785_v63, 0.0 }
 0xb19   :  { %1910 = vadd.xlane.f32.xlu0 %v1909_v24 }
 0xb20   :  { %v1935_v6 = vpop.f32.mrf.mxu0 }
 0xb21   :  { %v1936_v13 = vadd.f32 %v2635_v26, %v1935_v6 }
 0xb23   :  { %v1938_v16 = vsel %vm1423_vm10, %v1936_v13, -inf }
 0xb24   :  { %1939 = vmax.xlane.f32.xlu1 %v1938_v16 }
 0xb8c   :  { %v1911_v5 = vpop.xlane.xlu0 %1910 }
 0xb97   :  { %v1940_v37 = vpop.xlane.xlu1 %1939 }
 0xb98   :  { %v1941_v15 = vsub.f32 %v1936_v13, %v1940_v37 }
 0xb9a   :  { %v1942_v17 = vmul.f32 1.442695, %v1941_v15 }
 0xb9c   :  { %2786 = vpow2.f32 %v1942_v17 }
 0xb9d   :  { %2788 = vrcp.f32 %v1911_v5 }
 0xba2   :  { %v2787_v21 = vpop.eup %2786 }
 0xba3   :  { %v1944_v18 = vsel %vm1423_vm10, %v2787_v21, 0.0  ;;  %v2789_v25 = vpop.eup %2788 }
 0xba4   :  { %1945 = vadd.xlane.f32.xlu2 %v1944_v18  ;;  %v1913_v23 = vmul.f32 %v2789_v25, %v2785_v63  ;;  %v2092_v63 = vperm.slane %v2090_v41, 0 }
 0xba6   :  { %v1956_v55 = vperm.slane %v1913_v23, 1  ;;  %v1949_v62 = vperm.slane %v1913_v23, 0 }
 0xc17   :  { %v1946_v11 = vpop.xlane.xlu2 %1945 }
 0xc18   :  { %2790 = vrcp.f32 %v1946_v11 }
 0xc1e   :  { %v2791_v1 = vpop.eup %2790 }
 0xc1f   :  { %v1948_v3 = vmul.f32 %v2791_v1, %v2787_v21 }
 0xc21   :  { %v1996_v40 = vperm.slane %v1948_v3, 2  ;;  %v1973_v32 = vperm.slane %v1948_v3, 1  ;;  %v1966_v27 = vperm.slane %v1948_v3, 0  ;;  %v1965_v28 = vadd.f32 %v1948_v3, %v1913_v23 }
 0xc22   :  { %v1993_v29 = vrot.slane %v1948_v3, 2  ;;  %v2031_v31 = vrot.slane %v1948_v3, 4  ;;  %v2041_v33 = vperm.slane %v1948_v3, 5  ;;  %v2003_v35 = vperm.slane %v1948_v3, 3 }
 0xc23   :  { %2001 = vperm.xlu2 %2601, %v1996_v40   ;;  %1978 = vperm.xlu0 %2603, %v1973_v32   ;;  %v2034_v43 = vperm.slane %v1948_v3, 4  ;;  %v2069_v47 = vrot.slane %v1948_v3, 6  ;;  %v2072_v56 = vperm.slane %v1948_v3, 6  ;;  %v2079_v2 = vperm.slane %v1948_v3, 7 }
 0xc24   :  { %1971 = vperm.xlu1 %2602, %v1966_v27   ;;  %v1995_v30 = vadd.f32 %v1993_v29, %v1965_v28 }
 0xc26   :  { %v2033_v39 = vadd.f32 %v2031_v31, %v1995_v30 }
 0xc28   :  { %v2071_v36 = vadd.f32 %v2069_v47, %v2033_v39 }
 0xc2a   :  { %v2107_v57 = vperm.slane %v2071_v36, 0  ;;  %v2114_v59 = vperm.slane %v2071_v36, 1 }
 0xc2b   :  { %2046 = vperm.xlu2 %2601, %v2041_v33   ;;  %2008 = vperm.xlu0 %2603, %v2003_v35  }
 0xc2c   :  { %2039 = vperm.xlu1 %2602, %v2034_v43  }
 0xc33   :  { %2077 = vperm.xlu0 %2603, %v2072_v56   ;;  %2112 = vperm.xlu2 %2601, %v2107_v57  }
 0xc34   :  { %2084 = vperm.xlu1 %2602, %v2079_v2  }
 0xc3b   :  { %2119 = vperm.xlu0 %2603, %v2114_v59   ;;  %1961 = vperm.xlu2 %2601, %v1956_v55  }
 0xc3c   :  { %1954 = vperm.xlu1 %2602, %v1949_v62  }
 0xc7d   :  { %v2002_v53 = vpop.permute.xlu2 %2001 }
 0xc7e   :  { %v2019_v34 = vmul.f32 %v2015_v50, %v2002_v53 }
 0xc80   :  { %2023 = vrot.lane.b32.xlu2 %v2019_v34, %s2874_s21 }
 0xc85   :  { %v2047_v58 = vpop.permute.xlu2 %2046 }
 0xc86   :  { %v2058_v20 = vmul.f32 %v2054_v52, %v2047_v58 }
 0xc88   :  { %2063 = vrot.lane.b32.xlu2 %v2058_v20, %s2874_s21 }
 0xc8d   :  { %v2113_v49 = vpop.permute.xlu2 %2112 }
 0xc8e   :  { %v2121_v4 = vmul.f32 %v2554_v51, %v2113_v49 }
 0xc90   :  { %2125 = vrot.lane.b32.xlu2 %v2121_v4, %s2875_s3 }
 0xc95   :  { %v1979_v48 = vpop.permute.xlu0 %1978  ;;  %v1962_v16 = vpop.permute.xlu2 %1961 }
 0xc96   :  { %v1981_v45 = vmul.f32 %v1979_v48, %v4390_v38  ;;  %v1972_v61 = vpop.permute.xlu1 %1971  ;;  %v1964_v3 = vmul.f32 %v1962_v16, %v4390_v38 }
 0xc97   :  { %v1980_v26 = vmul.f32 %v1972_v61, %v4383_v60 }
 0xc98   :  { %1986 = vrot.lane.b32.xlu1 %v1981_v45, %s2874_s21 }
 0xc99   :  { %1984 = vrot.lane.b32.xlu0 %v1980_v26, %s2874_s21 }
 0xc9d   :  { %v2009_v12 = vpop.permute.xlu0 %2008 }
 0xc9e   :  { %v2020_v0 = vmul.f32 %v2016_v19, %v2009_v12  ;;  %v2040_v8 = vpop.permute.xlu1 %2039 }
 0xc9f   :  { %v2057_v14 = vmul.f32 %v2053_v44, %v2040_v8 }
 0xca1   :  { %2061 = vrot.lane.b32.xlu1 %v2057_v14, %s2874_s21  ;;  %2025 = vrot.lane.b32.xlu0 %v2020_v0, %s2874_s21 }
 0xca5   :  { %v2078_v46 = vpop.permute.xlu0 %2077 }
 0xca6   :  { %v2095_v24 = vmul.f32 %v2091_v7, %v2078_v46  ;;  %v2085_v6 = vpop.permute.xlu1 %2084 }
 0xca7   :  { %v2096_v13 = vmul.f32 %v2092_v63, %v2085_v6 }
 0xca9   :  { %2101 = vrot.lane.b32.xlu1 %v2096_v13, %s2874_s21  ;;  %2099 = vrot.lane.b32.xlu0 %v2095_v24, %s2874_s21 }
 0xcad   :  { %v2120_v42 = vpop.permute.xlu0 %2119 }
 0xcae   :  { %v2122_v54 = vmul.f32 %v2554_v51, %v2120_v42  ;;  %v1955_v37 = vpop.permute.xlu1 %1954 }
 0xcaf   :  { %v1963_v18 = vmul.f32 %v1955_v37, %v4383_v60 }
 0xcb1   :  { %2127 = vrot.lane.b32.xlu0 %v2122_v54, %s2875_s3 }
 0xcda   :  { %v2024_v15 = vpop.permute.xlu2 %2023 }
 0xce2   :  { %v2064_v5 = vpop.permute.xlu2 %2063 }
 0xcea   :  { %v2126_v30 = vpop.permute.xlu2 %2125 }
 0xd0a   :  { %v1987_v17 = vpop.permute.xlu1 %1986 }
 0xd0b   :  { %v1985_v21 = vpop.permute.xlu0 %1984  ;;  %v1991_v40 = vadd.f32 %v1987_v17, %v1964_v3 }
 0xd0c   :  { %v1990_v25 = vadd.f32 %v1985_v21, %v1963_v18 }
 0xd0e   :  { %v2029_v23 = vadd.f32 %v2024_v15, %v1990_v25  ;;  %v2572_v25 = vld [vmem:[%s4766_s7 + $0x178] sm:$0xff] }
 0xd0f   :  { %2308 = vmatpush.msra.mxu1 %v2572_v25  ;;  %v2579_v25 = vld [vmem:[%s4766_s7 + $0x1b0] sm:$0xff] }
 0xd13   :  { %v2026_v11 = vpop.permute.xlu0 %2025  ;;  %v2062_v1 = vpop.permute.xlu1 %2061 }
 0xd14   :  { %v2067_v32 = vadd.f32 %v2062_v1, %v2029_v23  ;;  %v2030_v28 = vadd.f32 %v2026_v11, %v1991_v40  ;;  %v2588_v1 = vld [vmem:[%s4766_s7 + $0x1f8] sm:$0xff] }
 0xd15   :  { %2328 = vmatpush.msrb.mxu0 %v2588_v1  ;;  %v2562_v1 = vld [vmem:[%s4766_s7 + $0x128] sm:$0xff] }
 0xd16   :  { %v2068_v35 = vadd.f32 %v2064_v5, %v2030_v28 }
 0xd1b   :  { %v2100_v27 = vpop.permute.xlu0 %2099  ;;  %v2102_v33 = vpop.permute.xlu1 %2101 }
 0xd1c   :  { %v2105_v29 = vadd.f32 %v2100_v27, %v2067_v32  ;;  %v2106_v43 = vadd.f32 %v2102_v33, %v2068_v35 }
 0xd1e   :  { %v2131_v31 = vsub.f32 %v2105_v29, %v2126_v30 }
 0xd20   :  { %v2133_v39 = vmul.f32 %v2131_v31, %v2131_v31 }
 0xd22   :  { %2137 = vrot.lane.b32.xlu1 %v2133_v39, %s2875_s3 }
 0xd23   :  { %v2128_v60 = vpop.permute.xlu0 %2127 }
 0xd24   :  { %v2132_v47 = vsub.f32 %v2106_v43, %v2128_v60 }
 0xd26   :  { %v2134_v36 = vmul.f32 %v2132_v47, %v2132_v47 }
 0xd28   :  { %2139 = vrot.lane.b32.xlu2 %v2134_v36, %s2875_s3 }
 0xd82   :  { %v2140_v38 = vpop.permute.xlu2 %2139 }
 0xd83   :  { %v2146_v56 = vsel %vm1363_vm8, %v2140_v38, 0.0 }
 0xd84   :  { %2147 = vadd.xlane.f32.xlu1 %v2146_v56 }
 0xd94   :  { %v2138_v57 = vpop.permute.xlu1 %2137 }
 0xd95   :  { %v2143_v2 = vsel %vm1363_vm8, %v2138_v57, 0.0 }
 0xd96   :  { %2144 = vadd.xlane.f32.xlu0 %v2143_v2 }
 0xdf7   :  { %v2148_v59 = vpop.xlane.xlu1 %2147 }
 0xdf8   :  { %v2150_v55 = vadd.f32 1e-12, %v2148_v59 }
 0xdfa   :  { %2792 = vrsqrt.f32 %v2150_v55  ;;  %vm2167_vm1 = vweird.f32 %v2150_v55 }
 0xe00   :  { %v2793_v50 = vpop.eup %2792 }
 0xe01   :  { %v2162_v34 = vmul.f32 %v2793_v50, %v2150_v55  ;;  %vm2168_vm0 = vweird.f32 %v2793_v50 }
 0xe02   :  { %vm2169_vm2 = vmor %vm2167_vm1, %vm2168_vm0 }
 0xe03   :  { %v2163_v52 = vmul.f32 %v2793_v50, %v2162_v34 }
 0xe05   :  { %v2164_v51 = vmul.f32 0.5, %v2163_v52 }
 0xe07   :  { %v2165_v48 = vsub.f32 1.5, %v2164_v51 }
 0xe09   :  { %v2145_v62 = vpop.xlane.xlu0 %2144  ;;  %v2166_v26 = vmul.f32 %v2793_v50, %v2165_v48 }
 0xe0a   :  { %v2149_v53 = vadd.f32 1e-12, %v2145_v62 }
 0xe0b   :  { %v2170_v0 = vsel %vm2169_vm2, %v2793_v50, %v2166_v26 }
 0xe0c   :  { %2794 = vrsqrt.f32 %v2149_v53  ;;  %vm2157_vm14 = vweird.f32 %v2149_v53  ;;  %v2172_v8 = vmul.f32 %v2170_v0, %v2132_v47 }
 0xe0e   :  { %v2174_v14 = vmul.f32 %v2172_v8, %v2172_v8 }
 0xe12   :  { %v2795_v58 = vpop.eup %2794 }
 0xe13   :  { %v2152_v20 = vmul.f32 %v2795_v58, %v2149_v53  ;;  %vm2158_vm9 = vweird.f32 %v2795_v58 }
 0xe14   :  { %vm2159_vm15 = vmor %vm2157_vm14, %vm2158_vm9 }
 0xe15   :  { %v2153_v49 = vmul.f32 %v2795_v58, %v2152_v20 }
 0xe17   :  { %v2154_v4 = vmul.f32 0.5, %v2153_v49 }
 0xe19   :  { %v2155_v45 = vsub.f32 1.5, %v2154_v4 }
 0xe1b   :  { %v2156_v61 = vmul.f32 %v2795_v58, %v2155_v45 }
 0xe1d   :  { %v2160_v19 = vsel %vm2159_vm15, %v2795_v58, %v2156_v61 }
 0xe1e   :  { %v2171_v12 = vmul.f32 %v2160_v19, %v2131_v31 }
 0xe20   :  { %v2173_v44 = vmul.f32 %v2171_v12, %v2171_v12 }
 0xe22   :  { %2177 = vrot.lane.b32.xlu2 %v2173_v44, %s2875_s3 }
 0xe2a   :  { %2179 = vrot.lane.b32.xlu2 %v2174_v14, %s2875_s3 }
 0xe7c   :  { %v2178_v9 = vpop.permute.xlu2 %2177 }
 0xe7d   :  { %v2183_v41 = vsel %vm1363_vm8, %v2178_v9, 0.0 }
 0xe7e   :  { %2184 = vadd.xlane.f32.xlu2 %v2183_v41  ;;  %v2571_v41 = vld [vmem:[%s4766_s7 + $0x170] sm:$0xff] }
 0xe7f   :  { %2309 = vmatpush.msra.mxu1 %v2571_v41 }
 0xe84   :  { %v2180_v7 = vpop.permute.xlu2 %2179 }
 0xe85   :  { %v2186_v46 = vsel %vm1363_vm8, %v2180_v7, 0.0  ;;  %v2587_v7 = vld [vmem:[%s4766_s7 + $0x1f0] sm:$0xff] }
 0xe86   :  { %2187 = vadd.xlane.f32.xlu0 %v2186_v46  ;;  %v2570_v46 = vld [vmem:[%s4766_s7 + $0x168] sm:$0xff]  ;;  %2329 = vmatpush.msrb.mxu0 %v2587_v7 }
 0xe87   :  { %2310 = vmatpush.msra.mxu1 %v2570_v46 }
 0xef1   :  { %v2185_v63 = vpop.xlane.xlu2 %2184 }
 0xef2   :  { %v2189_v24 = vrot.slane %v2185_v63, 4 }
 0xef4   :  { %v2190_v6 = vadd.f32 %v2189_v24, %v2185_v63  ;;  %v2586_v63 = vld [vmem:[%s4766_s7 + $0x1e8] sm:$0xff]  ;;  %v2569_v24 = vld [vmem:[%s4766_s7 + $0x160] sm:$0xff] }
 0xef5   :  { %2330 = vmatpush.msrb.mxu0 %v2586_v63  ;;  %2311 = vmatpush.msra.mxu1 %v2569_v24 }
 0xef6   :  { %v2191_v13 = vrot.slane %v2190_v6, 2 }
 0xef8   :  { %v2192_v42 = vadd.f32 %v2191_v13, %v2190_v6  ;;  %v2585_v6 = vld [vmem:[%s4766_s7 + $0x1e0] sm:$0xff]  ;;  %v2568_v13 = vld [vmem:[%s4766_s7 + $0x158] sm:$0xff] }
 0xef9   :  { %v2188_v54 = vpop.xlane.xlu0 %2187  ;;  %2331 = vmatpush.msrb.mxu0 %v2585_v6  ;;  %2312 = vmatpush.msra.mxu1 %v2568_v13  ;;  %v2402_v6 = vld [vmem:[%s4769_s10 + $0x18] sm:$0xff]  ;;  %v2401_v13 = vld [vmem:[%s4769_s10 + $0x10] sm:$0xff] }
 0xefa   :  { %v2193_v16 = vrot.slane %v2192_v42, 1  ;;  %v2195_v37 = vrot.slane %v2188_v54, 4  ;;  %2420 = vmatpush.msrb.mxu3 %v2402_v6 }
 0xefc   :  { %v2194_v15 = vadd.f32 %v2193_v16, %v2192_v42  ;;  %v2196_v17 = vadd.f32 %v2195_v37, %v2188_v54  ;;  %v2584_v42 = vld [vmem:[%s4766_s7 + $0x1d8] sm:$0xff]  ;;  %v2567_v54 = vld [vmem:[%s4766_s7 + $0x150] sm:$0xff]  ;;  %v2566_v37 = vld [vmem:[%s4766_s7 + $0x148] sm:$0xff]  ;;  %2421 = vmatpush.msrb.mxu3 %v2401_v13 }
 0xefd   :  { %v2583_v16 = vld [vmem:[%s4766_s7 + $0x1d0] sm:$0xff]  ;;  %2332 = vmatpush.msrb.mxu0 %v2584_v42  ;;  %2313 = vmatpush.msra.mxu1 %v2567_v54  ;;  %v2637_v42 = vld [vmem:[%s4768_s9 + $0x1] ss:$0 sm:$0xff] }
 0xefe   :  { %v2201_v21 = vadd.f32 1e-12, %v2194_v15  ;;  %v2197_v18 = vrot.slane %v2196_v17, 2  ;;  %v2582_v15 = vld [vmem:[%s4766_s7 + $0x1c8] sm:$0xff] }
 0xeff   :  { %2333 = vmatpush.msrb.mxu0 %v2583_v16  ;;  %2314 = vmatpush.msra.mxu1 %v2566_v37 }
 0xf00   :  { %2796 = vrsqrt.f32 %v2201_v21  ;;  %v2198_v5 = vadd.f32 %v2197_v18, %v2196_v17  ;;  %vm2209_vm4 = vweird.f32 %v2201_v21  ;;  %v2565_v17 = vld [vmem:[%s4766_s7 + $0x140] sm:$0xff]  ;;  %v2564_v18 = vld [vmem:[%s4766_s7 + $0x138] sm:$0xff] }
 0xf01   :  { %2334 = vmatpush.msrb.mxu0 %v2582_v15  ;;  %2315 = vmatpush.msra.mxu1 %v2565_v17 }
 0xf02   :  { %v2199_v11 = vrot.slane %v2198_v5, 1 }
 0xf03   :  { %2316 = vmatpush.msra.mxu1 %v2564_v18 }
 0xf04   :  { %v2200_v3 = vadd.f32 %v2199_v11, %v2198_v5  ;;  %v2580_v5 = vld [vmem:[%s4766_s7 + $0x1b8] sm:$0xff]  ;;  %v2563_v11 = vld [vmem:[%s4766_s7 + $0x130] sm:$0xff] }
 0xf05   :  { %2317 = vmatpush.msra.mxu1 %v2563_v11 }
 0xf06   :  { %v2797_v23 = vpop.eup %2796  ;;  %v2202_v40 = vadd.f32 1e-12, %v2200_v3  ;;  %v2578_v3 = vld [vmem:[%s4766_s7 + $0x1a8] sm:$0xff] }
 0xf07   :  { %v2204_v32 = vmul.f32 %v2797_v23, %v2201_v21  ;;  %vm2210_vm3 = vweird.f32 %v2797_v23  ;;  %v2581_v21 = vld [vmem:[%s4766_s7 + $0x1c0] sm:$0xff]  ;;  %2318 = vmatpush.msra.mxu1 %v2562_v1 }
 0xf08   :  { %2798 = vrsqrt.f32 %v2202_v40  ;;  %vm2211_vm5 = vmor %vm2209_vm4, %vm2210_vm3  ;;  %vm2219_vm9 = vweird.f32 %v2202_v40  ;;  %2335 = vmatpush.msrb.mxu0 %v2581_v21  ;;  %vm2483_vm3 = vcmask 1024  }
 0xf09   :  { %v2205_v27 = vmul.f32 %v2797_v23, %v2204_v32  ;;  %v2560_v32 = vld [vmem:[%s4766_s7 + $0x118] sm:$0xff] }
 0xf0a   :  { %2336 = vmatpush.msrb.mxu0 %v2580_v5 }
 0xf0b   :  { %v2206_v28 = vmul.f32 0.5, %v2205_v27  ;;  %v2576_v27 = vld [vmem:[%s4766_s7 + $0x198] sm:$0xff] }
 0xf0c   :  { %2337 = vmatpush.msrb.mxu0 %v2579_v25 }
 0xf0d   :  { %v2207_v29 = vsub.f32 1.5, %v2206_v28  ;;  %v2559_v28 = vld [vmem:[%s4766_s7 + $0x110] sm:$0xff] }
 0xf0e   :  { %v2799_v30 = vpop.eup %2798  ;;  %2338 = vmatpush.msrb.mxu0 %v2578_v3 }
 0xf0f   :  { %v2208_v31 = vmul.f32 %v2797_v23, %v2207_v29  ;;  %v2214_v33 = vmul.f32 %v2799_v30, %v2202_v40  ;;  %vm2220_vm6 = vweird.f32 %v2799_v30  ;;  %v2577_v40 = vld [vmem:[%s4766_s7 + $0x1a0] sm:$0xff]  ;;  %v2575_v29 = vld [vmem:[%s4766_s7 + $0x190] sm:$0xff] }
 0xf10   :  { %vm2221_vm14 = vmor %vm2219_vm9, %vm2220_vm6  ;;  %2339 = vmatpush.msrb.mxu0 %v2577_v40 }
 0xf11   :  { %v2215_v35 = vmul.f32 %v2799_v30, %v2214_v33  ;;  %v2212_v39 = vsel %vm2211_vm5, %v2797_v23, %v2208_v31  ;;  %v2561_v23 = vld [vmem:[%s4766_s7 + $0x120] sm:$0xff]  ;;  %v2574_v31 = vld [vmem:[%s4766_s7 + $0x188] sm:$0xff] }
 0xf12   :  { %v2223_v47 = vmul.f32 %v2212_v39, %v2171_v12  ;;  %2319 = vmatpush.msra.mxu1 %v2561_v23  ;;  %2340 = vmatpush.msrb.mxu0 %v2576_v27  ;;  %v2557_v33 = vld [vmem:[%s4766_s7 + $0x100] sm:$0xff]  ;;  %v2590_v39 = vld [vmem:[%s4767_s8 + $0x18] sm:$0xff] }
 0xf13   :  { %v2216_v43 = vmul.f32 0.5, %v2215_v35  ;;  %v2573_v35 = vld [vmem:[%s4766_s7 + $0x180] sm:$0xff]  ;;  %2373 = vmatpush.msrb.mxu2 %v2590_v39 }
 0xf14   :  { %v2241_v57 = vrot.slane %v2223_v47, 3  ;;  %v2263_v2 = vrot.slane %v2223_v47, 7  ;;  %v2232_v59 = vrot.slane %v2223_v47, 1  ;;  %v2253_v55 = vrot.slane %v2223_v47, 5  ;;  %2320 = vmatpush.msra.mxu1 %v2560_v32  ;;  %2341 = vmatpush.msrb.mxu0 %v2575_v29  ;;  %v2638_v29 = vld [vmem:[%s4770_s11] ss:$0 sm:$0xff] }
 0xf15   :  { %v2217_v60 = vsub.f32 1.5, %v2216_v43  ;;  %v2247_v62 = vrot.slane %v2223_v47, 4  ;;  %v2237_v50 = vrot.slane %v2223_v47, 2  ;;  %v2259_v58 = vrot.slane %v2223_v47, 6  ;;  %v2589_v43 = vld [vmem:[%s4767_s8 + $0x10] sm:$0xff] }
 0xf16   :  { %2321 = vmatpush.msra.mxu1 %v2559_v28  ;;  %2342 = vmatpush.msrb.mxu0 %v2574_v31  ;;  %v19_v28 = vstv %s4772_s13 }
 0xf17   :  { %v2218_v36 = vmul.f32 %v2799_v30, %v2217_v60  ;;  %2374 = vmatpush.msrb.mxu2 %v2589_v43  ;;  %20 = vst [vmem:[#allocation2] sm:$0x1] %v19_v28 }
 0xf18   :  { %2343 = vmatpush.msrb.mxu0 %v2573_v35 }
 0xf19   :  { %v2222_v38 = vsel %vm2221_vm14, %v2799_v30, %v2218_v36  ;;  %v2558_v30 = vld [vmem:[%s4766_s7 + $0x108] sm:$0xff] }
 0xf1a   :  { %v2224_v56 = vmul.f32 %v2222_v38, %v2172_v8  ;;  %2322 = vmatpush.msra.mxu1 %v2558_v30 }
 0xf1c   :  { %v2242_v53 = vrot.slane %v2224_v56, 2  ;;  %v2264_v34 = vrot.slane %v2224_v56, 6  ;;  %v2254_v52 = vrot.slane %v2224_v56, 4  ;;  %v2227_v20 = vrot.slane %v2224_v56, 7  ;;  %2323 = vmatpush.msra.mxu1 %v2557_v33 }
 0xf1d   :  { %v2248_v51 = vrot.slane %v2224_v56, 3  ;;  %v2238_v49 = vrot.slane %v2224_v56, 1  ;;  %v2260_v4 = vrot.slane %v2224_v56, 5  ;;  %v2233_v61 = vsel %vm1695_vm7, %v2224_v56, %v2232_v59 }
 0xf1e   :  { %v2243_v48 = vsel %vm1695_vm7, %v2242_v53, %v2241_v57  ;;  %v2265_v45 = vsel %vm1695_vm7, %v2264_v34, %v2263_v2  ;;  %v2255_v26 = vsel %vm1695_vm7, %v2254_v52, %v2253_v55  ;;  %v2228_v44 = vsel %vm1695_vm7, %v2227_v20, %v2223_v47  ;;  %v2636_v20 = vld [vmem:[%s4768_s9] ss:$0 sm:$0xff]  ;;  %v2639_v43 = vld [vmem:[#allocation2] ss:$0 sm:$0xff] }
 0xf1f   :  { %v2629_v19 = vpack.i.bf16 %v2265_v45, %v2243_v48  ;;  %v2624_v12 = vpack.i.bf16 %v2255_v26, %v2233_v61  ;;  %v2249_v0 = vsel %vm1695_vm7, %v2248_v51, %v2247_v62  ;;  %v4611_v14 = vsel %vm1695_vm7, %v2238_v49, %v2237_v50  ;;  %v2400_v48 = vld [vmem:[%s4769_s10 + $0x8] sm:$0xff]  ;;  %v2399_v45 = vld [vmem:[%s4769_s10] sm:$0xff] }
 0xf20   :  { %v2619_v8 = vpack.i.bf16 %v2249_v0, %v2228_v44  ;;  %v4614_v9 = vsel %vm1695_vm7, %v2260_v4, %v2259_v58  ;;  %v1845_v51 = vadd.f32 %v2636_v20, %v4564_v22  ;;  %2443 = vmatpush.msra.mxu2 %v2400_v48 }
 0xf21   :  { %2630 = vrot.lane.b32.xlu2 %v2629_v19, %s2876_s28  ;;  %2625 = vrot.lane.b32.xlu0 %v2624_v12, %s2874_s21 }
 0xf22   :  { %2620 = vrot.lane.b32.xlu1 %v2619_v8, %s2875_s3  ;;  %v2548_v49 = vmul.f32 -1.442695, %v1845_v51  ;;  %2444 = vmatpush.msra.mxu2 %v2399_v45 }
 0xf24   :  { %2800 = vpow2.f32 %v2548_v49 }
 0xf2a   :  { %v2801_v4 = vpop.eup %2800 }
 0xf2b   :  { %v1850_v61 = vadd.f32 1.0, %v2801_v4 }
 0xf2d   :  { %2802 = vrcp.f32 %v1850_v61  ;;  %v1862_v0 = vand.u32 2147483648, %v1850_v61  ;;  %vm1856_vm7 = vweird.f32 %v1850_v61  ;;  %v1860_v41 = vand.u32 2147483647, %v1850_v61 }
 0xf2f   :  { %v1863_v46 = vor.u32 1.1754944e-38, %v1862_v0 }
 0xf33   :  { %v2803_v26 = vpop.eup %2802 }
 0xf34   :  { %v1852_v19 = vmul.f32 %v2803_v26, %v1850_v61 }
 0xf36   :  { %v1853_v12 = vsub.f32 1.0, %v1852_v19 }
 0xf38   :  { %v1854_v44 = vmul.f32 %v2803_v26, %v1853_v12 }
 0xf3a   :  { %v1855_v22 = vadd.f32 %v2803_v26, %v1854_v44 }
 0xf7b   :  { %v2631_v47 = vpop.permute.xlu2 %2630 }
 0xf7c   :  { %v2633_v59 = vunpack.i.h.bf16 %v2631_v47  ;;  %v2632_v55 = vunpack.i.l.bf16 %v2631_v47 }
 0xf93   :  { %v2626_v60 = vpop.permute.xlu0 %2625 }
 0xf94   :  { %v2628_v36 = vunpack.i.h.bf16 %v2626_v60  ;;  %v2627_v38 = vunpack.i.l.bf16 %v2626_v60  ;;  %v2621_v56 = vpop.permute.xlu1 %2620 }
 0xf95   :  { %v2623_v57 = vunpack.i.h.bf16 %v2621_v56  ;;  %v2622_v2 = vunpack.i.l.bf16 %v2621_v56 }
 0xf97   :  { %v2272_v62 = vsel %vm1363_vm8, %v2623_v57, %v2628_v36  ;;  %v2269_v50 = vsel %vm1363_vm8, %v2622_v2, %v2627_v38  ;;  %vm1857_vm8 = vweird.f32 %v2803_v26 }
 0xf98   :  { %v2270_v53 = vsel %vm1738_vm11, %v2269_v50, %v4611_v14  ;;  %v2273_v34 = vsel %vm1738_vm11, %v2272_v62, %v4614_v9  ;;  %vm1858_vm11 = vmor %vm1856_vm7, %vm1857_vm8 }
 0xf99   :  { %v2271_v52 = vsel %vm1740_vm12, %v2270_v53, %v2632_v55  ;;  %v2274_v58 = vsel %vm1740_vm12, %v2273_v34, %v2633_v59  ;;  %v1859_v7 = vsel %vm1858_vm11, %v2803_v26, %v1855_v22  ;;  %vm1861_vm12 = vcmp.eq.f32.partialorder %v1860_v41, 8.507059e+37 }
 0xf9a   :  { %2324 = vmatmul.f32.vlgmr.msra.gmra.mxu1 %v2271_v52  ;;  %2344 = vmatmul.f32.vlgmr.msrb.gmra.mxu0 %v2274_v58  ;;  %v1864_v63 = vsel %vm1861_vm12, %v1863_v46, %v1859_v7 }
 0xf9b   :  { %v1866_v24 = vmul.f32 %v1864_v63, %v4559_v10  ;;  %v2455_v10 = vld [vmem:[%s4771_s12] sm:$0xff] }
 0xf9c   :  { %2478 = vmatpush.msra.mxu3 %v2455_v10 }
0x1017   :  { %v2325_v8 = vpop.f32.mrf.mxu1  ;;  %v2345_v14 = vpop.f32.mrf.mxu0 }
0x1018   :  { %v2346_v9 = vadd.f32 %v2345_v14, %v2325_v8 }
0x101a   :  { %2592 = vmatmul.msk.f32.vlgmr.msrb.gmra.mxu2 %vm1823_vm13, %v2346_v9 }
0x1022   :  { %2595 = vmatmul.msk.f32.vlgmr.msra.gmra.mxu2 %vm1823_vm13, %v1866_v24 }
0x109d   :  { %v2376_v54 = vpop.f32.mrf.mxu2 }
0x109e   :  { %v2377_v16 = vadd.f32 %v2637_v42, %v2376_v54 }
0x10a0   :  { %v2593_v37 = vmul.f32 -1.442695, %v2377_v16 }
0x10a2   :  { %2804 = vpow2.f32 %v2593_v37 }
0x10a5   :  { %v2446_v30 = vpop.f32.mrf.mxu2 }
0x10a8   :  { %v2805_v15 = vpop.eup %2804 }
0x10a9   :  { %v2382_v17 = vadd.f32 1.0, %v2805_v15 }
0x10ab   :  { %2806 = vrcp.f32 %v2382_v17  ;;  %v2394_v11 = vand.u32 2147483648, %v2382_v17  ;;  %v2392_v1 = vand.u32 2147483647, %v2382_v17  ;;  %vm2388_vm0 = vweird.f32 %v2382_v17 }
0x10ad   :  { %v2395_v23 = vor.u32 1.1754944e-38, %v2394_v11  ;;  %vm2393_vm2 = vcmp.eq.f32.partialorder %v2392_v1, 8.507059e+37 }
0x10b1   :  { %v2807_v21 = vpop.eup %2806 }
0x10b2   :  { %v2384_v18 = vmul.f32 %v2807_v21, %v2382_v17  ;;  %vm2389_vm15 = vweird.f32 %v2807_v21 }
0x10b3   :  { %vm2390_vm1 = vmor %vm2388_vm0, %vm2389_vm15 }
0x10b4   :  { %v2385_v5 = vsub.f32 1.0, %v2384_v18 }
0x10b6   :  { %v2386_v25 = vmul.f32 %v2807_v21, %v2385_v5 }
0x10b8   :  { %v2387_v3 = vadd.f32 %v2807_v21, %v2386_v25 }
0x10ba   :  { %v2391_v40 = vsel %vm2390_vm1, %v2807_v21, %v2387_v3 }
0x10bb   :  { %v2396_v32 = vsel %vm2393_vm2, %v2395_v23, %v2391_v40 }
0x10bc   :  { %v2398_v27 = vmul.f32 %v2396_v32, %v2346_v9 }
0x10be   :  { %2594 = vmatmul.msk.f32.vlgmr.msrb.gmra.mxu3 %vm1823_vm13, %v2398_v27 }
0x1141   :  { %v2423_v31 = vpop.f32.mrf.mxu3 }
0x1142   :  { %v2447_v33 = vadd.f32 %v2446_v30, %v2423_v31 }
0x1144   :  { %v2453_v35 = vadd.f32 %v2638_v29, %v2447_v33 }
0x1146   :  { %v2454_v39 = vmax.f32 %v2453_v35, 0.0 }
0x1148   :  { %2596 = vmatmul.msk.f32.vlgmr.msra.gmra.mxu3 %vm1423_vm10, %v2454_v39 }
0x11cb   :  { %v2480_v60 = vpop.f32.mrf.mxu3 }
0x11cc   :  { %v2481_v47 = vadd.f32 %v2639_v43, %v2480_v60 }
0x11ce   :  { %2484 = vst.msk [vmem:[%s4773_s14] sm:$0x3] %vm2483_vm3, %v2481_v47 }

</bundles_post_ra>
